<compile_context>
chip_gen: v7x
topology: tpu7x:2x2x1
jax: 0.10.0
libtpu: 0.0.40
codegen_flags: <defaults>
</compile_context>

<pallas_src>
import jax
import jax.numpy as jnp
from jax.experimental import pallas as pl
from jax.experimental.pallas import tpu as pltpu

Z_PAD = 128   # latent dim 100 padded to 128
N_OUT = 784   # real output width
N_PAD = 896   # 7 * 128, lane-dense padded output width


def _round_up(n, m):
    return (n + m - 1) // m * m


def _generator_kernel(x_ref, w1_ref, b1_ref, w2_ref, b2_ref, w3_ref, b3_ref,
                      o_ref):
    # Entire problem fits in VMEM: three fused MXU matmuls with VPU relu /
    # EUP tanh epilogues, no HBM round-trips for activations.
    x = x_ref[...]                                             # (bm, 128)
    h1 = jnp.dot(x, w1_ref[...], preferred_element_type=jnp.float32)
    h1 = jnp.maximum(h1 + b1_ref[...], 0.0)                    # (bm, 256)
    h2 = jnp.dot(h1, w2_ref[...], preferred_element_type=jnp.float32)
    h2 = jnp.maximum(h2 + b2_ref[...], 0.0)                    # (bm, 512)
    h3 = jnp.dot(h2, w3_ref[...], preferred_element_type=jnp.float32)
    o_ref[...] = jnp.tanh(h3 + b3_ref[...]).astype(o_ref.dtype)  # (bm, 896)


def generator_forward(x, params, *, bm=256):
    """x: (B, 100) float32 -> (B, 1, 28, 28) float32."""
    w1, b1, w2, b2, w3, b3 = params
    B, Z = x.shape
    assert Z == 100
    assert w1.shape == (100, 256) and w3.shape == (512, 784)

    # Effective batch tile: big enough to feed the MXU, never larger than the
    # (128-rounded) batch itself.
    bm = min(bm, _round_up(B, 128))
    Bp = _round_up(B, bm)

    # Pad latent dim 100 -> 128 (zeros contribute nothing) and batch B -> Bp.
    x_p = jnp.pad(x, ((0, Bp - B), (0, Z_PAD - Z)))
    w1_p = jnp.pad(w1, ((0, Z_PAD - Z), (0, 0)))               # (128, 256)
    # Pad final layer 784 -> 896 for a lane-dense output store.
    w3_p = jnp.pad(w3, ((0, 0), (0, N_PAD - N_OUT)))           # (512, 896)
    b3_p = jnp.pad(b3, ((0, 0), (0, N_PAD - N_OUT)))           # (1, 896)

    out_padded = pl.pallas_call(
        _generator_kernel,
        out_shape=jax.ShapeDtypeStruct((Bp, N_PAD), jnp.float32),
        grid_spec=pltpu.PrefetchScalarGridSpec(
            num_scalar_prefetch=0,
            grid=(Bp // bm,),
            in_specs=[
                # batch tile of the latent input
                pl.BlockSpec((bm, Z_PAD), lambda i: (i, 0)),
                # weights / biases: full-array blocks, resident across grid
                pl.BlockSpec((Z_PAD, 256), lambda i: (0, 0)),
                pl.BlockSpec((1, 256), lambda i: (0, 0)),
                pl.BlockSpec((256, 512), lambda i: (0, 0)),
                pl.BlockSpec((1, 512), lambda i: (0, 0)),
                pl.BlockSpec((512, N_PAD), lambda i: (0, 0)),
                pl.BlockSpec((1, N_PAD), lambda i: (0, 0)),
            ],
            out_specs=pl.BlockSpec((bm, N_PAD), lambda i: (i, 0)),
        ),
        compiler_params=pltpu.CompilerParams(
            dimension_semantics=("parallel",)),
    )(x_p, w1_p, b1, w2, b2, w3_p, b3_p)

    # Drop batch / lane padding, then torch's out.view(B, 1, 28, 28)  (NCHW).
    # If a downstream consumer accepts (B, 784), prefer returning the flat
    # slab and deferring this lane-sparse reshape.
    out_flat = out_padded[:B, :N_OUT]
    return out_flat.reshape(B, 1, 28, 28)


def init_params(key):
    """Deterministic synthetic parameters matching nn.Linear shapes.

    nn.Linear(in, out) holds weight (out, in); we store the transpose
    (in, out) so the kernel computes x @ W directly. Biases are kept as
    (1, out) 2-D rows for TPU-friendly broadcasting.
    """
    ks = jax.random.split(key, 6)

    def linear(kw, kb, fan_in, fan_out):
        bound = 1.0 / jnp.sqrt(fan_in)
        w = jax.random.uniform(kw, (fan_in, fan_out), jnp.float32,
                               minval=-bound, maxval=bound)
        b = jax.random.uniform(kb, (1, fan_out), jnp.float32,
                               minval=-bound, maxval=bound)
        return w, b

    w1, b1 = linear(ks[0], ks[1], 100, 256)
    w2, b2 = linear(ks[2], ks[3], 256, 512)
    w3, b3 = linear(ks[4], ks[5], 512, 784)
    return (w1, b1, w2, b2, w3, b3)


def _reference(x, params):
    w1, b1, w2, b2, w3, b3 = params
    h1 = jnp.maximum(x @ w1 + b1, 0.0)
    h2 = jnp.maximum(h1 @ w2 + b2, 0.0)
    return jnp.tanh(h2 @ w3 + b3).reshape(x.shape[0], 1, 28, 28)


if __name__ == "__main__":
    key = jax.random.PRNGKey(0)
    k_param, k_x = jax.random.split(key)
    params = init_params(k_param)

    # Latent dim fixed at 100 by the module.  B=512 with bm=256 gives a
    # 2-step parallel grid (both v7x TensorCores busy) while staying small.
    B = 512
    x = jax.random.normal(k_x, (B, 100), dtype=jnp.float32)

    out = generator_forward(x, params, bm=256)
    out = jax.block_until_ready(out)

    assert out.shape == (B, 1, 28, 28), out.shape
    ref = _reference(x, params)
    assert jnp.allclose(out, ref, atol=1e-5, rtol=1e-5)

    # Also exercise a batch that is not a multiple of the tile.
    x_small = jax.random.normal(k_x, (8, 100), dtype=jnp.float32)
    out_small = jax.block_until_ready(generator_forward(x_small, params))
    assert out_small.shape == (8, 1, 28, 28)
    assert jnp.allclose(out_small, _reference(x_small, params),
                        atol=1e-5, rtol=1e-5)

    print("KERNEL_OK")
</pallas_src>

<mosaic_0001>
module attributes {stable_mosaic.version = 11 : i64} {
  func.func @_generator_kernel(%arg0: i32, %arg1: memref<256x128xf32, #tpu.memory_space<vmem>>, %arg2: memref<128x256xf32, #tpu.memory_space<vmem>>, %arg3: memref<1x256xf32, #tpu.memory_space<vmem>>, %arg4: memref<256x512xf32, #tpu.memory_space<vmem>>, %arg5: memref<1x512xf32, #tpu.memory_space<vmem>>, %arg6: memref<512x896xf32, #tpu.memory_space<vmem>>, %arg7: memref<1x896xf32, #tpu.memory_space<vmem>>, %arg8: memref<256x896xf32, #tpu.memory_space<vmem>>) attributes {dimension_semantics = [#tpu.dimension_semantics<parallel>], iteration_bounds = array<i64: 2>, scalar_prefetch = 0 : i64, scratch_operands = 0 : i64, tpu.core_type = #tpu.core_type<tc>, window_params = [{transform_indices = @transform_0, window_bounds = array<i64: 256, 128>}, {pipeline_mode = #tpu.pipeline_mode<synchronous>, transform_indices = @transform_1, window_bounds = array<i64: 128, 256>}, {pipeline_mode = #tpu.pipeline_mode<synchronous>, transform_indices = @transform_2, window_bounds = array<i64: 1, 256>}, {pipeline_mode = #tpu.pipeline_mode<synchronous>, transform_indices = @transform_3, window_bounds = array<i64: 256, 512>}, {pipeline_mode = #tpu.pipeline_mode<synchronous>, transform_indices = @transform_4, window_bounds = array<i64: 1, 512>}, {pipeline_mode = #tpu.pipeline_mode<synchronous>, transform_indices = @transform_5, window_bounds = array<i64: 512, 896>}, {pipeline_mode = #tpu.pipeline_mode<synchronous>, transform_indices = @transform_6, window_bounds = array<i64: 1, 896>}, {transform_indices = @transform_7, window_bounds = array<i64: 256, 896>}]} {
    %c0 = arith.constant 0 : index
    %c0_0 = arith.constant 0 : index
    %0 = vector.load %arg1[%c0, %c0_0] : memref<256x128xf32, #tpu.memory_space<vmem>>, vector<256x128xf32>
    %c0_1 = arith.constant 0 : index
    %c0_2 = arith.constant 0 : index
    %1 = vector.load %arg2[%c0_1, %c0_2] : memref<128x256xf32, #tpu.memory_space<vmem>>, vector<128x256xf32>
    %cst = arith.constant dense<0.000000e+00> : vector<256x256xf32>
    %2 = tpu.matmul %0, %1, %cst {dimension_numbers = #tpu.dot_dimension_numbers<[1], [0], [0], [1], [0, 0, 1, 1], [], []>} : vector<256x128xf32>, vector<128x256xf32>, vector<256x256xf32> -> vector<256x256xf32>
    %c0_3 = arith.constant 0 : index
    %c0_4 = arith.constant 0 : index
    %3 = vector.load %arg3[%c0_3, %c0_4] : memref<1x256xf32, #tpu.memory_space<vmem>>, vector<1x256xf32>
    %4 = vector.broadcast %3 : vector<1x256xf32> to vector<256x256xf32>
    %5 = arith.addf %2, %4 : vector<256x256xf32>
    %cst_5 = arith.constant 0.000000e+00 : f32
    %6 = vector.broadcast %cst_5 : f32 to vector<256x256xf32>
    %7 = arith.maximumf %5, %6 : vector<256x256xf32>
    %c0_6 = arith.constant 0 : index
    %c0_7 = arith.constant 0 : index
    %8 = vector.load %arg4[%c0_6, %c0_7] : memref<256x512xf32, #tpu.memory_space<vmem>>, vector<256x512xf32>
    %cst_8 = arith.constant dense<0.000000e+00> : vector<256x512xf32>
    %9 = tpu.matmul %7, %8, %cst_8 {dimension_numbers = #tpu.dot_dimension_numbers<[1], [0], [0], [1], [0, 0, 1, 1], [], []>} : vector<256x256xf32>, vector<256x512xf32>, vector<256x512xf32> -> vector<256x512xf32>
    %c0_9 = arith.constant 0 : index
    %c0_10 = arith.constant 0 : index
    %10 = vector.load %arg5[%c0_9, %c0_10] : memref<1x512xf32, #tpu.memory_space<vmem>>, vector<1x512xf32>
    %11 = vector.broadcast %10 : vector<1x512xf32> to vector<256x512xf32>
    %12 = arith.addf %9, %11 : vector<256x512xf32>
    %cst_11 = arith.constant 0.000000e+00 : f32
    %13 = vector.broadcast %cst_11 : f32 to vector<256x512xf32>
    %14 = arith.maximumf %12, %13 : vector<256x512xf32>
    %c0_12 = arith.constant 0 : index
    %c0_13 = arith.constant 0 : index
    %15 = vector.load %arg6[%c0_12, %c0_13] : memref<512x896xf32, #tpu.memory_space<vmem>>, vector<512x896xf32>
    %cst_14 = arith.constant dense<0.000000e+00> : vector<256x896xf32>
    %16 = tpu.matmul %14, %15, %cst_14 {dimension_numbers = #tpu.dot_dimension_numbers<[1], [0], [0], [1], [0, 0, 1, 1], [], []>} : vector<256x512xf32>, vector<512x896xf32>, vector<256x896xf32> -> vector<256x896xf32>
    %c0_15 = arith.constant 0 : index
    %c0_16 = arith.constant 0 : index
    %17 = vector.load %arg7[%c0_15, %c0_16] : memref<1x896xf32, #tpu.memory_space<vmem>>, vector<1x896xf32>
    %18 = vector.broadcast %17 : vector<1x896xf32> to vector<256x896xf32>
    %19 = arith.addf %16, %18 : vector<256x896xf32>
    %20 = math.tanh %19 : vector<256x896xf32>
    %c0_17 = arith.constant 0 : index
    %c0_18 = arith.constant 0 : index
    %21 = vector.load %arg8[%c0_17, %c0_18] : memref<256x896xf32, #tpu.memory_space<vmem>>, vector<256x896xf32>
    tpu.vector_store %arg8[%c0_17, %c0_18], %20 {strides = array<i32>} : memref<256x896xf32, #tpu.memory_space<vmem>>, vector<256x896xf32>,
    return
  }
  func.func @transform_0(%arg0: i32) -> (i32, i32) {
    %c0_i32 = arith.constant 0 : i32
    %c0_i32_0 = arith.constant 0 : i32
    return %arg0, %c0_i32 : i32, i32
  }
  func.func @transform_1(%arg0: i32) -> (i32, i32) {
    %c0_i32 = arith.constant 0 : i32
    %c0_i32_0 = arith.constant 0 : i32
    %c0_i32_1 = arith.constant 0 : i32
    return %c0_i32, %c0_i32_0 : i32, i32
  }
  func.func @transform_2(%arg0: i32) -> (i32, i32) {
    %c0_i32 = arith.constant 0 : i32
    %c0_i32_0 = arith.constant 0 : i32
    %c0_i32_1 = arith.constant 0 : i32
    return %c0_i32, %c0_i32_0 : i32, i32
  }
  func.func @transform_3(%arg0: i32) -> (i32, i32) {
    %c0_i32 = arith.constant 0 : i32
    %c0_i32_0 = arith.constant 0 : i32
    %c0_i32_1 = arith.constant 0 : i32
    return %c0_i32, %c0_i32_0 : i32, i32
  }
  func.func @transform_4(%arg0: i32) -> (i32, i32) {
    %c0_i32 = arith.constant 0 : i32
    %c0_i32_0 = arith.constant 0 : i32
    %c0_i32_1 = arith.constant 0 : i32
    return %c0_i32, %c0_i32_0 : i32, i32
  }
  func.func @transform_5(%arg0: i32) -> (i32, i32) {
    %c0_i32 = arith.constant 0 : i32
    %c0_i32_0 = arith.constant 0 : i32
    %c0_i32_1 = arith.constant 0 : i32
    return %c0_i32, %c0_i32_0 : i32, i32
  }
  func.func @transform_6(%arg0: i32) -> (i32, i32) {
    %c0_i32 = arith.constant 0 : i32
    %c0_i32_0 = arith.constant 0 : i32
    %c0_i32_1 = arith.constant 0 : i32
    return %c0_i32, %c0_i32_0 : i32, i32
  }
  func.func @transform_7(%arg0: i32) -> (i32, i32) {
    %c0_i32 = arith.constant 0 : i32
    %c0_i32_0 = arith.constant 0 : i32
    return %arg0, %c0_i32 : i32, i32
  }
}

</mosaic_0001>

<bundles_post_ra>
// kernel: tpu_custom_call.1
= control target key start
LH: loop header
LB: loop body
LE: loop exit
PB: predicated region body
PF: predicated region fallthrough
CT: control target
= control target key end

     0   :  { %s8882_s0 = inlined_call_operand.hbm [shape: f32[512,128], index: 0, kind: input, shape index: {}]   ;;  %s8883_s1 = inlined_call_operand.hbm [shape: f32[128,256], index: 1, kind: input, shape index: {}]   ;;  %s8884_s2 = inlined_call_operand.hbm [shape: f32[1,256], index: 2, kind: input, shape index: {}]   ;;  %s8885_s3 = inlined_call_operand.hbm [shape: f32[256,512], index: 3, kind: input, shape index: {}]   ;;  %s8886_s4 = inlined_call_operand.hbm [shape: f32[1,512], index: 4, kind: input, shape index: {}]   ;;  %s8887_s5 = inlined_call_operand.hbm [shape: f32[512,896], index: 5, kind: input, shape index: {}]   ;;  %s8888_s6 = inlined_call_operand.hbm [shape: f32[1,896], index: 6, kind: input, shape index: {}]   ;;  %s8889_s7 = inlined_call_operand.hbm [shape: f32[512,896], index: 7, kind: output, shape index: {}]  }
   0x1   :  { %9071 = sst [smem:[#allocation109_spill]] %s8883_s1 }
   0x2   :  { %12 = vsyncpa [#allocation3], 0 }
   0x3   :  { %14 = vsyncpa [#allocation3 + $0x1], 0 }
   0x4   :  { %15 = vsyncpa [#allocation6], 0 }
   0x5   :  { %16 = vsyncpa [#allocation9], 0 }
   0x6   :  { %17 = vsyncpa [#allocation12], 0 }
   0x7   :  { %18 = vsyncpa [#allocation4], 0 }
   0x8   :  { %20 = vsyncpa [#allocation4 + $0x1], 0  ;;  %s6710_s24 = smov 0   ;;  %s6712_s25 = smov 0  }
   0x9   :  { %s6714_s26 = smov 0   ;;  %s6716_s27 = smov 0  }
   0xa LB: > { %s6650_s28 = smov [#allocation5]   ;;  %s6731_s30 = sadd.s32 4294967295, %s6648_s27   ;;  %s6648_s27 = sphi %s6716_s27, %s9316_s27   ;;  %s6644_s26 = sphi %s6714_s26, %s9315_s26   ;;  %s6640_s25 = sphi %s6712_s25, %s9314_s25   ;;  %s6636_s24 = sphi %s6710_s24, %s9313_s24  }
   0xb   : > { %s221_s29 = sshll.u32 %s6650_s28, 4  ;;  %p4640_p0 = scmp.ge.s32.totalorder %s6648_s27, 1  ;;  %s6736_s29 = int_to_ptr.vmem [resolvable:$true] %s221_s29 }
   0xc   : > { %p8890_p1 = scmp.eq.s32.totalorder %s6731_s30, 0  ;;  %p209_p2 = scmp.lt.s32.totalorder %s6648_s27, 3 }
   0xd   : > { %s6651_s9 = smov [#allocation8]   ;;  %s6652_s12 = smov [#allocation11]  }
   0xe   : > { %p6738_p3 = pnand %p4640_p0, %p209_p2  ;;  %s245_s10 = sshll.u32 %s6651_s9, 4  ;;  %s6751_s10 = int_to_ptr.vmem [resolvable:$true] %s245_s10 }
   0xf   : > { %s6753_s13 = sshll.u32 %s6652_s12, 4  ;;  %s9074_s1 = sld [smem:[#allocation109_spill]]  ;;  %s270_s13 = int_to_ptr.vmem [resolvable:$true] %s6753_s13 }
  0x10   : > { %s9072_s8 = scalar_select %p6738_p3, 1, 0 }
  0x11   : > { %p5831_p5 = pneg %p6738_p3 }
  0x13   : > { %p6747_p6 = pnand %p5831_p5, %p8890_p1 }
  0x15   : > { %s6372_s16 = scalar_lea.hbm %s9074_s1, 4096  ;;  %p6763_p8 = pneg %p6747_p6 }
  0x16   : > { %p6373_p7 = scmp.ne.s32.totalorder %s9074_s1, %s6372_s16  ;;  %p6379_p11 = scmp.lt.u32.totalorder %s6372_s16, %s9074_s1 }
  0x18   : > { %p6375_p9 = pnand %p6763_p8, %p6373_p7 }
  0x1a   : > { %p6376_p10 = pneg %p6375_p9 }
  0x1c   : > { %p6381_p12 = pnand %p6379_p11, %p6376_p10 }
  0x1e   : > { %6384 = shalt.err (!%p6381_p12)
}
  0x1f   : > { %s6385_s22 = scalar_lea.vmem %s6736_s29, 4096  ;;  %p6393_p5 = scmp.lt.s32.totalorder %s6736_s29, %s6736_s29 }
  0x20   : > { %p6386_p13 = scmp.ne.s32.totalorder %s6736_s29, %s6385_s22  ;;  %p6394_p4 = scmp.lt.s32.totalorder %s6385_s22, %s6385_s22 }
  0x22   : > { %p6388_p0 = pnand %p6386_p13, %p6763_p8  ;;  %p6395_p7 = por %p6394_p4, %p6393_p5 }
  0x24   : > { %p6389_p2 = pneg %p6388_p0 }
  0x26   : > { %p6396_p9 = pnand %p6395_p7, %p6389_p2 }
  0x28   : > { %6399 = shalt.err (!%p6396_p9)
}
  0x29   : > { %s6653_s23 = smov 256   ;;  %s6654_s28 = smov 16  }
  0x2a   : > { %5834 = dma.hbm_to_vmem [thread:$0]  (!%p6747_p6), %s9074_s1, 4096, %s6736_s29, [#allocation6], %s6653_s23, %s6653_s23, %s6654_s28  }
  0x2b   : > { %s6400_s16 = scalar_lea.hbm %s8885_s3, 16384 }
  0x2c   : > { %p6401_p4 = scmp.ne.s32.totalorder %s8885_s3, %s6400_s16  ;;  %p6407_p12 = scmp.lt.u32.totalorder %s6400_s16, %s8885_s3 }
  0x2e   : > { %p6403_p10 = pnand %p6401_p4, %p6763_p8 }
  0x30   : > { %p6404_p11 = pneg %p6403_p10 }
  0x32   : > { %p6409_p13 = pnand %p6407_p12, %p6404_p11 }
  0x34   : > { %6412 = shalt.err (!%p6409_p13)
}
  0x35   : > { %s6413_s29 = scalar_lea.vmem %s6751_s10, 16384  ;;  %p6421_p7 = scmp.lt.s32.totalorder %s6751_s10, %s6751_s10 }
  0x36   : > { %p6414_p0 = scmp.ne.s32.totalorder %s6751_s10, %s6413_s29  ;;  %p6422_p9 = scmp.lt.s32.totalorder %s6413_s29, %s6413_s29 }
  0x38   : > { %p6416_p2 = pnand %p6414_p0, %p6763_p8  ;;  %p6423_p4 = por %p6422_p9, %p6421_p7 }
  0x3a   : > { %p6417_p5 = pneg %p6416_p2 }
  0x3c   : > { %p6424_p10 = pnand %p6423_p4, %p6417_p5 }
  0x3e   : > { %6427 = shalt.err (!%p6424_p10)
}
  0x3f   : > { %s6655_s22 = smov 512   ;;  %s6656_s23 = smov 32  }
  0x40   : > { %5840 = dma.hbm_to_vmem [thread:$0]  (!%p6747_p6), %s8885_s3, 16384, %s6751_s10, [#allocation9], %s6655_s22, %s6655_s22, %s6656_s23  }
  0x41   : > { %s6428_s15 = scalar_lea.hbm %s8887_s5, 57344 }
  0x42   : > { %p6429_p11 = scmp.ne.s32.totalorder %s8887_s5, %s6428_s15  ;;  %p6435_p0 = scmp.lt.u32.totalorder %s6428_s15, %s8887_s5 }
  0x44   : > { %p6431_p12 = pnand %p6429_p11, %p6763_p8 }
  0x46   : > { %p6432_p13 = pneg %p6431_p12 }
  0x48   : > { %p6437_p2 = pnand %p6435_p0, %p6432_p13 }
  0x4a   : > { %6440 = shalt.err (!%p6437_p2)
}
  0x4b   : > { %s6441_s21 = scalar_lea.vmem %s270_s13, 57344  ;;  %p6449_p4 = scmp.lt.s32.totalorder %s270_s13, %s270_s13 }
  0x4c   : > { %p6442_p5 = scmp.ne.s32.totalorder %s270_s13, %s6441_s21  ;;  %p6450_p10 = scmp.lt.s32.totalorder %s6441_s21, %s6441_s21 }
  0x4e   : > { %p6444_p7 = pnand %p6442_p5, %p6763_p8  ;;  %p6451_p1 = por %p6450_p10, %p6449_p4 }
  0x50   : > { %p6445_p9 = pneg %p6444_p7 }
  0x52   : > { %p6452_p3 = pnand %p6451_p1, %p6445_p9 }
  0x54   : > { %6455 = shalt.err (!%p6452_p3)
}
  0x55   : > { %s6657_s10 = smov 896   ;;  %s6658_s29 = smov 56  }
  0x56   : > { %5846 = dma.hbm_to_vmem [thread:$0]  (!%p6747_p6), %s8887_s5, 57344, %s270_s13, [#allocation12], %s6657_s10, %s6657_s10, %s6658_s29  }
  0x57   : > { %s6659_s28 = smov [#allocation7]   ;;  %s6660_s12 = smov [#allocation10]  }
  0x58   : > { %s235_s9 = sshll.u32 %s6659_s28, 4  ;;  %s259_s14 = sshll.u32 %s6660_s12, 4  ;;  %s236_s9 = int_to_ptr.vmem [resolvable:$true] %s235_s9  ;;  %s260_s14 = int_to_ptr.vmem [resolvable:$true] %s259_s14 }
  0x59   : > { %s6456_s17 = scalar_lea.hbm %s8884_s2, 32 }
  0x5a   : > { %p6457_p1 = scmp.ne.s32.totalorder %s8884_s2, %s6456_s17  ;;  %p6463_p12 = scmp.lt.u32.totalorder %s6456_s17, %s8884_s2 }
  0x5c   : > { %p6459_p3 = pnand %p6457_p1, %p6763_p8 }
  0x5e   : > { %p6460_p11 = pneg %p6459_p3 }
  0x60   : > { %p6465_p13 = pnand %p6463_p12, %p6460_p11 }
  0x62   : > { %6468 = shalt.err (!%p6465_p13)
}
  0x63   : > { %s6469_s13 = scalar_lea.vmem %s236_s9, 32  ;;  %p6477_p7 = scmp.lt.s32.totalorder %s236_s9, %s236_s9 }
  0x64   : > { %p6470_p0 = scmp.ne.s32.totalorder %s236_s9, %s6469_s13  ;;  %p6478_p9 = scmp.lt.s32.totalorder %s6469_s13, %s6469_s13 }
  0x66   : > { %p6472_p2 = pnand %p6470_p0, %p6763_p8  ;;  %p6479_p4 = por %p6478_p9, %p6477_p7 }
  0x68   : > { %p6473_p5 = pneg %p6472_p2 }
  0x6a   : > { %p6480_p10 = pnand %p6479_p4, %p6473_p5 }
  0x6c   : > { %6483 = shalt.err (!%p6480_p10)
}
  0x6d   : > { %5837 = dma.hbm_to_vmem [thread:$0]  (!%p6747_p6), %s8884_s2, 32, %s236_s9, [#allocation6]  }
  0x6e   : > { %s6484_s23 = scalar_lea.hbm %s8886_s4, 64 }
  0x6f   : > { %p6485_p1 = scmp.ne.s32.totalorder %s8886_s4, %s6484_s23  ;;  %p6491_p12 = scmp.lt.u32.totalorder %s6484_s23, %s8886_s4 }
  0x71   : > { %p6487_p3 = pnand %p6485_p1, %p6763_p8 }
  0x73   : > { %p6488_p11 = pneg %p6487_p3 }
  0x75   : > { %p6493_p13 = pnand %p6491_p12, %p6488_p11 }
  0x77   : > { %6496 = shalt.err (!%p6493_p13)
}
  0x78   : > { %s6497_s17 = scalar_lea.vmem %s260_s14, 64  ;;  %p6505_p7 = scmp.lt.s32.totalorder %s260_s14, %s260_s14 }
  0x79   : > { %p6498_p0 = scmp.ne.s32.totalorder %s260_s14, %s6497_s17  ;;  %p6506_p9 = scmp.lt.s32.totalorder %s6497_s17, %s6497_s17 }
  0x7b   : > { %p6500_p2 = pnand %p6498_p0, %p6763_p8  ;;  %p6507_p4 = por %p6506_p9, %p6505_p7 }
  0x7d   : > { %p6501_p5 = pneg %p6500_p2 }
  0x7f   : > { %p6508_p10 = pnand %p6507_p4, %p6501_p5 }
  0x81   : > { %6511 = shalt.err (!%p6508_p10)
}
  0x82   : > { %5843 = dma.hbm_to_vmem [thread:$0]  (!%p6747_p6), %s8886_s4, 64, %s260_s14, [#allocation9]  }
  0x83   : > { %s6661_s20 = smov [#allocation13]   ;;  %s6512_s29 = scalar_lea.hbm %s8888_s6, 112 }
  0x84   : > { %s283_s21 = sshll.u32 %s6661_s20, 4  ;;  %p6513_p1 = scmp.ne.s32.totalorder %s8888_s6, %s6512_s29  ;;  %s284_s21 = int_to_ptr.vmem [resolvable:$true] %s283_s21 }
  0x85   : > { %p6519_p12 = scmp.lt.u32.totalorder %s6512_s29, %s8888_s6 }
  0x86   : > { %p6515_p3 = pnand %p6513_p1, %p6763_p8 }
  0x88   : > { %p6516_p11 = pneg %p6515_p3 }
  0x8a   : > { %p6521_p13 = pnand %p6519_p12, %p6516_p11 }
  0x8c   : > { %6524 = shalt.err (!%p6521_p13)
}
  0x8d   : > { %s6525_s14 = scalar_lea.vmem %s284_s21, 112  ;;  %s6532_s12 = scalar_lea.vmem %s284_s21, 128 }
  0x8e   : > { %p6526_p0 = scmp.ne.s32.totalorder %s284_s21, %s6525_s14  ;;  %p6533_p7 = scmp.lt.s32.totalorder %s284_s21, %s284_s21 }
  0x8f   : > { %p6534_p9 = scmp.lt.s32.totalorder %s6532_s12, %s6525_s14 }
  0x90   : > { %p6528_p2 = pnand %p6526_p0, %p6763_p8 }
  0x91   : > { %p6535_p4 = por %p6534_p9, %p6533_p7 }
  0x92   : > { %p6529_p5 = pneg %p6528_p2 }
  0x94   : > { %p6536_p10 = pnand %p6535_p4, %p6529_p5 }
  0x96   : > { %6539 = shalt.err (!%p6536_p10)
}
  0x97   : > { %5849 = dma.hbm_to_vmem [thread:$0]  (!%p6747_p6), %s8888_s6, 112, %s284_s21, [#allocation12]  }
  0x98   : > { %s4639_s19 = sadd.s32 4294967294, %s6648_s27   ;;  %s6882_s11 = sadd.s32 1, %s6648_s27  }
  0x99   : > { %s30_s17 = ssub.s32 %s6648_s27, %s6882_s11  ;;  %s33_s9 = sadd.s32 1, %s6644_s26 }
  0x9a   : > { %p31_p8 = scmp.eq.s32.totalorder %s30_s17, 0  ;;  %p40_p1 = scmp.ne.s32.totalorder %s6644_s26, %s6640_s25 }
  0x9b   : > { %p41_p3 = scmp.eq.s32.totalorder %s6648_s27, 0  ;;  %p46_p11 = scmp.ne.s32.totalorder %s6640_s25, %s6636_s24 }
  0x9c   : > { %s6893_s18 = scalar_select %p31_p8, %s6644_s26, %s33_s9  }
  0x9d   : > { %p6895_p12 = por %p41_p3, %p40_p1  ;;  %p9077_p13 = scmp.eq.s32.totalorder %s6731_s30, 0 }
  0x9e   : > { %p196_p0 = scmp.eq.s32.totalorder %s6731_s30, 1  ;;  %p202_p2 = scmp.eq.s32.totalorder %s4639_s19, 1 }
  0x9f   : > { %p6901_p6 = por %p9077_p13, %p46_p11  ;;  %p5864_p5 = scmp.lt.s32.totalorder %s6648_s27, 2 }
  0xa0   : > { %s294_s13 = sand.u32 1, %s6644_s26   ;;  %p6908_p7 = por %p196_p0, %p40_p1 }
  0xa1   : > { %p6912_p9 = por %p202_p2, %p46_p11  ;;  %s4648_s1 = sshll.u32 %s294_s13, 8 }
  0xa2   : > { %s9079_s10 = scalar_select %p6908_p7, 1, 0 }
  0xa3   : > { %s9080_s29 = scalar_select %p6912_p9, 1, 0 }
  0xa4   : > { %s4664_s22 = sshll.u32 %s6648_s27, 12  ;;  %s298_s12 = scalar_lea.vmem [#allocation2], %s4648_s1 }
  0xa5   : > { %s6920_s14 = scalar_lea.hbm %s8882_s0, %s4664_s22  ;;  %s305_s15 = sshll.u32 %s298_s12, 4  ;;  %s6922_s15 = int_to_ptr.vmem [resolvable:$true] %s305_s15 }
  0xa6   : > { %p6926_p4 = pnand %p5864_p5, %p6895_p12  ;;  %s6930_s19 = scalar_lea.sflag [#allocation3], %s294_s13 }
  0xa7   : > { %s6540_s17 = scalar_lea.hbm %s6920_s14, 4096  ;;  %s6545_s20 = scalar_lea.hbm %s8882_s0, 8192 }
  0xa8   : > { %p6541_p10 = scmp.ne.s32.totalorder %s6920_s14, %s6540_s17  ;;  %p6542_p8 = pneg %p6926_p4 }
  0xa9   : > { %p6546_p11 = scmp.lt.u32.totalorder %s6920_s14, %s8882_s0  ;;  %p6547_p12 = scmp.lt.u32.totalorder %s6545_s20, %s6540_s17 }
  0xaa   : > { %p6543_p1 = pnand %p6542_p8, %p6541_p10  ;;  %p6549_p0 = scmp.lt.u32.totalorder %s6540_s17, %s6920_s14 }
  0xab   : > { %p6548_p13 = por %p6547_p12, %p6546_p11 }
  0xac   : > { %p6544_p3 = pneg %p6543_p1 }
  0xad   : > { %p6550_p2 = por %p6549_p0, %p6548_p13 }
  0xaf   : > { %p6551_p5 = pnand %p6550_p2, %p6544_p3 }
  0xb1   : > { %6554 = shalt.err (!%p6551_p5)
}
  0xb2   : > { %s6555_s13 = scalar_lea.vmem %s6922_s15, 4096  ;;  %s6662_s28 = smov [#allocation2]  }
  0xb3   : > { %p6556_p10 = scmp.ne.s32.totalorder %s6922_s15, %s6555_s13  ;;  %s6560_s12 = sshll.u32 %s6662_s28, 4  ;;  %s6561_s12 = int_to_ptr.vmem [resolvable:$false] %s6560_s12 }
  0xb4   : > { %s6562_s9 = scalar_lea.vmem %s6561_s12, 8192  ;;  %p6563_p7 = scmp.lt.s32.totalorder %s6922_s15, %s6561_s12 }
  0xb5   : > { %p6558_p1 = pnand %p6556_p10, %p6542_p8  ;;  %p6564_p11 = scmp.lt.s32.totalorder %s6562_s9, %s6555_s13 }
  0xb7   : > { %p6559_p9 = pneg %p6558_p1  ;;  %p6565_p12 = por %p6564_p11, %p6563_p7 }
  0xb9   : > { %p6566_p13 = pnand %p6565_p12, %p6559_p9 }
  0xbb   : > { %6569 = shalt.err (!%p6566_p13)
}
  0xbc   : > { %s6663_s17 = smov 128   ;;  %s6664_s1 = smov 8  }
  0xbd   : > { %5853 = dma.hbm_to_vmem [thread:$0]  (!%p6926_p4), %s6920_s14, 4096, %s6922_s15, %s6930_s19, %s6663_s17, %s6663_s17, %s6664_s1  }
  0xbe   : > { %p9082_p8 = scmp.ne.s32.totalorder %s9072_s8, 0 }
  0xc0   : > { %317 = sbr.rel (%p9082_p8) target bundleno = 1434 (0x59a), region = 48 }
  0xc7   : > { %s6961_s20 = sand.u32 1, %s6640_s25  }
  0xc8   : > { %s4652_s22 = sshll.u32 %s6961_s20, 8  ;;  %s320_s23 = scalar_lea.sflag [#allocation3], %s6961_s20 }
  0xc9   : > { %s6965_s13 = scalar_lea.vmem [#allocation2], %s4652_s22 }
  0xca   : > { %6615 = dma.done.wait (%p6901_p6), %s320_s23, 4096  }
  0xcb   : > { %6617 = vsyncadd (%p6901_p6), %s320_s23, 4294963200  ;;  %p9083_p7 = scmp.eq.s32.totalorder %s6731_s30, 0 }
  0xcd   : > { %6619 = dma.done.wait (%p9083_p7), [#allocation6], 4128   ;;  %p9084_p9 = pmov %p9083_p7 }
  0xce   : > { %p9085_p4 = pmov %p9083_p7 }
  0xcf   : > { %6621 = vsyncadd (%p9084_p9), [#allocation6], 4294963168 }
  0xd0   : > { %6623 = dma.done.wait (%p9085_p4), [#allocation9], 16448   ;;  %p9086_p3 = pmov %p9085_p4 }
  0xd2   : > { %6625 = vsyncadd (%p9086_p3), [#allocation9], 4294950848  ;;  %p9087_p0 = pmov %p9086_p3 }
  0xd4   : > { %6627 = dma.done.wait (%p9087_p0), [#allocation12], 57456   ;;  %p9088_p2 = pmov %p9087_p0 }
  0xd5   : > { %v6665_v0 = vmov 0.0   ;;  %v413_v1 = vld [vmem:[#allocation5 + $0x8] sm:$0xff]  ;;  %v415_v2 = vld [vmem:[#allocation5 + $0x18] sm:$0xff]  ;;  %v412_v3 = vld [vmem:[#allocation5] sm:$0xff]  ;;  %s5801_s8 = smul.u32 1792, %s6961_s20  ;;  %p9310_p5 = scmp.ne.s32.totalorder %s9079_s10, 0 }
  0xd6   : > { %6629 = vsyncadd (%p9088_p2), [#allocation12], 4294909840  ;;  %520 = vmatprep.mubr.f32.mxu0 %v6665_v0  ;;  %616 = vmatprep.mubr.f32.mxu1 %v6665_v0  ;;  %v4665_v4 = vpack.c.bf16 %v415_v2, %v413_v1  ;;  %v414_v5 = vld [vmem:[#allocation5 + $0x10] sm:$0xff]  ;;  %v417_v6 = vld [vmem:[#allocation5 + $0x28] sm:$0xff]  ;;  %s5802_s14 = smul.u32 28672, %s6731_s30  ;;  %s4495_s30 = scalar_lea.sflag [#allocation4], %s6961_s20 }
  0xd7   : > { %v419_v7 = vld [vmem:[#allocation5 + $0x38] sm:$0xff]  ;;  %v4667_v8 = vpack.c.bf16 %v414_v5, %v412_v3  ;;  %v416_v10 = vld [vmem:[#allocation5 + $0x20] sm:$0xff]  ;;  %v418_v11 = vld [vmem:[#allocation5 + $0x30] sm:$0xff]  ;;  %s8230_s21 = scalar_lea.vmem [#allocation14], %s5801_s8  ;;  %s6667_s9 = smov [#allocation14]  }
  0xd8   : > { %v4669_v9 = vpack.c.bf16 %v419_v7, %v417_v6  ;;  %v421_v12 = vld [vmem:[#allocation5 + $0x48] sm:$0xff]  ;;  %4666 = vmatprep.subr.bf16.mxu0 %v4665_v4  ;;  %v423_v13 = vld [vmem:[#allocation5 + $0x58] sm:$0xff]  ;;  %5305 = vmatprep.subr.bf16.mxu1 %v4665_v4  ;;  %v4671_v14 = vpack.c.bf16 %v418_v11, %v416_v10  ;;  %v420_v16 = vld [vmem:[#allocation5 + $0x40] sm:$0xff]  ;;  %s4509_s15 = sshll.u32 %s8230_s21, 4  ;;  %s8833_s28 = scalar_lea.hbm %s8889_s7, %s5802_s14  ;;  %s8835_s15 = int_to_ptr.vmem [resolvable:$true] %s4509_s15 }
  0xd9   : > { %4668 = vmatpush1.bf16.msra.mxu0 %v4667_v8  ;;  %5313 = vmatpush1.bf16.msra.mxu1 %v4667_v8  ;;  %v4673_v15 = vpack.c.bf16 %v423_v13, %v421_v12  ;;  %v422_v17 = vld [vmem:[#allocation5 + $0x50] sm:$0xff]  ;;  %v425_v18 = vld [vmem:[#allocation5 + $0x68] sm:$0xff]  ;;  %v427_v19 = vld [vmem:[#allocation5 + $0x78] sm:$0xff]  ;;  %s6570_s12 = scalar_lea.vmem %s8835_s15, 28672  ;;  %s6574_s17 = sshll.u32 %s6667_s9, 4  ;;  %s6575_s17 = int_to_ptr.vmem [resolvable:$false] %s6574_s17 }
  0xda   : > { %4670 = vmatprep.subr.bf16.mxu0 %v4669_v9  ;;  %5306 = vmatprep.subr.bf16.mxu1 %v4669_v9  ;;  %v4675_v20 = vpack.c.bf16 %v422_v17, %v420_v16  ;;  %v4677_v21 = vpack.c.bf16 %v427_v19, %v425_v18  ;;  %v424_v22 = vld [vmem:[#allocation5 + $0x60] sm:$0xff]  ;;  %v426_v23 = vld [vmem:[#allocation5 + $0x70] sm:$0xff]  ;;  %v429_v24 = vld [vmem:[#allocation5 + $0x88] sm:$0xff]  ;;  %p6571_p6 = scmp.ne.s32.totalorder %s8835_s15, %s6570_s12  ;;  %s6576_s1 = scalar_lea.vmem %s6575_s17, 57344 }
  0xdb   : > { %v431_v25 = vld [vmem:[#allocation5 + $0x98] sm:$0xff]  ;;  %v4679_v26 = vpack.c.bf16 %v426_v23, %v424_v22  ;;  %v428_v28 = vld [vmem:[#allocation5 + $0x80] sm:$0xff]  ;;  %v430_v29 = vld [vmem:[#allocation5 + $0x90] sm:$0xff]  ;;  %p6577_p11 = scmp.lt.s32.totalorder %s8835_s15, %s6575_s17  ;;  %p6578_p12 = scmp.lt.s32.totalorder %s6576_s1, %s6570_s12 }
  0xdc   : > { %v4681_v27 = vpack.c.bf16 %v431_v25, %v429_v24  ;;  %v433_v30 = vld [vmem:[#allocation5 + $0xa8] sm:$0xff]  ;;  %v435_v31 = vld [vmem:[#allocation5 + $0xb8] sm:$0xff]  ;;  %v4683_v32 = vpack.c.bf16 %v430_v29, %v428_v28  ;;  %v432_v34 = vld [vmem:[#allocation5 + $0xa0] sm:$0xff]  ;;  %p6572_p10 = pnand %p6571_p6, %p9310_p5 }
  0xdd   : > { %4672 = vmatpush1.bf16.msra.mxu0 %v4671_v14  ;;  %5314 = vmatpush1.bf16.msra.mxu1 %v4671_v14  ;;  %v4685_v33 = vpack.c.bf16 %v435_v31, %v433_v30  ;;  %v434_v35 = vld [vmem:[#allocation5 + $0xb0] sm:$0xff]  ;;  %v437_v36 = vld [vmem:[#allocation5 + $0xc8] sm:$0xff]  ;;  %v439_v37 = vld [vmem:[#allocation5 + $0xd8] sm:$0xff]  ;;  %p6579_p13 = por %p6578_p12, %p6577_p11 }
  0xde   : > { %4674 = vmatprep.subr.bf16.mxu0 %v4673_v15  ;;  %5307 = vmatprep.subr.bf16.mxu1 %v4673_v15  ;;  %v4687_v38 = vpack.c.bf16 %v434_v35, %v432_v34  ;;  %v4689_v39 = vpack.c.bf16 %v439_v37, %v437_v36  ;;  %v436_v40 = vld [vmem:[#allocation5 + $0xc0] sm:$0xff]  ;;  %v438_v41 = vld [vmem:[#allocation5 + $0xd0] sm:$0xff]  ;;  %v441_v42 = vld [vmem:[#allocation5 + $0xe8] sm:$0xff]  ;;  %p6573_p1 = pneg %p6572_p10 }
  0xdf   : > { %v443_v43 = vld [vmem:[#allocation5 + $0xf8] sm:$0xff]  ;;  %v4691_v44 = vpack.c.bf16 %v438_v41, %v436_v40  ;;  %v440_v46 = vld [vmem:[#allocation5 + $0xe0] sm:$0xff]  ;;  %v442_v47 = vld [vmem:[#allocation5 + $0xf0] sm:$0xff] }
  0xe0   : > { %v4693_v45 = vpack.c.bf16 %v443_v43, %v441_v42  ;;  %v778_v48 = vld [vmem:[#allocation8 + $0x8] sm:$0xff]  ;;  %v780_v50 = vld [vmem:[#allocation8 + $0x18] sm:$0xff]  ;;  %v4695_v52 = vpack.c.bf16 %v442_v47, %v440_v46  ;;  %v777_v54 = vld [vmem:[#allocation8] sm:$0xff]  ;;  %p6580_p8 = pnand %p6579_p13, %p6573_p1 }
  0xe1   : > { %4676 = vmatpush1.bf16.msra.mxu0 %v4675_v20  ;;  %5315 = vmatpush1.bf16.msra.mxu1 %v4675_v20  ;;  %v782_v49 = vld [vmem:[#allocation8 + $0x28] sm:$0xff]  ;;  %v784_v51 = vld [vmem:[#allocation8 + $0x38] sm:$0xff]  ;;  %v781_v55 = vld [vmem:[#allocation8 + $0x20] sm:$0xff] }
  0xe2   : > { %4678 = vmatprep.subr.bf16.mxu0 %v4677_v21  ;;  %5308 = vmatprep.subr.bf16.mxu1 %v4677_v21  ;;  %v4697_v53 = vpack.c.bf16 %v782_v49, %v778_v48  ;;  %v4761_v56 = vpack.c.bf16 %v784_v51, %v780_v50  ;;  %v779_v57 = vld [vmem:[#allocation8 + $0x10] sm:$0xff]  ;;  %v786_v59 = vld [vmem:[#allocation8 + $0x48] sm:$0xff]  ;;  %v788_v61 = vld [vmem:[#allocation8 + $0x58] sm:$0xff]  ;;  %v4699_v2 = vpack.c.bf16 %v781_v55, %v777_v54 }
  0xe3   : > { %v783_v58 = vld [vmem:[#allocation8 + $0x30] sm:$0xff]  ;;  %v790_v60 = vld [vmem:[#allocation8 + $0x68] sm:$0xff]  ;;  %v792_v62 = vld [vmem:[#allocation8 + $0x78] sm:$0xff] }
  0xe4   : > { %v380_v63 = vld [vmem:[%s6965_s13] sm:$0xff]  ;;  %v4763_v3 = vpack.c.bf16 %v783_v58, %v779_v57  ;;  %v4701_v6 = vpack.c.bf16 %v790_v60, %v786_v59  ;;  %v4765_v7 = vpack.c.bf16 %v792_v62, %v788_v61  ;;  %v787_v8 = vld [vmem:[#allocation8 + $0x50] sm:$0xff]  ;;  %v794_v10 = vld [vmem:[#allocation8 + $0x88] sm:$0xff] }
  0xe5   : > { %4680 = vmatpush1.bf16.msra.mxu0 %v4679_v26  ;;  %5316 = vmatpush1.bf16.msra.mxu1 %v4679_v26  ;;  %v396_v1 = vld [vmem:[%s6965_s13 + $0x80] sm:$0xff]  ;;  %v791_v9 = vld [vmem:[#allocation8 + $0x70] sm:$0xff]  ;;  %v798_v11 = vld [vmem:[#allocation8 + $0xa8] sm:$0xff] }
  0xe6   : > { %4682 = vmatprep.subr.bf16.mxu0 %v4681_v27  ;;  %5309 = vmatprep.subr.bf16.mxu1 %v4681_v27  ;;  %v785_v4 = vld [vmem:[#allocation8 + $0x40] sm:$0xff]  ;;  %v796_v12 = vld [vmem:[#allocation8 + $0x98] sm:$0xff]  ;;  %v4767_v17 = vpack.c.bf16 %v791_v9, %v787_v8  ;;  %v4705_v20 = vpack.c.bf16 %v798_v11, %v794_v10  ;;  %v795_v22 = vld [vmem:[#allocation8 + $0x90] sm:$0xff] }
  0xe7   : > { %v789_v5 = vld [vmem:[#allocation8 + $0x60] sm:$0xff]  ;;  %v800_v13 = vld [vmem:[#allocation8 + $0xb8] sm:$0xff]  ;;  %v799_v23 = vld [vmem:[#allocation8 + $0xb0] sm:$0xff] }
  0xe8   : > { %v381_v14 = vld [vmem:[%s6965_s13 + $0x8] sm:$0xff]  ;;  %v4703_v16 = vpack.c.bf16 %v789_v5, %v785_v4  ;;  %v4769_v21 = vpack.c.bf16 %v800_v13, %v796_v12  ;;  %v804_v26 = vld [vmem:[#allocation8 + $0xd8] sm:$0xff]  ;;  %v382_v28 = vld [vmem:[%s6965_s13 + $0x10] sm:$0xff]  ;;  %v4771_v31 = vpack.c.bf16 %v799_v23, %v795_v22 }
  0xe9   : > { %4684 = vmatpush1.bf16.msra.mxu0 %v4683_v32  ;;  %5317 = vmatpush1.bf16.msra.mxu1 %v4683_v32  ;;  %v397_v15 = vld [vmem:[%s6965_s13 + $0x88] sm:$0xff]  ;;  %v808_v27 = vld [vmem:[#allocation8 + $0xf8] sm:$0xff]  ;;  %v398_v29 = vld [vmem:[%s6965_s13 + $0x90] sm:$0xff] }
  0xea   : > { %4686 = vmatprep.subr.bf16.mxu0 %v4685_v33  ;;  %5310 = vmatprep.subr.bf16.mxu1 %v4685_v33  ;;  %v793_v18 = vld [vmem:[#allocation8 + $0x80] sm:$0xff]  ;;  %v802_v24 = vld [vmem:[#allocation8 + $0xc8] sm:$0xff]  ;;  %v4773_v35 = vpack.c.bf16 %v808_v27, %v804_v26  ;;  %v803_v36 = vld [vmem:[#allocation8 + $0xd0] sm:$0xff] }
  0xeb   : > { %v797_v19 = vld [vmem:[#allocation8 + $0xa0] sm:$0xff]  ;;  %v806_v25 = vld [vmem:[#allocation8 + $0xe8] sm:$0xff]  ;;  %v807_v37 = vld [vmem:[#allocation8 + $0xf0] sm:$0xff] }
  0xec   : > { %v4707_v30 = vpack.c.bf16 %v797_v19, %v793_v18  ;;  %v801_v32 = vld [vmem:[#allocation8 + $0xc0] sm:$0xff]  ;;  %v4709_v34 = vpack.c.bf16 %v806_v25, %v802_v24  ;;  %v812_v40 = vld [vmem:[#allocation8 + $0x118] sm:$0xff]  ;;  %v811_v50 = vld [vmem:[#allocation8 + $0x110] sm:$0xff] }
  0xed   : > { %4688 = vmatpush1.bf16.msra.mxu0 %v4687_v38  ;;  %5318 = vmatpush1.bf16.msra.mxu1 %v4687_v38  ;;  %v805_v33 = vld [vmem:[#allocation8 + $0xe0] sm:$0xff]  ;;  %v810_v38 = vld [vmem:[#allocation8 + $0x108] sm:$0xff]  ;;  %v816_v41 = vld [vmem:[#allocation8 + $0x138] sm:$0xff] }
  0xee   : > { %4690 = vmatprep.subr.bf16.mxu0 %v4689_v39  ;;  %5311 = vmatprep.subr.bf16.mxu1 %v4689_v39  ;;  %v814_v39 = vld [vmem:[#allocation8 + $0x128] sm:$0xff]  ;;  %v383_v42 = vld [vmem:[%s6965_s13 + $0x18] sm:$0xff]  ;;  %v809_v46 = vld [vmem:[#allocation8 + $0x100] sm:$0xff]  ;;  %v4777_v49 = vpack.c.bf16 %v816_v41, %v812_v40 }
  0xef   : > { %v399_v43 = vld [vmem:[%s6965_s13 + $0x98] sm:$0xff]  ;;  %v813_v47 = vld [vmem:[#allocation8 + $0x120] sm:$0xff]  ;;  %v4713_v48 = vpack.c.bf16 %v814_v39, %v810_v38  ;;  %v830_v4 = vld [vmem:[#allocation8 + $0x1a8] sm:$0xff] }
  0xf0   : > { %v815_v51 = vld [vmem:[#allocation8 + $0x130] sm:$0xff]  ;;  %v820_v54 = vld [vmem:[#allocation8 + $0x158] sm:$0xff]  ;;  %v4715_v58 = vpack.c.bf16 %v813_v47, %v809_v46  ;;  %v817_v60 = vld [vmem:[#allocation8 + $0x140] sm:$0xff] }
  0xf1   : > { %4692 = vmatpush1.bf16.msra.mxu0 %v4691_v44  ;;  %5319 = vmatpush1.bf16.msra.mxu1 %v4691_v44  ;;  %v4711_v44 = vpack.c.bf16 %v805_v33, %v801_v32  ;;  %v824_v55 = vld [vmem:[#allocation8 + $0x178] sm:$0xff]  ;;  %v4779_v59 = vpack.c.bf16 %v815_v51, %v811_v50  ;;  %v821_v61 = vld [vmem:[#allocation8 + $0x160] sm:$0xff]  ;;  %v838_v18 = vld [vmem:[#allocation8 + $0x1e8] sm:$0xff] }
  0xf2   : > { %4694 = vmatprep.subr.bf16.mxu0 %v4693_v45  ;;  %5312 = vmatprep.subr.bf16.mxu1 %v4693_v45  ;;  %v4775_v45 = vpack.c.bf16 %v807_v37, %v803_v36  ;;  %v400_v57 = vld [vmem:[%s6965_s13 + $0xa0] sm:$0xff]  ;;  %v401_v8 = vld [vmem:[%s6965_s13 + $0xa8] sm:$0xff]  ;;  %v4719_v9 = vpack.c.bf16 %v821_v61, %v817_v60  ;;  %v402_v22 = vld [vmem:[%s6965_s13 + $0xb0] sm:$0xff] }
  0xf3   : > { %v828_v5 = vld [vmem:[#allocation8 + $0x198] sm:$0xff]  ;;  %v825_v11 = vld [vmem:[#allocation8 + $0x180] sm:$0xff]  ;;  %v846_v32 = vld [vmem:[#allocation8 + $0x228] sm:$0xff] }
  0xf4   : > { %v829_v12 = vld [vmem:[#allocation8 + $0x1a0] sm:$0xff]  ;;  %v836_v19 = vld [vmem:[#allocation8 + $0x1d8] sm:$0xff]  ;;  %v854_v46 = vld [vmem:[#allocation8 + $0x268] sm:$0xff] }
  0xf5   : > { %4696 = vmatpush1.bf16.msra.mxu0 %v4695_v52  ;;  %5320 = vmatpush1.bf16.msra.mxu1 %v4695_v52  ;;  %v818_v52 = vld [vmem:[#allocation8 + $0x148] sm:$0xff]  ;;  %v4723_v23 = vpack.c.bf16 %v829_v12, %v825_v11  ;;  %v833_v25 = vld [vmem:[#allocation8 + $0x1c0] sm:$0xff]  ;;  %v844_v33 = vld [vmem:[#allocation8 + $0x218] sm:$0xff] }
  0xf6   : > { %4698 = vmatprep.subr.bf16.mxu1 %v4697_v53  ;;  %4762 = vmatprep.subr.bf16.mxu0 %v4761_v56  ;;  %v822_v53 = vld [vmem:[#allocation8 + $0x168] sm:$0xff]  ;;  %v384_v56 = vld [vmem:[%s6965_s13 + $0x20] sm:$0xff]  ;;  %v403_v36 = vld [vmem:[%s6965_s13 + $0xb8] sm:$0xff] }
  0xf7   : > { %v4717_v62 = vpack.c.bf16 %v822_v53, %v818_v52  ;;  %v837_v26 = vld [vmem:[#allocation8 + $0x1e0] sm:$0xff]  ;;  %v852_v47 = vld [vmem:[#allocation8 + $0x258] sm:$0xff]  ;;  %v862_v60 = vld [vmem:[#allocation8 + $0x2a8] sm:$0xff] }
  0xf8   : > { %521 = vmatmul.mubr.f32.vlgmr.msra.gmra.mrb[0].mxu0 %v380_v63  ;;  %617 = vmatmul.mubr.f32.vlgmr.msra.gmra.mrb[0].mxu1 %v396_v1  ;;  %v4781_v63 = vpack.c.bf16 %v824_v55, %v820_v54  ;;  %v819_v1 = vld [vmem:[#allocation8 + $0x150] sm:$0xff]  ;;  %v4727_v37 = vpack.c.bf16 %v837_v26, %v833_v25  ;;  %v841_v39 = vld [vmem:[#allocation8 + $0x200] sm:$0xff]  ;;  %v860_v61 = vld [vmem:[#allocation8 + $0x298] sm:$0xff] }
  0xf9   : > { %526 = vmatprep.mubr.f32.mxu0 %v6665_v0  ;;  %622 = vmatprep.mubr.f32.mxu1 %v6665_v0  ;;  %v845_v40 = vld [vmem:[#allocation8 + $0x220] sm:$0xff]  ;;  %v870_v11 = vld [vmem:[#allocation8 + $0x2e8] sm:$0xff]  ;;  %v868_v12 = vld [vmem:[#allocation8 + $0x2d8] sm:$0xff] }
  0xfa   : > { %4700 = vmatpush1.bf16.msra.mxu1 %v4699_v2  ;;  %4764 = vmatpush1.bf16.msra.mxu0 %v4763_v3  ;;  %v823_v2 = vld [vmem:[#allocation8 + $0x170] sm:$0xff]  ;;  %v826_v3 = vld [vmem:[#allocation8 + $0x188] sm:$0xff]  ;;  %v404_v50 = vld [vmem:[%s6965_s13 + $0xc0] sm:$0xff]  ;;  %v4731_v51 = vpack.c.bf16 %v845_v40, %v841_v39 }
  0xfb   : > { %4702 = vmatprep.subr.bf16.mxu1 %v4701_v6  ;;  %4766 = vmatprep.subr.bf16.mxu0 %v4765_v7  ;;  %v832_v6 = vld [vmem:[#allocation8 + $0x1b8] sm:$0xff]  ;;  %v385_v7 = vld [vmem:[%s6965_s13 + $0x28] sm:$0xff]  ;;  %v4783_v10 = vpack.c.bf16 %v823_v2, %v819_v1  ;;  %v4721_v13 = vpack.c.bf16 %v830_v4, %v826_v3 }
  0xfc   : > { %527 = vmatmul.mubr.f32.gmra.mrb[2].mxu0 %v381_v14  ;;  %623 = vmatmul.mubr.f32.gmra.mrb[2].mxu1 %v397_v15  ;;  %v4785_v14 = vpack.c.bf16 %v832_v6, %v828_v5  ;;  %v827_v15 = vld [vmem:[#allocation8 + $0x190] sm:$0xff]  ;;  %v849_v53 = vld [vmem:[#allocation8 + $0x240] sm:$0xff]  ;;  %v878_v25 = vld [vmem:[#allocation8 + $0x328] sm:$0xff] }
  0xfd   : > { %532 = vmatprep.mubr.f32.mxu0 %v6665_v0  ;;  %628 = vmatprep.mubr.f32.mxu1 %v6665_v0  ;;  %v853_v54 = vld [vmem:[#allocation8 + $0x260] sm:$0xff]  ;;  %v876_v26 = vld [vmem:[#allocation8 + $0x318] sm:$0xff]  ;;  %v886_v39 = vld [vmem:[#allocation8 + $0x368] sm:$0xff] }
  0xfe   : > { %4704 = vmatpush1.bf16.msra.mxu1 %v4703_v16  ;;  %4768 = vmatpush1.bf16.msra.mxu0 %v4767_v17  ;;  %v831_v16 = vld [vmem:[#allocation8 + $0x1b0] sm:$0xff]  ;;  %v834_v17 = vld [vmem:[#allocation8 + $0x1c8] sm:$0xff]  ;;  %v4735_v2 = vpack.c.bf16 %v853_v54, %v849_v53  ;;  %v857_v4 = vld [vmem:[#allocation8 + $0x280] sm:$0xff] }
  0xff   : > { %4706 = vmatprep.subr.bf16.mxu1 %v4705_v20  ;;  %4770 = vmatprep.subr.bf16.mxu0 %v4769_v21  ;;  %v840_v20 = vld [vmem:[#allocation8 + $0x1f8] sm:$0xff]  ;;  %v386_v21 = vld [vmem:[%s6965_s13 + $0x30] sm:$0xff]  ;;  %v4787_v24 = vpack.c.bf16 %v831_v16, %v827_v15  ;;  %v4725_v27 = vpack.c.bf16 %v838_v18, %v834_v17  ;;  %v405_v1 = vld [vmem:[%s6965_s13 + $0xc8] sm:$0xff] }
 0x100   : > { %533 = vmatmul.mubr.f32.gmra.mrb[4].mxu0 %v382_v28  ;;  %629 = vmatmul.mubr.f32.gmra.mrb[4].mxu1 %v398_v29  ;;  %v4789_v28 = vpack.c.bf16 %v840_v20, %v836_v19  ;;  %v835_v29 = vld [vmem:[#allocation8 + $0x1d0] sm:$0xff]  ;;  %v861_v5 = vld [vmem:[#allocation8 + $0x2a0] sm:$0xff]  ;;  %v884_v40 = vld [vmem:[#allocation8 + $0x358] sm:$0xff] }
 0x101   : > { %538 = vmatprep.mubr.f32.mxu0 %v6665_v0  ;;  %634 = vmatprep.mubr.f32.mxu1 %v6665_v0  ;;  %v406_v15 = vld [vmem:[%s6965_s13 + $0xd0] sm:$0xff]  ;;  %v4739_v16 = vpack.c.bf16 %v861_v5, %v857_v4  ;;  %v865_v18 = vld [vmem:[#allocation8 + $0x2c0] sm:$0xff]  ;;  %v892_v54 = vld [vmem:[#allocation8 + $0x398] sm:$0xff] }
 0x102   : > { %4708 = vmatpush1.bf16.msra.mxu1 %v4707_v30  ;;  %4772 = vmatpush1.bf16.msra.mxu0 %v4771_v31  ;;  %v839_v30 = vld [vmem:[#allocation8 + $0x1f0] sm:$0xff]  ;;  %v842_v31 = vld [vmem:[#allocation8 + $0x208] sm:$0xff]  ;;  %v869_v19 = vld [vmem:[#allocation8 + $0x2e0] sm:$0xff] }
 0x103   : > { %4710 = vmatprep.subr.bf16.mxu1 %v4709_v34  ;;  %4774 = vmatprep.subr.bf16.mxu0 %v4773_v35  ;;  %v848_v34 = vld [vmem:[#allocation8 + $0x238] sm:$0xff]  ;;  %v4791_v38 = vpack.c.bf16 %v839_v30, %v835_v29  ;;  %v4729_v41 = vpack.c.bf16 %v846_v32, %v842_v31  ;;  %v4743_v30 = vpack.c.bf16 %v869_v19, %v865_v18  ;;  %v873_v32 = vld [vmem:[#allocation8 + $0x300] sm:$0xff]  ;;  %v894_v53 = vld [vmem:[#allocation8 + $0x3a8] sm:$0xff] }
 0x104   : > { %539 = vmatmul.mubr.f32.gmra.mrb[6].mxu0 %v383_v42  ;;  %635 = vmatmul.mubr.f32.gmra.mrb[6].mxu1 %v399_v43  ;;  %v387_v35 = vld [vmem:[%s6965_s13 + $0x38] sm:$0xff]  ;;  %v4793_v42 = vpack.c.bf16 %v848_v34, %v844_v33  ;;  %v877_v33 = vld [vmem:[#allocation8 + $0x320] sm:$0xff] }
 0x105   : > { %544 = vmatprep.mubr.f32.mxu0 %v6665_v0  ;;  %640 = vmatprep.mubr.f32.mxu1 %v6665_v0  ;;  %v843_v43 = vld [vmem:[#allocation8 + $0x210] sm:$0xff] }
 0x106   : > { %4712 = vmatpush1.bf16.msra.mxu1 %v4711_v44  ;;  %4776 = vmatpush1.bf16.msra.mxu0 %v4775_v45  ;;  %v847_v44 = vld [vmem:[#allocation8 + $0x230] sm:$0xff]  ;;  %v850_v45 = vld [vmem:[#allocation8 + $0x248] sm:$0xff] }
 0x107   : > { %4714 = vmatprep.subr.bf16.mxu1 %v4713_v48  ;;  %4778 = vmatprep.subr.bf16.mxu0 %v4777_v49  ;;  %v856_v48 = vld [vmem:[#allocation8 + $0x278] sm:$0xff]  ;;  %v4795_v52 = vpack.c.bf16 %v847_v44, %v843_v43  ;;  %v4733_v55 = vpack.c.bf16 %v854_v46, %v850_v45  ;;  %v4747_v44 = vpack.c.bf16 %v877_v33, %v873_v32  ;;  %v881_v46 = vld [vmem:[#allocation8 + $0x340] sm:$0xff]  ;;  %v899_v18 = vld [vmem:[#allocation8 + $0x3d0] sm:$0xff] }
 0x108   : > { %545 = vmatmul.mubr.f32.gmra.mrb[8].mxu0 %v384_v56  ;;  %641 = vmatmul.mubr.f32.gmra.mrb[8].mxu1 %v400_v57  ;;  %v388_v49 = vld [vmem:[%s6965_s13 + $0x40] sm:$0xff]  ;;  %v4797_v56 = vpack.c.bf16 %v856_v48, %v852_v47  ;;  %v851_v57 = vld [vmem:[#allocation8 + $0x250] sm:$0xff] }
 0x109   : > { %550 = vmatprep.mubr.f32.mxu0 %v6665_v0  ;;  %646 = vmatprep.mubr.f32.mxu1 %v6665_v0  ;;  %v407_v29 = vld [vmem:[%s6965_s13 + $0xd8] sm:$0xff]  ;;  %v408_v43 = vld [vmem:[%s6965_s13 + $0xe0] sm:$0xff] }
 0x10a   : > { %4716 = vmatpush1.bf16.msra.mxu1 %v4715_v58  ;;  %4780 = vmatpush1.bf16.msra.mxu0 %v4779_v59  ;;  %v855_v58 = vld [vmem:[#allocation8 + $0x270] sm:$0xff]  ;;  %v858_v59 = vld [vmem:[#allocation8 + $0x288] sm:$0xff]  ;;  %v885_v47 = vld [vmem:[#allocation8 + $0x360] sm:$0xff] }
 0x10b   : > { %4718 = vmatprep.subr.bf16.mxu1 %v4717_v62  ;;  %4782 = vmatprep.subr.bf16.mxu0 %v4781_v63  ;;  %v864_v62 = vld [vmem:[#allocation8 + $0x2b8] sm:$0xff]  ;;  %v389_v63 = vld [vmem:[%s6965_s13 + $0x48] sm:$0xff]  ;;  %v4799_v3 = vpack.c.bf16 %v855_v58, %v851_v57  ;;  %v4737_v6 = vpack.c.bf16 %v862_v60, %v858_v59  ;;  %v4751_v58 = vpack.c.bf16 %v885_v47, %v881_v46  ;;  %v903_v19 = vld [vmem:[#allocation8 + $0x3f0] sm:$0xff] }
 0x10c   : > { %551 = vmatmul.mubr.f32.gmra.mrb[10].mxu0 %v385_v7  ;;  %647 = vmatmul.mubr.f32.gmra.mrb[10].mxu1 %v401_v8  ;;  %v4801_v7 = vpack.c.bf16 %v864_v62, %v860_v61  ;;  %v859_v8 = vld [vmem:[#allocation8 + $0x290] sm:$0xff]  ;;  %v409_v57 = vld [vmem:[%s6965_s13 + $0xe8] sm:$0xff] }
 0x10d   : > { %556 = vmatprep.mubr.f32.mxu0 %v6665_v0  ;;  %652 = vmatprep.mubr.f32.mxu1 %v6665_v0  ;;  %v889_v61 = vld [vmem:[#allocation8 + $0x380] sm:$0xff]  ;;  %v395_v4 = vld [vmem:[%s6965_s13 + $0x78] sm:$0xff]  ;;  %v1586_v46 = vld [vmem:[#allocation11 + $0x88] sm:$0xff] }
 0x10e   : > { %4720 = vmatpush1.bf16.msra.mxu1 %v4719_v9  ;;  %4784 = vmatpush1.bf16.msra.mxu0 %v4783_v10  ;;  %v863_v9 = vld [vmem:[#allocation8 + $0x2b0] sm:$0xff]  ;;  %v866_v10 = vld [vmem:[#allocation8 + $0x2c8] sm:$0xff]  ;;  %v893_v62 = vld [vmem:[#allocation8 + $0x3a0] sm:$0xff] }
 0x10f   : > { %4722 = vmatprep.subr.bf16.mxu1 %v4721_v13  ;;  %4786 = vmatprep.subr.bf16.mxu0 %v4785_v14  ;;  %v872_v13 = vld [vmem:[#allocation8 + $0x2f8] sm:$0xff]  ;;  %v390_v14 = vld [vmem:[%s6965_s13 + $0x50] sm:$0xff]  ;;  %v4803_v17 = vpack.c.bf16 %v863_v9, %v859_v8  ;;  %v4741_v20 = vpack.c.bf16 %v870_v11, %v866_v10  ;;  %v1593_v47 = vld [vmem:[#allocation11 + $0xc0] sm:$0xff] }
 0x110   : > { %557 = vmatmul.mubr.f32.gmra.mrb[12].mxu0 %v386_v21  ;;  %653 = vmatmul.mubr.f32.gmra.mrb[12].mxu1 %v402_v22  ;;  %v4805_v21 = vpack.c.bf16 %v872_v13, %v868_v12  ;;  %v867_v22 = vld [vmem:[#allocation8 + $0x2d0] sm:$0xff]  ;;  %v898_v9 = vld [vmem:[#allocation8 + $0x3c8] sm:$0xff]  ;;  %v900_v11 = vld [vmem:[#allocation8 + $0x3d8] sm:$0xff] }
 0x111   : > { %562 = vmatprep.mubr.f32.mxu0 %v6665_v0  ;;  %658 = vmatprep.mubr.f32.mxu1 %v6665_v0  ;;  %v411_v5 = vld [vmem:[%s6965_s13 + $0xf8] sm:$0xff]  ;;  %v902_v10 = vld [vmem:[#allocation8 + $0x3e8] sm:$0xff]  ;;  %v897_v13 = vld [vmem:[#allocation8 + $0x3c0] sm:$0xff] }
 0x112   : > { %4724 = vmatpush1.bf16.msra.mxu1 %v4723_v23  ;;  %4788 = vmatpush1.bf16.msra.mxu0 %v4787_v24  ;;  %v871_v23 = vld [vmem:[#allocation8 + $0x2f0] sm:$0xff]  ;;  %v874_v24 = vld [vmem:[#allocation8 + $0x308] sm:$0xff]  ;;  %v4757_v12 = vpack.c.bf16 %v902_v10, %v898_v9 }
 0x113   : > { %4726 = vmatprep.subr.bf16.mxu1 %v4725_v27  ;;  %4790 = vmatprep.subr.bf16.mxu0 %v4789_v28  ;;  %v880_v27 = vld [vmem:[#allocation8 + $0x338] sm:$0xff]  ;;  %v4807_v31 = vpack.c.bf16 %v871_v23, %v867_v22  ;;  %v4745_v34 = vpack.c.bf16 %v878_v25, %v874_v24 }
 0x114   : > { %563 = vmatmul.mubr.f32.gmra.mrb[14].mxu0 %v387_v35  ;;  %659 = vmatmul.mubr.f32.gmra.mrb[14].mxu1 %v403_v36  ;;  %v391_v28 = vld [vmem:[%s6965_s13 + $0x58] sm:$0xff]  ;;  %v4809_v35 = vpack.c.bf16 %v880_v27, %v876_v26  ;;  %v446_v26 = vlaneseq }
 0x115   : > { %568 = vmatprep.mubr.f32.mxu0 %v6665_v0  ;;  %664 = vmatprep.mubr.f32.mxu1 %v6665_v0  ;;  %v875_v36 = vld [vmem:[#allocation8 + $0x310] sm:$0xff]  ;;  %v1572_v23 = vld [vmem:[#allocation11 + $0x18] sm:$0xff] }
 0x116   : > { %4728 = vmatpush1.bf16.msra.mxu1 %v4727_v37  ;;  %4792 = vmatpush1.bf16.msra.mxu0 %v4791_v38  ;;  %v879_v37 = vld [vmem:[#allocation8 + $0x330] sm:$0xff]  ;;  %v882_v38 = vld [vmem:[#allocation8 + $0x348] sm:$0xff]  ;;  %v7047_v27 = vshrl.u32 %v446_v26, 7 }
 0x117   : > { %4730 = vmatprep.subr.bf16.mxu1 %v4729_v41  ;;  %4794 = vmatprep.subr.bf16.mxu0 %v4793_v42  ;;  %v888_v41 = vld [vmem:[#allocation8 + $0x378] sm:$0xff]  ;;  %v4811_v45 = vpack.c.bf16 %v879_v37, %v875_v36  ;;  %v4749_v48 = vpack.c.bf16 %v886_v39, %v882_v38  ;;  %v1614_v26 = vld [vmem:[#allocation11 + $0x168] sm:$0xff] }
 0x118   : > { %569 = vmatmul.mubr.f32.gmra.mrb[16].mxu0 %v388_v49  ;;  %665 = vmatmul.mubr.f32.gmra.mrb[16].mxu1 %v404_v50  ;;  %v392_v42 = vld [vmem:[%s6965_s13 + $0x60] sm:$0xff]  ;;  %v4813_v49 = vpack.c.bf16 %v888_v41, %v884_v40  ;;  %v883_v50 = vld [vmem:[#allocation8 + $0x350] sm:$0xff]  ;;  %9089 = vst [vmem:[#allocation20_spill] sm:$0xff] %v7047_v27 }
 0x119   : > { %574 = vmatprep.mubr.f32.mxu0 %v6665_v0  ;;  %670 = vmatprep.mubr.f32.mxu1 %v6665_v0  ;;  %v1579_v24 = vld [vmem:[#allocation11 + $0x50] sm:$0xff]  ;;  %v1576_v36 = vld [vmem:[#allocation11 + $0x38] sm:$0xff] }
 0x11a   : > { %4732 = vmatpush1.bf16.msra.mxu1 %v4731_v51  ;;  %4796 = vmatpush1.bf16.msra.mxu0 %v4795_v52  ;;  %v887_v51 = vld [vmem:[#allocation8 + $0x370] sm:$0xff]  ;;  %v890_v52 = vld [vmem:[#allocation8 + $0x388] sm:$0xff]  ;;  %v4953_v25 = vpack.c.bf16 %v1579_v24, %v1572_v23 }
 0x11b   : > { %4734 = vmatprep.subr.bf16.mxu1 %v4733_v55  ;;  %4798 = vmatprep.subr.bf16.mxu0 %v4797_v56  ;;  %v896_v55 = vld [vmem:[#allocation8 + $0x3b8] sm:$0xff]  ;;  %v393_v56 = vld [vmem:[%s6965_s13 + $0x68] sm:$0xff]  ;;  %v4815_v59 = vpack.c.bf16 %v887_v51, %v883_v50  ;;  %v4753_v60 = vpack.c.bf16 %v894_v53, %v890_v52 }
 0x11c   : > { %575 = vmatmul.mubr.f32.gmra.mrb[18].mxu0 %v389_v63  ;;  %671 = vmatmul.mubr.f32.gmra.mrb[18].mxu1 %v405_v1  ;;  %v4817_v63 = vpack.c.bf16 %v896_v55, %v892_v54  ;;  %v394_v1 = vld [vmem:[%s6965_s13 + $0x70] sm:$0xff] }
 0x11d   : > { %580 = vmatprep.mubr.f32.mxu0 %v6665_v0  ;;  %676 = vmatprep.mubr.f32.mxu1 %v6665_v0  ;;  %v1571_v37 = vld [vmem:[#allocation11 + $0x10] sm:$0xff]  ;;  %v1590_v55 = vld [vmem:[#allocation11 + $0xa8] sm:$0xff] }
 0x11e   : > { %4736 = vmatpush1.bf16.msra.mxu1 %v4735_v2  ;;  %4800 = vmatpush1.bf16.msra.mxu0 %v4799_v3  ;;  %v410_v2 = vld [vmem:[%s6965_s13 + $0xf0] sm:$0xff]  ;;  %v4755_v3 = vpack.c.bf16 %v893_v62, %v889_v61  ;;  %v4957_v62 = vpack.c.bf16 %v1593_v47, %v1586_v46 }
 0x11f   : > { %4738 = vmatprep.subr.bf16.mxu1 %v4737_v6  ;;  %4802 = vmatprep.subr.bf16.mxu0 %v4801_v7  ;;  %v891_v6 = vld [vmem:[#allocation8 + $0x390] sm:$0xff] }
 0x120   : > { %581 = vmatmul.mubr.f32.gmra.mrb[20].mxu0 %v390_v14  ;;  %677 = vmatmul.mubr.f32.gmra.mrb[20].mxu1 %v406_v15  ;;  %v895_v7 = vld [vmem:[#allocation8 + $0x3b0] sm:$0xff]  ;;  %v901_v14 = vld [vmem:[#allocation8 + $0x3e0] sm:$0xff]  ;;  %v904_v15 = vld [vmem:[#allocation8 + $0x3f8] sm:$0xff] }
 0x121   : > { %586 = vmatprep.mubr.f32.mxu0 %v6665_v0  ;;  %682 = vmatprep.mubr.f32.mxu1 %v6665_v0  ;;  %v4819_v8 = vpack.c.bf16 %v895_v7, %v891_v6  ;;  %v1583_v54 = vld [vmem:[#allocation11 + $0x70] sm:$0xff] }
 0x122   : > { %4740 = vmatpush1.bf16.msra.mxu1 %v4739_v16  ;;  %4804 = vmatpush1.bf16.msra.mxu0 %v4803_v17  ;;  %v4759_v16 = vpack.c.bf16 %v901_v14, %v897_v13  ;;  %v4821_v17 = vpack.c.bf16 %v904_v15, %v900_v11  ;;  %v1607_v6 = vld [vmem:[#allocation11 + $0x130] sm:$0xff]  ;;  %v4831_v10 = vpack.c.bf16 %v1590_v55, %v1583_v54  ;;  %v1597_v13 = vld [vmem:[#allocation11 + $0xe0] sm:$0xff]  ;;  %v1604_v14 = vld [vmem:[#allocation11 + $0x118] sm:$0xff] }
 0x123   : > { %4742 = vmatprep.subr.bf16.mxu1 %v4741_v20  ;;  %4806 = vmatprep.subr.bf16.mxu0 %v4805_v21  ;;  %v1570_v20 = vld [vmem:[#allocation11 + $0x8] sm:$0xff]  ;;  %v1577_v21 = vld [vmem:[#allocation11 + $0x40] sm:$0xff]  ;;  %v1599_v15 = vld [vmem:[#allocation11 + $0xf0] sm:$0xff] }
 0x124   : > { %587 = vmatmul.mubr.f32.gmra.mrb[22].mxu0 %v391_v28  ;;  %683 = vmatmul.mubr.f32.gmra.mrb[22].mxu1 %v407_v29  ;;  %v4825_v22 = vpack.c.bf16 %v1577_v21, %v1570_v20  ;;  %v7050_v28 = vsub.s32 0, %v7047_v27  ;;  %v444_v29 = vld [vmem:[#allocation7] sm:$0x3]  ;;  %v1606_v21 = vld [vmem:[#allocation11 + $0x128] sm:$0xff]  ;;  %v1619_v23 = vld [vmem:[#allocation11 + $0x190] sm:$0xff] }
 0x125   : > { %592 = vmatprep.mubr.f32.mxu0 %v6665_v0  ;;  %688 = vmatprep.mubr.f32.mxu1 %v6665_v0  ;;  %v1628_v55 = vld [vmem:[#allocation11 + $0x1d8] sm:$0xff] }
 0x126   : > { %4744 = vmatpush1.bf16.msra.mxu1 %v4743_v30  ;;  %4808 = vmatpush1.bf16.msra.mxu0 %v4807_v31  ;;  %9090 = vst [vmem:[#allocation21_spill] sm:$0xff] %v7050_v28  ;;  %v7053_v30 = vsub.s32 1, %v7047_v27  ;;  %v7056_v31 = vrot.slane %v444_v29, %v7050_v28 }
 0x127   : > { %4746 = vmatprep.subr.bf16.mxu1 %v4745_v34  ;;  %4810 = vmatprep.subr.bf16.mxu0 %v4809_v35  ;;  %v1569_v35 = vld [vmem:[#allocation11] sm:$0xff] }
 0x128   : > { %593 = vmatmul.mubr.f32.gmra.mrb[24].mxu0 %v392_v42  ;;  %689 = vmatmul.mubr.f32.gmra.mrb[24].mxu1 %v408_v43  ;;  %9091 = vst [vmem:[#allocation22_spill] sm:$0xff] %v7053_v30  ;;  %v7059_v32 = vrot.slane %v444_v29, %v7053_v30  ;;  %v1578_v42 = vld [vmem:[#allocation11 + $0x48] sm:$0xff]  ;;  %v1584_v43 = vld [vmem:[#allocation11 + $0x78] sm:$0xff]  ;;  %v4827_v51 = vpack.c.bf16 %v1576_v36, %v1569_v35  ;;  %v1621_v29 = vld [vmem:[#allocation11 + $0x1a0] sm:$0xff] }
 0x129   : > { %598 = vmatprep.mubr.f32.mxu0 %v6665_v0  ;;  %694 = vmatprep.mubr.f32.mxu1 %v6665_v0  ;;  %v4955_v52 = vpack.c.bf16 %v1578_v42, %v1571_v37  ;;  %v4835_v36 = vpack.c.bf16 %v1604_v14, %v1597_v13  ;;  %v4963_v37 = vpack.c.bf16 %v1606_v21, %v1599_v15  ;;  %v1618_v42 = vld [vmem:[#allocation11 + $0x188] sm:$0xff]  ;;  %v1647_v13 = vld [vmem:[#allocation11 + $0x270] sm:$0xff] }
 0x12a   : > { %4748 = vmatpush1.bf16.msra.mxu1 %v4747_v44  ;;  %4812 = vmatpush1.bf16.msra.mxu0 %v4811_v45  ;;  %v1591_v44 = vld [vmem:[#allocation11 + $0xb0] sm:$0xff] }
 0x12b   : > { %4750 = vmatprep.subr.bf16.mxu1 %v4749_v48  ;;  %4814 = vmatprep.subr.bf16.mxu0 %v4813_v49  ;;  %v4829_v53 = vpack.c.bf16 %v1591_v44, %v1584_v43  ;;  %v1613_v43 = vld [vmem:[#allocation11 + $0x160] sm:$0xff] }
 0x12c   : > { %599 = vmatmul.mubr.f32.gmra.mrb[26].mxu0 %v393_v56  ;;  %695 = vmatmul.mubr.f32.gmra.mrb[26].mxu1 %v409_v57  ;;  %v1585_v56 = vld [vmem:[#allocation11 + $0x80] sm:$0xff] }
 0x12d   : > { %604 = vmatprep.mubr.f32.mxu0 %v6665_v0  ;;  %700 = vmatprep.mubr.f32.mxu1 %v6665_v0 }
 0x12e   : > { %4752 = vmatpush1.bf16.msra.mxu1 %v4751_v58  ;;  %4816 = vmatpush1.bf16.msra.mxu0 %v4815_v59 }
 0x12f   : > { %4754 = vmatprep.subr.bf16.mxu1 %v4753_v60  ;;  %4818 = vmatprep.subr.bf16.mxu0 %v4817_v63  ;;  %v1592_v63 = vld [vmem:[#allocation11 + $0xb8] sm:$0xff] }
 0x130   : > { %605 = vmatmul.mubr.f32.gmra.mrb[28].mxu0 %v394_v1  ;;  %701 = vmatmul.mubr.f32.gmra.mrb[28].mxu1 %v410_v2  ;;  %v1598_v1 = vld [vmem:[#allocation11 + $0xe8] sm:$0xff]  ;;  %v1605_v2 = vld [vmem:[#allocation11 + $0x120] sm:$0xff]  ;;  %v4959_v11 = vpack.c.bf16 %v1592_v63, %v1585_v56  ;;  %v1635_v56 = vld [vmem:[#allocation11 + $0x210] sm:$0xff] }
 0x131   : > { %610 = vmatprep.mubr.f32.mxu0 %v6665_v0  ;;  %706 = vmatprep.mubr.f32.mxu1 %v6665_v0  ;;  %v4823_v0 = vpack.c.bf16 %v903_v19, %v899_v18 }
 0x132   : > { %4756 = vmatpush1.bf16.msra.mxu1 %v4755_v3  ;;  %4820 = vmatpush1.bf16.msra.mxu0 %v4819_v8 }
 0x133   : > { %4758 = vmatprep.subr.bf16.mxu1 %v4757_v12  ;;  %4822 = vmatprep.subr.bf16.mxu0 %v4821_v17  ;;  %v4833_v12 = vpack.c.bf16 %v1605_v2, %v1598_v1  ;;  %v1625_v1 = vld [vmem:[#allocation11 + $0x1c0] sm:$0xff]  ;;  %v1632_v2 = vld [vmem:[#allocation11 + $0x1f8] sm:$0xff] }
 0x134   : > { %611 = vmatmul.mubr.f32.gmra.mrb[30].mxu0 %v395_v4  ;;  %707 = vmatmul.mubr.f32.gmra.mrb[30].mxu1 %v411_v5  ;;  %v1600_v5 = vld [vmem:[#allocation11 + $0xf8] sm:$0xff]  ;;  %v4843_v21 = vpack.c.bf16 %v1632_v2, %v1625_v1 }
 0x135   : > { %v4961_v20 = vpack.c.bf16 %v1607_v6, %v1600_v5 }
 0x136   : > { %4760 = vmatpush1.bf16.msra.mxu1 %v4759_v16  ;;  %4824 = vmatpush1.bf16.msra.mxu0 %v4823_v0 }
 0x137   : > { %4826 = vmatprep.subr.bf16.mxu1 %v4825_v22  ;;  %4954 = vmatprep.subr.bf16.mxu0 %v4953_v25  ;;  %v1612_v22 = vld [vmem:[#allocation11 + $0x158] sm:$0xff] }
 0x1cb   : > { %v522_v33 = vpop.f32.mrb[0].mxu0  ;;  %v618_v34 = vpop.f32.mrb[0].mxu1 }
 0x1cc   : > { %v523_v38 = vadd.f32 %v522_v33, %v7056_v31  ;;  %v524_v39 = vpop.f32.mrb[1].mxu0  ;;  %v7063_v40 = vadd.f32 %v618_v34, %v7056_v31  ;;  %v7065_v41 = vpop.f32.mrb[1].mxu1 }
 0x1cd   : > { %v525_v45 = vadd.f32 %v524_v39, %v7059_v32  ;;  %v1611_v39 = vld [vmem:[#allocation11 + $0x150] sm:$0xff] }
 0x1ce   : > { %v713_v57 = vmax.f32 %v523_v38, 0.0  ;;  %v4837_v38 = vpack.c.bf16 %v1619_v23, %v1612_v22 }
 0x1cf   : > { %v714_v48 = vmax.f32 %v525_v45, 0.0  ;;  %v528_v49 = vpop.f32.mrb[2].mxu0  ;;  %v624_v50 = vpop.f32.mrb[2].mxu1 }
 0x1d0   : > { %v529_v58 = vadd.f32 %v528_v49, %v7056_v31  ;;  %v530_v59 = vpop.f32.mrb[3].mxu0  ;;  %v7070_v60 = vadd.f32 %v624_v50, %v7056_v31  ;;  %v626_v61 = vpop.f32.mrb[3].mxu1  ;;  %v4965_v49 = vpack.c.bf16 %v1621_v29, %v1614_v26  ;;  %v1620_v50 = vld [vmem:[#allocation11 + $0x198] sm:$0xff]  ;;  %v1646_v26 = vld [vmem:[#allocation11 + $0x268] sm:$0xff]  ;;  %v1641_v29 = vld [vmem:[#allocation11 + $0x240] sm:$0xff] }
 0x1d1   : > { %v531_v3 = vadd.f32 %v530_v59, %v7059_v32  ;;  %991 = vmatprep.mubr.f32.mxu1 %v714_v48  ;;  %1248 = vmatprep.mubr.f32.mxu0 %v714_v48  ;;  %v7074_v4 = vadd.f32 %v626_v61, %v7059_v32  ;;  %v4839_v61 = vpack.c.bf16 %v1618_v42, %v1611_v39  ;;  %v1648_v39 = vld [vmem:[#allocation11 + $0x278] sm:$0xff]  ;;  %v1654_v42 = vld [vmem:[#allocation11 + $0x2a8] sm:$0xff] }
 0x1d2   : > { %992 = vmatmul.mubr.f32.vlgmr.msra.gmra.mrb[32].mxu1 %v713_v57  ;;  %1249 = vmatmul.mubr.f32.vlgmr.msra.gmra.mrb[32].mxu0 %v713_v57  ;;  %v715_v16 = vmax.f32 %v529_v58, 0.0 }
 0x1d3   : > { %v716_v7 = vmax.f32 %v531_v3, 0.0  ;;  %v534_v8 = vpop.f32.mrb[4].mxu0  ;;  %v630_v9 = vpop.f32.mrb[4].mxu1  ;;  %4828 = vmatpush1.bf16.msra.mxu1 %v4827_v51  ;;  %4956 = vmatpush1.bf16.msra.mxu0 %v4955_v52  ;;  %v1626_v51 = vld [vmem:[#allocation11 + $0x1c8] sm:$0xff]  ;;  %v1633_v52 = vld [vmem:[#allocation11 + $0x200] sm:$0xff]  ;;  %v1627_v3 = vld [vmem:[#allocation11 + $0x1d0] sm:$0xff] }
 0x1d4   : > { %v535_v17 = vadd.f32 %v534_v8, %v7056_v31  ;;  %v536_v18 = vpop.f32.mrb[5].mxu0  ;;  %v7078_v19 = vadd.f32 %v630_v9, %v7056_v31  ;;  %v632_v0 = vpop.f32.mrb[5].mxu1  ;;  %4830 = vmatprep.subr.bf16.mxu1 %v4829_v53  ;;  %4958 = vmatprep.subr.bf16.mxu0 %v4957_v62  ;;  %v4967_v62 = vpack.c.bf16 %v1620_v50, %v1613_v43  ;;  %v1661_v43 = vld [vmem:[#allocation11 + $0x2e0] sm:$0xff] }
 0x1d5   : > { %v537_v24 = vadd.f32 %v536_v18, %v7059_v32  ;;  %997 = vmatprep.mubr.f32.mxu1 %v716_v7  ;;  %1254 = vmatprep.mubr.f32.mxu0 %v716_v7  ;;  %v7082_v25 = vadd.f32 %v632_v0, %v7059_v32  ;;  %v4841_v63 = vpack.c.bf16 %v1633_v52, %v1626_v51 }
 0x1d6   : > { %998 = vmatmul.mubr.f32.gmra.mrb[34].mxu1 %v715_v16  ;;  %1255 = vmatmul.mubr.f32.gmra.mrb[34].mxu0 %v715_v16  ;;  %v717_v44 = vmax.f32 %v535_v17, 0.0  ;;  %v1642_v16 = vld [vmem:[#allocation11 + $0x248] sm:$0xff]  ;;  %v1649_v17 = vld [vmem:[#allocation11 + $0x280] sm:$0xff] }
 0x1d7   : > { %v718_v33 = vmax.f32 %v537_v24, 0.0  ;;  %v540_v34 = vpop.f32.mrb[6].mxu0  ;;  %v636_v35 = vpop.f32.mrb[6].mxu1  ;;  %4832 = vmatpush1.bf16.msra.mxu1 %v4831_v10  ;;  %4960 = vmatpush1.bf16.msra.mxu0 %v4959_v11  ;;  %v4969_v10 = vpack.c.bf16 %v1635_v56, %v1628_v55  ;;  %v1634_v11 = vld [vmem:[#allocation11 + $0x208] sm:$0xff]  ;;  %v1639_v24 = vld [vmem:[#allocation11 + $0x230] sm:$0xff]  ;;  %v4849_v55 = vpack.c.bf16 %v1661_v43, %v1654_v42  ;;  %v1653_v56 = vld [vmem:[#allocation11 + $0x2a0] sm:$0xff] }
 0x1d8   : > { %v541_v45 = vadd.f32 %v540_v34, %v7056_v31  ;;  %v542_v46 = vpop.f32.mrb[7].mxu0  ;;  %v7086_v47 = vadd.f32 %v636_v35, %v7056_v31  ;;  %v638_v48 = vpop.f32.mrb[7].mxu1  ;;  %4834 = vmatprep.subr.bf16.mxu1 %v4833_v12  ;;  %4962 = vmatprep.subr.bf16.mxu0 %v4961_v20  ;;  %v1640_v12 = vld [vmem:[#allocation11 + $0x238] sm:$0xff]  ;;  %v4971_v22 = vpack.c.bf16 %v1634_v11, %v1627_v3  ;;  %v1662_v3 = vld [vmem:[#allocation11 + $0x2e8] sm:$0xff]  ;;  %v1677_v11 = vld [vmem:[#allocation11 + $0x360] sm:$0xff] }
 0x1d9   : > { %v543_v53 = vadd.f32 %v542_v46, %v7059_v32  ;;  %1003 = vmatprep.mubr.f32.mxu1 %v718_v33  ;;  %1260 = vmatprep.mubr.f32.mxu0 %v718_v33  ;;  %v7090_v54 = vadd.f32 %v638_v48, %v7059_v32  ;;  %v4845_v23 = vpack.c.bf16 %v1647_v13, %v1640_v12  ;;  %v1656_v46 = vld [vmem:[#allocation11 + $0x2b8] sm:$0xff]  ;;  %v1663_v48 = vld [vmem:[#allocation11 + $0x2f0] sm:$0xff] }
 0x1da   : > { %1004 = vmatmul.mubr.f32.gmra.mrb[36].mxu1 %v717_v44  ;;  %1261 = vmatmul.mubr.f32.gmra.mrb[36].mxu0 %v717_v44  ;;  %v719_v5 = vmax.f32 %v541_v45, 0.0  ;;  %v4847_v52 = vpack.c.bf16 %v1646_v26, %v1639_v24  ;;  %v4977_v2 = vpack.c.bf16 %v1663_v48, %v1656_v46  ;;  %v1684_v42 = vld [vmem:[#allocation11 + $0x398] sm:$0xff]  ;;  %v1691_v43 = vld [vmem:[#allocation11 + $0x3d0] sm:$0xff] }
 0x1db   : > { %v720_v57 = vmax.f32 %v543_v53, 0.0  ;;  %v546_v58 = vpop.f32.mrb[8].mxu0  ;;  %v642_v59 = vpop.f32.mrb[8].mxu1  ;;  %4836 = vmatpush1.bf16.msra.mxu1 %v4835_v36  ;;  %4964 = vmatpush1.bf16.msra.mxu0 %v4963_v37  ;;  %v4975_v53 = vpack.c.bf16 %v1648_v39, %v1641_v29 }
 0x1dc   : > { %v547_v6 = vadd.f32 %v546_v58, %v7056_v31  ;;  %v548_v7 = vpop.f32.mrb[9].mxu0  ;;  %v7094_v8 = vadd.f32 %v642_v59, %v7056_v31  ;;  %v644_v9 = vpop.f32.mrb[9].mxu1  ;;  %4838 = vmatprep.subr.bf16.mxu1 %v4837_v38  ;;  %4966 = vmatprep.subr.bf16.mxu0 %v4965_v49  ;;  %v4973_v38 = vpack.c.bf16 %v1649_v17, %v1642_v16  ;;  %v1655_v58 = vld [vmem:[#allocation11 + $0x2b0] sm:$0xff] }
 0x1dd   : > { %v549_v14 = vadd.f32 %v548_v7, %v7059_v32  ;;  %1009 = vmatprep.mubr.f32.mxu1 %v720_v57  ;;  %1266 = vmatprep.mubr.f32.mxu0 %v720_v57  ;;  %v7098_v15 = vadd.f32 %v644_v9, %v7059_v32  ;;  %v1660_v57 = vld [vmem:[#allocation11 + $0x2d8] sm:$0xff]  ;;  %v4979_v17 = vpack.c.bf16 %v1662_v3, %v1655_v58  ;;  %v1703_v3 = vld [vmem:[#allocation11 + $0x430] sm:$0xff] }
 0x1de   : > { %1010 = vmatmul.mubr.f32.gmra.mrb[38].mxu1 %v719_v5  ;;  %1267 = vmatmul.mubr.f32.gmra.mrb[38].mxu0 %v719_v5  ;;  %v721_v33 = vmax.f32 %v547_v6, 0.0  ;;  %v1668_v5 = vld [vmem:[#allocation11 + $0x318] sm:$0xff]  ;;  %v1675_v6 = vld [vmem:[#allocation11 + $0x350] sm:$0xff]  ;;  %v4851_v16 = vpack.c.bf16 %v1660_v57, %v1653_v56 }
 0x1df   : > { %v722_v18 = vmax.f32 %v549_v14, 0.0  ;;  %v552_v0 = vpop.f32.mrb[10].mxu0  ;;  %v648_v20 = vpop.f32.mrb[10].mxu1  ;;  %4840 = vmatpush1.bf16.msra.mxu1 %v4839_v61  ;;  %4968 = vmatpush1.bf16.msra.mxu0 %v4967_v62 }
 0x1e0   : > { %v553_v34 = vadd.f32 %v552_v0, %v7056_v31  ;;  %v554_v35 = vpop.f32.mrb[11].mxu0  ;;  %v7102_v36 = vadd.f32 %v648_v20, %v7056_v31  ;;  %v650_v37 = vpop.f32.mrb[11].mxu1  ;;  %4842 = vmatprep.subr.bf16.mxu1 %v4841_v63  ;;  %4970 = vmatprep.subr.bf16.mxu0 %v4969_v10  ;;  %v1670_v10 = vld [vmem:[#allocation11 + $0x328] sm:$0xff]  ;;  %v1667_v0 = vld [vmem:[#allocation11 + $0x310] sm:$0xff] }
 0x1e1   : > { %v555_v44 = vadd.f32 %v554_v35, %v7059_v32  ;;  %1015 = vmatprep.mubr.f32.mxu1 %v722_v18  ;;  %1272 = vmatprep.mubr.f32.mxu0 %v722_v18  ;;  %v7106_v45 = vadd.f32 %v650_v37, %v7059_v32  ;;  %v4853_v18 = vpack.c.bf16 %v1675_v6, %v1668_v5  ;;  %v1674_v20 = vld [vmem:[#allocation11 + $0x348] sm:$0xff]  ;;  %v1689_v37 = vld [vmem:[#allocation11 + $0x3c0] sm:$0xff] }
 0x1e2   : > { %1016 = vmatmul.mubr.f32.gmra.mrb[40].mxu1 %v721_v33  ;;  %1273 = vmatmul.mubr.f32.gmra.mrb[40].mxu0 %v721_v33  ;;  %v723_v59 = vmax.f32 %v553_v34, 0.0  ;;  %v4981_v33 = vpack.c.bf16 %v1677_v11, %v1670_v10  ;;  %v1676_v34 = vld [vmem:[#allocation11 + $0x358] sm:$0xff]  ;;  %v1682_v35 = vld [vmem:[#allocation11 + $0x388] sm:$0xff]  ;;  %v1705_v10 = vld [vmem:[#allocation11 + $0x440] sm:$0xff] }
 0x1e3   : > { %v724_v49 = vmax.f32 %v555_v44, 0.0  ;;  %v558_v50 = vpop.f32.mrb[12].mxu0  ;;  %v654_v51 = vpop.f32.mrb[12].mxu1  ;;  %4844 = vmatpush1.bf16.msra.mxu1 %v4843_v21  ;;  %4972 = vmatpush1.bf16.msra.mxu0 %v4971_v22  ;;  %v1669_v21 = vld [vmem:[#allocation11 + $0x320] sm:$0xff] }
 0x1e4   : > { %v559_v61 = vadd.f32 %v558_v50, %v7056_v31  ;;  %v560_v62 = vpop.f32.mrb[13].mxu0  ;;  %v7110_v63 = vadd.f32 %v654_v51, %v7056_v31  ;;  %v656_v1 = vpop.f32.mrb[13].mxu1  ;;  %4846 = vmatprep.subr.bf16.mxu1 %v4845_v23  ;;  %4974 = vmatprep.subr.bf16.mxu0 %v4973_v38  ;;  %v4983_v50 = vpack.c.bf16 %v1676_v34, %v1669_v21  ;;  %v1704_v34 = vld [vmem:[#allocation11 + $0x438] sm:$0xff] }
 0x1e5   : > { %v561_v7 = vadd.f32 %v560_v62, %v7059_v32  ;;  %1021 = vmatprep.mubr.f32.mxu1 %v724_v49  ;;  %1278 = vmatprep.mubr.f32.mxu0 %v724_v49  ;;  %v7114_v9 = vadd.f32 %v656_v1, %v7059_v32  ;;  %v4855_v49 = vpack.c.bf16 %v1674_v20, %v1667_v0  ;;  %v1690_v1 = vld [vmem:[#allocation11 + $0x3c8] sm:$0xff]  ;;  %v1697_v20 = vld [vmem:[#allocation11 + $0x400] sm:$0xff] }
 0x1e6   : > { %1022 = vmatmul.mubr.f32.gmra.mrb[42].mxu1 %v723_v59  ;;  %1279 = vmatmul.mubr.f32.gmra.mrb[42].mxu0 %v723_v59  ;;  %v725_v22 = vmax.f32 %v559_v61, 0.0  ;;  %v4857_v51 = vpack.c.bf16 %v1689_v37, %v1682_v35  ;;  %v4985_v62 = vpack.c.bf16 %v1691_v43, %v1684_v42  ;;  %v1702_v0 = vld [vmem:[#allocation11 + $0x428] sm:$0xff]  ;;  %v1717_v37 = vld [vmem:[#allocation11 + $0x4a0] sm:$0xff]  ;;  %v1712_v43 = vld [vmem:[#allocation11 + $0x478] sm:$0xff] }
 0x1e7   : > { %v726_v12 = vmax.f32 %v561_v7, 0.0  ;;  %v564_v13 = vpop.f32.mrb[14].mxu0  ;;  %v660_v14 = vpop.f32.mrb[14].mxu1  ;;  %4848 = vmatpush1.bf16.msra.mxu1 %v4847_v52  ;;  %4976 = vmatpush1.bf16.msra.mxu0 %v4975_v53  ;;  %v1681_v52 = vld [vmem:[#allocation11 + $0x380] sm:$0xff]  ;;  %v1688_v53 = vld [vmem:[#allocation11 + $0x3b8] sm:$0xff]  ;;  %v1698_v7 = vld [vmem:[#allocation11 + $0x408] sm:$0xff] }
 0x1e8   : > { %v565_v23 = vadd.f32 %v564_v13, %v7056_v31  ;;  %v566_v24 = vpop.f32.mrb[15].mxu0  ;;  %v7118_v26 = vadd.f32 %v660_v14, %v7056_v31  ;;  %v662_v29 = vpop.f32.mrb[15].mxu1  ;;  %4850 = vmatprep.subr.bf16.mxu1 %v4849_v55  ;;  %4978 = vmatprep.subr.bf16.mxu0 %v4977_v2  ;;  %v1683_v55 = vld [vmem:[#allocation11 + $0x390] sm:$0xff]  ;;  %v1696_v2 = vld [vmem:[#allocation11 + $0x3f8] sm:$0xff]  ;;  %v4859_v14 = vpack.c.bf16 %v1688_v53, %v1681_v52  ;;  %v1710_v35 = vld [vmem:[#allocation11 + $0x468] sm:$0xff] }
 0x1e9   : > { %v567_v38 = vadd.f32 %v566_v24, %v7059_v32  ;;  %1027 = vmatprep.mubr.f32.mxu1 %v726_v12  ;;  %1284 = vmatprep.mubr.f32.mxu0 %v726_v12  ;;  %v7122_v39 = vadd.f32 %v662_v29, %v7059_v32  ;;  %v4865_v52 = vpack.c.bf16 %v1717_v37, %v1710_v35  ;;  %v1709_v53 = vld [vmem:[#allocation11 + $0x460] sm:$0xff] }
 0x1ea   : > { %1028 = vmatmul.mubr.f32.gmra.mrb[44].mxu1 %v725_v22  ;;  %1285 = vmatmul.mubr.f32.gmra.mrb[44].mxu0 %v725_v22  ;;  %v727_v56 = vmax.f32 %v565_v23, 0.0 }
 0x1eb   : > { %v728_v44 = vmax.f32 %v567_v38, 0.0  ;;  %v570_v46 = vpop.f32.mrb[16].mxu0  ;;  %v666_v48 = vpop.f32.mrb[16].mxu1  ;;  %4852 = vmatpush1.bf16.msra.mxu1 %v4851_v16  ;;  %4980 = vmatpush1.bf16.msra.mxu0 %v4979_v17  ;;  %v4987_v16 = vpack.c.bf16 %v1690_v1, %v1683_v55  ;;  %v4861_v17 = vpack.c.bf16 %v1703_v3, %v1696_v2  ;;  %v1716_v55 = vld [vmem:[#allocation11 + $0x498] sm:$0xff]  ;;  %v1718_v3 = vld [vmem:[#allocation11 + $0x4a8] sm:$0xff] }
 0x1ec   : > { %v571_v57 = vadd.f32 %v570_v46, %v7056_v31  ;;  %v572_v58 = vpop.f32.mrb[17].mxu0  ;;  %v7126_v59 = vadd.f32 %v666_v48, %v7056_v31  ;;  %v668_v61 = vpop.f32.mrb[17].mxu1  ;;  %4854 = vmatprep.subr.bf16.mxu1 %v4853_v18  ;;  %4982 = vmatprep.subr.bf16.mxu0 %v4981_v33  ;;  %v1695_v18 = vld [vmem:[#allocation11 + $0x3f0] sm:$0xff]  ;;  %v4989_v33 = vpack.c.bf16 %v1705_v10, %v1698_v7 }
 0x1ed   : > { %v573_v5 = vadd.f32 %v572_v58, %v7059_v32  ;;  %1033 = vmatprep.mubr.f32.mxu1 %v728_v44  ;;  %1290 = vmatprep.mubr.f32.mxu0 %v728_v44  ;;  %v7130_v6 = vadd.f32 %v668_v61, %v7059_v32  ;;  %v1719_v44 = vld [vmem:[#allocation11 + $0x4b0] sm:$0xff] }
 0x1ee   : > { %1034 = vmatmul.mubr.f32.gmra.mrb[46].mxu1 %v727_v56  ;;  %1291 = vmatmul.mubr.f32.gmra.mrb[46].mxu0 %v727_v56  ;;  %v729_v21 = vmax.f32 %v571_v57, 0.0  ;;  %v1711_v56 = vld [vmem:[#allocation11 + $0x470] sm:$0xff]  ;;  %v4993_v2 = vpack.c.bf16 %v1719_v44, %v1712_v43  ;;  %v1732_v43 = vld [vmem:[#allocation11 + $0x518] sm:$0xff]  ;;  %v1738_v44 = vld [vmem:[#allocation11 + $0x548] sm:$0xff] }
 0x1ef   : > { %v730_v11 = vmax.f32 %v573_v5, 0.0  ;;  %v576_v12 = vpop.f32.mrb[18].mxu0  ;;  %v672_v13 = vpop.f32.mrb[18].mxu1  ;;  %4856 = vmatpush1.bf16.msra.mxu1 %v4855_v49  ;;  %4984 = vmatpush1.bf16.msra.mxu0 %v4983_v50  ;;  %v4863_v50 = vpack.c.bf16 %v1702_v0, %v1695_v18  ;;  %v1724_v5 = vld [vmem:[#allocation11 + $0x4d8] sm:$0xff]  ;;  %v1731_v7 = vld [vmem:[#allocation11 + $0x510] sm:$0xff]  ;;  %v4995_v0 = vpack.c.bf16 %v1718_v3, %v1711_v56 }
 0x1f0   : > { %v577_v22 = vadd.f32 %v576_v12, %v7056_v31  ;;  %v578_v23 = vpop.f32.mrb[19].mxu0  ;;  %v7134_v24 = vadd.f32 %v672_v13, %v7056_v31  ;;  %v674_v29 = vpop.f32.mrb[19].mxu1  ;;  %4858 = vmatprep.subr.bf16.mxu1 %v4857_v51  ;;  %4986 = vmatprep.subr.bf16.mxu0 %v4985_v62  ;;  %v4991_v51 = vpack.c.bf16 %v1704_v34, %v1697_v20  ;;  %v1726_v12 = vld [vmem:[#allocation11 + $0x4e8] sm:$0xff]  ;;  %v1733_v13 = vld [vmem:[#allocation11 + $0x520] sm:$0xff] }
 0x1f1   : > { %v579_v38 = vadd.f32 %v578_v23, %v7059_v32  ;;  %1039 = vmatprep.mubr.f32.mxu1 %v730_v11  ;;  %1296 = vmatprep.mubr.f32.mxu0 %v730_v11  ;;  %v7138_v42 = vadd.f32 %v674_v29, %v7059_v32  ;;  %v4869_v20 = vpack.c.bf16 %v1731_v7, %v1724_v5  ;;  %v1725_v23 = vld [vmem:[#allocation11 + $0x4e0] sm:$0xff] }
 0x1f2   : > { %1040 = vmatmul.mubr.f32.gmra.mrb[48].mxu1 %v729_v21  ;;  %1297 = vmatmul.mubr.f32.gmra.mrb[48].mxu0 %v729_v21  ;;  %v731_v57 = vmax.f32 %v577_v22, 0.0  ;;  %v1723_v21 = vld [vmem:[#allocation11 + $0x4d0] sm:$0xff]  ;;  %v1730_v22 = vld [vmem:[#allocation11 + $0x508] sm:$0xff] }
 0x1f3   : > { %v732_v46 = vmax.f32 %v579_v38, 0.0  ;;  %v582_v48 = vpop.f32.mrb[20].mxu0  ;;  %v678_v49 = vpop.f32.mrb[20].mxu1  ;;  %4860 = vmatpush1.bf16.msra.mxu1 %v4859_v14  ;;  %4988 = vmatpush1.bf16.msra.mxu0 %v4987_v16  ;;  %v4997_v38 = vpack.c.bf16 %v1733_v13, %v1726_v12 }
 0x1f4   : > { %v583_v58 = vadd.f32 %v582_v48, %v7056_v31  ;;  %v584_v61 = vpop.f32.mrb[21].mxu0  ;;  %v7142_v62 = vadd.f32 %v678_v49, %v7056_v31  ;;  %v680_v1 = vpop.f32.mrb[21].mxu1  ;;  %4862 = vmatprep.subr.bf16.mxu1 %v4861_v17  ;;  %4990 = vmatprep.subr.bf16.mxu0 %v4989_v33  ;;  %v4867_v17 = vpack.c.bf16 %v1716_v55, %v1709_v53 }
 0x1f5   : > { %v585_v10 = vadd.f32 %v584_v61, %v7059_v32  ;;  %1045 = vmatprep.mubr.f32.mxu1 %v732_v46  ;;  %1302 = vmatprep.mubr.f32.mxu0 %v732_v46  ;;  %v7146_v11 = vadd.f32 %v680_v1, %v7059_v32  ;;  %v1745_v46 = vld [vmem:[#allocation11 + $0x580] sm:$0xff]  ;;  %v1744_v1 = vld [vmem:[#allocation11 + $0x578] sm:$0xff] }
 0x1f6   : > { %1046 = vmatmul.mubr.f32.gmra.mrb[50].mxu1 %v731_v57  ;;  %1303 = vmatmul.mubr.f32.gmra.mrb[50].mxu0 %v731_v57  ;;  %v733_v29 = vmax.f32 %v583_v58, 0.0  ;;  %v4999_v57 = vpack.c.bf16 %v1732_v43, %v1725_v23  ;;  %v4873_v58 = vpack.c.bf16 %v1745_v46, %v1738_v44  ;;  %v1737_v61 = vld [vmem:[#allocation11 + $0x540] sm:$0xff]  ;;  %v1758_v43 = vld [vmem:[#allocation11 + $0x5e8] sm:$0xff] }
 0x1f7   : > { %v734_v14 = vmax.f32 %v585_v10, 0.0  ;;  %v588_v16 = vpop.f32.mrb[22].mxu0  ;;  %v684_v18 = vpop.f32.mrb[22].mxu1  ;;  %4864 = vmatpush1.bf16.msra.mxu1 %v4863_v50  ;;  %4992 = vmatpush1.bf16.msra.mxu0 %v4991_v51  ;;  %v1740_v50 = vld [vmem:[#allocation11 + $0x558] sm:$0xff]  ;;  %v1747_v51 = vld [vmem:[#allocation11 + $0x590] sm:$0xff]  ;;  %v1753_v44 = vld [vmem:[#allocation11 + $0x5c0] sm:$0xff] }
 0x1f8   : > { %v589_v33 = vadd.f32 %v588_v16, %v7056_v31  ;;  %v590_v34 = vpop.f32.mrb[23].mxu0  ;;  %v7150_v35 = vadd.f32 %v684_v18, %v7056_v31  ;;  %v686_v37 = vpop.f32.mrb[23].mxu1  ;;  %4866 = vmatprep.subr.bf16.mxu1 %v4865_v52  ;;  %4994 = vmatprep.subr.bf16.mxu0 %v4993_v2  ;;  %v4871_v52 = vpack.c.bf16 %v1730_v22, %v1723_v21  ;;  %v1739_v2 = vld [vmem:[#allocation11 + $0x550] sm:$0xff]  ;;  %v1752_v16 = vld [vmem:[#allocation11 + $0x5b8] sm:$0xff]  ;;  %v1754_v21 = vld [vmem:[#allocation11 + $0x5c8] sm:$0xff] }
 0x1f9   : > { %v591_v48 = vadd.f32 %v590_v34, %v7059_v32  ;;  %1051 = vmatprep.mubr.f32.mxu1 %v734_v14  ;;  %1308 = vmatprep.mubr.f32.mxu0 %v734_v14  ;;  %v7154_v49 = vadd.f32 %v686_v37, %v7059_v32  ;;  %v5001_v13 = vpack.c.bf16 %v1747_v51, %v1740_v50  ;;  %v1746_v14 = vld [vmem:[#allocation11 + $0x588] sm:$0xff]  ;;  %v1759_v18 = vld [vmem:[#allocation11 + $0x5f0] sm:$0xff]  ;;  %v1761_v22 = vld [vmem:[#allocation11 + $0x600] sm:$0xff] }
 0x1fa   : > { %1052 = vmatmul.mubr.f32.gmra.mrb[52].mxu1 %v733_v29  ;;  %1309 = vmatmul.mubr.f32.gmra.mrb[52].mxu0 %v733_v29  ;;  %v735_v3 = vmax.f32 %v589_v33, 0.0  ;;  %v5003_v34 = vpack.c.bf16 %v1746_v14, %v1739_v2  ;;  %v4877_v37 = vpack.c.bf16 %v1759_v18, %v1752_v16  ;;  %v1768_v2 = vld [vmem:[#allocation11 + $0x638] sm:$0xff]  ;;  %v1765_v16 = vld [vmem:[#allocation11 + $0x620] sm:$0xff] }
 0x1fb   : > { %v736_v53 = vmax.f32 %v591_v48, 0.0  ;;  %v594_v55 = vpop.f32.mrb[24].mxu0  ;;  %v690_v56 = vpop.f32.mrb[24].mxu1  ;;  %4868 = vmatpush1.bf16.msra.mxu1 %v4867_v17  ;;  %4996 = vmatpush1.bf16.msra.mxu0 %v4995_v0  ;;  %v1772_v18 = vld [vmem:[#allocation11 + $0x658] sm:$0xff] }
 0x1fc   : > { %v595_v5 = vadd.f32 %v594_v55, %v7056_v31  ;;  %v596_v7 = vpop.f32.mrb[25].mxu0  ;;  %v7158_v10 = vadd.f32 %v690_v56, %v7056_v31  ;;  %v692_v12 = vpop.f32.mrb[25].mxu1  ;;  %4870 = vmatprep.subr.bf16.mxu1 %v4869_v20  ;;  %4998 = vmatprep.subr.bf16.mxu0 %v4997_v38  ;;  %v4875_v20 = vpack.c.bf16 %v1744_v1, %v1737_v61  ;;  %v1751_v38 = vld [vmem:[#allocation11 + $0x5b0] sm:$0xff]  ;;  %v1760_v56 = vld [vmem:[#allocation11 + $0x5f8] sm:$0xff] }
 0x1fd   : > { %v597_v17 = vadd.f32 %v596_v7, %v7059_v32  ;;  %1057 = vmatprep.mubr.f32.mxu1 %v736_v53  ;;  %1314 = vmatprep.mubr.f32.mxu0 %v736_v53  ;;  %v7162_v0 = vadd.f32 %v692_v12, %v7059_v32  ;;  %v5005_v55 = vpack.c.bf16 %v1761_v22, %v1754_v21 }
 0x1fe   : > { %1058 = vmatmul.mubr.f32.gmra.mrb[54].mxu1 %v735_v3  ;;  %1315 = vmatmul.mubr.f32.gmra.mrb[54].mxu0 %v735_v3  ;;  %v737_v46 = vmax.f32 %v595_v5, 0.0  ;;  %v1775_v3 = vld [vmem:[#allocation11 + $0x670] sm:$0xff] }
 0x1ff   : > { %v738_v23 = vmax.f32 %v597_v17, 0.0  ;;  %v600_v29 = vpop.f32.mrb[26].mxu0  ;;  %v696_v33 = vpop.f32.mrb[26].mxu1  ;;  %4872 = vmatpush1.bf16.msra.mxu1 %v4871_v52  ;;  %5000 = vmatpush1.bf16.msra.mxu0 %v4999_v57  ;;  %v1766_v52 = vld [vmem:[#allocation11 + $0x628] sm:$0xff]  ;;  %v1773_v57 = vld [vmem:[#allocation11 + $0x660] sm:$0xff]  ;;  %v1767_v17 = vld [vmem:[#allocation11 + $0x630] sm:$0xff] }
 0x200   : > { %v601_v48 = vadd.f32 %v600_v29, %v7056_v31  ;;  %v602_v50 = vpop.f32.mrb[27].mxu0  ;;  %v7166_v51 = vadd.f32 %v696_v33, %v7056_v31  ;;  %v698_v53 = vpop.f32.mrb[27].mxu1  ;;  %4874 = vmatprep.subr.bf16.mxu1 %v4873_v58  ;;  %5002 = vmatprep.subr.bf16.mxu0 %v5001_v13  ;;  %v4879_v58 = vpack.c.bf16 %v1758_v43, %v1751_v38 }
 0x201   : > { %v603_v61 = vadd.f32 %v602_v50, %v7059_v32  ;;  %1063 = vmatprep.mubr.f32.mxu1 %v738_v23  ;;  %1320 = vmatprep.mubr.f32.mxu0 %v738_v23  ;;  %v7170_v1 = vadd.f32 %v698_v53, %v7059_v32  ;;  %v5007_v13 = vpack.c.bf16 %v1760_v56, %v1753_v44  ;;  %v1774_v50 = vld [vmem:[#allocation11 + $0x668] sm:$0xff] }
 0x202   : > { %1064 = vmatmul.mubr.f32.gmra.mrb[56].mxu1 %v737_v46  ;;  %1321 = vmatmul.mubr.f32.gmra.mrb[56].mxu0 %v737_v46  ;;  %v4881_v14 = vpack.c.bf16 %v1773_v57, %v1766_v52  ;;  %v739_v21 = vmax.f32 %v601_v48, 0.0  ;;  %v5009_v46 = vpack.c.bf16 %v1775_v3, %v1768_v2  ;;  %v1782_v44 = vld [vmem:[#allocation11 + $0x6a8] sm:$0xff]  ;;  %v1789_v48 = vld [vmem:[#allocation11 + $0x6e0] sm:$0xff]  ;;  %v621_v53 = vadd.f32 %v7065_v41, %v7059_v32 }
 0x203   : > { %v740_v5 = vmax.f32 %v603_v61, 0.0  ;;  %v606_v7 = vpop.f32.mrb[28].mxu0  ;;  %v702_v12 = vpop.f32.mrb[28].mxu1  ;;  %4876 = vmatpush1.bf16.msra.mxu1 %v4875_v20  ;;  %5004 = vmatpush1.bf16.msra.mxu0 %v5003_v34  ;;  %v1780_v20 = vld [vmem:[#allocation11 + $0x698] sm:$0xff]  ;;  %v1787_v34 = vld [vmem:[#allocation11 + $0x6d0] sm:$0xff]  ;;  %v4883_v52 = vpack.c.bf16 %v1772_v18, %v1765_v16  ;;  %v5011_v57 = vpack.c.bf16 %v1774_v50, %v1767_v17  ;;  %v1786_v16 = vld [vmem:[#allocation11 + $0x6c8] sm:$0xff] }
 0x204   : > { %v607_v22 = vadd.f32 %v606_v7, %v7056_v31  ;;  %v608_v23 = vpop.f32.mrb[29].mxu0  ;;  %v7174_v29 = vadd.f32 %v702_v12, %v7056_v31  ;;  %v704_v33 = vpop.f32.mrb[29].mxu1  ;;  %4878 = vmatprep.subr.bf16.mxu1 %v4877_v37  ;;  %5006 = vmatprep.subr.bf16.mxu0 %v5005_v55  ;;  %v4885_v61 = vpack.c.bf16 %v1787_v34, %v1780_v20  ;;  %v746_v17 = vmax.f32 %v621_v53, 0.0  ;;  %v1781_v50 = vld [vmem:[#allocation11 + $0x6a0] sm:$0xff] }
 0x205   : > { %v609_v38 = vadd.f32 %v608_v23, %v7059_v32  ;;  %1069 = vmatprep.mubr.f32.mxu1 %v740_v5  ;;  %1326 = vmatprep.mubr.f32.mxu0 %v740_v5  ;;  %v7178_v43 = vadd.f32 %v704_v33, %v7059_v32  ;;  %v750_v23 = vmax.f32 %v7082_v25, 0.0  ;;  %v747_v33 = vmax.f32 %v7070_v60, 0.0 }
 0x206   : > { %1070 = vmatmul.mubr.f32.gmra.mrb[58].mxu1 %v739_v21  ;;  %1327 = vmatmul.mubr.f32.gmra.mrb[58].mxu0 %v739_v21  ;;  %v741_v2 = vmax.f32 %v607_v22, 0.0  ;;  %v5013_v21 = vpack.c.bf16 %v1789_v48, %v1782_v44  ;;  %v748_v22 = vmax.f32 %v7074_v4, 0.0  ;;  %v749_v4 = vmax.f32 %v7078_v19, 0.0  ;;  %v1803_v48 = vld [vmem:[#allocation11 + $0x750] sm:$0xff] }
 0x207   : > { %v742_v37 = vmax.f32 %v609_v38, 0.0  ;;  %v612_v55 = vpop.f32.mrb[30].mxu0  ;;  %v708_v56 = vpop.f32.mrb[30].mxu1  ;;  %4880 = vmatpush1.bf16.msra.mxu1 %v4879_v58  ;;  %5008 = vmatpush1.bf16.msra.mxu0 %v5007_v13  ;;  %v1779_v13 = vld [vmem:[#allocation11 + $0x690] sm:$0xff]  ;;  %v751_v25 = vmax.f32 %v7086_v47, 0.0  ;;  %v756_v60 = vmax.f32 %v7106_v45, 0.0 }
 0x208   : > { %v613_v3 = vadd.f32 %v612_v55, %v7056_v31  ;;  %v614_v5 = vpop.f32.mrb[31].mxu0  ;;  %v7184_v7 = vadd.f32 %v708_v56, %v7056_v31  ;;  %v710_v12 = vpop.f32.mrb[31].mxu1  ;;  %4882 = vmatprep.subr.bf16.mxu1 %v4881_v14  ;;  %5010 = vmatprep.subr.bf16.mxu0 %v5009_v46  ;;  %v4887_v14 = vpack.c.bf16 %v1786_v16, %v1779_v13  ;;  %v752_v46 = vmax.f32 %v7090_v54, 0.0  ;;  %v1788_v47 = vld [vmem:[#allocation11 + $0x6d8] sm:$0xff]  ;;  %v1801_v38 = vld [vmem:[#allocation11 + $0x740] sm:$0xff]  ;;  %v1810_v13 = vld [vmem:[#allocation11 + $0x788] sm:$0xff] }
 0x209   : > { %v615_v41 = vadd.f32 %v614_v5, %v7059_v32  ;;  %1075 = vmatprep.mubr.f32.mxu1 %v742_v37  ;;  %1332 = vmatprep.mubr.f32.mxu0 %v742_v37  ;;  %v7188_v58 = vadd.f32 %v710_v12, %v7059_v32  ;;  %v745_v32 = vmax.f32 %v7063_v40, 0.0  ;;  %v754_v40 = vmax.f32 %v7098_v15, 0.0  ;;  %v1802_v12 = vld [vmem:[#allocation11 + $0x748] sm:$0xff]  ;;  %v1817_v16 = vld [vmem:[#allocation11 + $0x7c0] sm:$0xff] }
 0x20a   : > { %1076 = vmatmul.mubr.f32.gmra.mrb[60].mxu1 %v741_v2  ;;  %1333 = vmatmul.mubr.f32.gmra.mrb[60].mxu0 %v741_v2  ;;  %v743_v31 = vmax.f32 %v613_v3, 0.0  ;;  %v753_v54 = vmax.f32 %v7094_v8, 0.0  ;;  %v758_v19 = vmax.f32 %v7114_v9, 0.0  ;;  %v755_v15 = vmax.f32 %v7102_v36, 0.0  ;;  %v1794_v9 = vld [vmem:[#allocation11 + $0x708] sm:$0xff] }
 0x20b   : > { %v744_v18 = vmax.f32 %v615_v41, 0.0  ;;  %4884 = vmatpush1.bf16.msra.mxu1 %v4883_v52  ;;  %5012 = vmatpush1.bf16.msra.mxu0 %v5011_v57  ;;  %v760_v20 = vmax.f32 %v7122_v39, 0.0  ;;  %v5015_v45 = vpack.c.bf16 %v1788_v47, %v1781_v50  ;;  %v757_v34 = vmax.f32 %v7110_v63, 0.0  ;;  %v1796_v39 = vld [vmem:[#allocation11 + $0x718] sm:$0xff]  ;;  %v1829_v47 = vld [vmem:[#allocation11 + $0x820] sm:$0xff] }
 0x20c   : > { %4886 = vmatprep.subr.bf16.mxu1 %v4885_v61  ;;  %5014 = vmatprep.subr.bf16.mxu0 %v5013_v21  ;;  %v762_v8 = vmax.f32 %v7130_v6, 0.0  ;;  %v759_v36 = vmax.f32 %v7118_v26, 0.0  ;;  %v4889_v44 = vpack.c.bf16 %v1801_v38, %v1794_v9  ;;  %v764_v53 = vmax.f32 %v7138_v42, 0.0  ;;  %v1793_v61 = vld [vmem:[#allocation11 + $0x700] sm:$0xff]  ;;  %v1808_v21 = vld [vmem:[#allocation11 + $0x778] sm:$0xff] }
 0x20d   : > { %1081 = vmatprep.mubr.f32.mxu1 %v744_v18  ;;  %1338 = vmatprep.mubr.f32.mxu0 %v744_v18  ;;  %v5017_v63 = vpack.c.bf16 %v1803_v48, %v1796_v39  ;;  %v761_v37 = vmax.f32 %v7126_v59, 0.0  ;;  %v766_v26 = vmax.f32 %v7146_v11, 0.0  ;;  %v763_v6 = vmax.f32 %v7134_v24, 0.0  ;;  %v1828_v39 = vld [vmem:[#allocation11 + $0x818] sm:$0xff] }
 0x20e   : > { %1082 = vmatmul.mubr.f32.gmra.mrb[62].mxu1 %v743_v31  ;;  %1339 = vmatmul.mubr.f32.gmra.mrb[62].mxu0 %v743_v31  ;;  %v768_v55 = vmax.f32 %v7154_v49, 0.0  ;;  %v765_v42 = vmax.f32 %v7142_v62, 0.0  ;;  %v770_v59 = vmax.f32 %v7162_v0, 0.0  ;;  %v767_v11 = vmax.f32 %v7150_v35, 0.0 }
 0x20f   : > { %1087 = vmatprep.mubr.f32.mxu1 %v746_v17  ;;  %1344 = vmatprep.mubr.f32.mxu0 %v746_v17  ;;  %v772_v24 = vmax.f32 %v7170_v1, 0.0  ;;  %v769_v49 = vmax.f32 %v7158_v10, 0.0  ;;  %v774_v62 = vmax.f32 %v7178_v43, 0.0  ;;  %v771_v0 = vmax.f32 %v7166_v51, 0.0  ;;  %v905_v43 = vld [vmem:[#allocation10] sm:$0xf] }
 0x210   : > { %4888 = vmatpush1.bf16.msra.mxu1 %v4887_v14  ;;  %5016 = vmatpush1.bf16.msra.mxu0 %v5015_v45  ;;  %v776_v35 = vmax.f32 %v7188_v58, 0.0  ;;  %v773_v1 = vmax.f32 %v7174_v29, 0.0  ;;  %v775_v10 = vmax.f32 %v7184_v7, 0.0  ;;  %v7222_v56 = vrot.slane %v905_v43, %v7050_v28  ;;  %v1800_v29 = vld [vmem:[#allocation11 + $0x738] sm:$0xff]  ;;  %v1795_v7 = vld [vmem:[#allocation11 + $0x710] sm:$0xff]  ;;  %v1921_v28 = vld [vmem:[#allocation11 + $0xb00] sm:$0xff] }
 0x211   : > { %4890 = vmatprep.subr.bf16.mxu1 %v4889_v44  ;;  %5018 = vmatprep.subr.bf16.mxu0 %v5017_v63  ;;  %v7225_v51 = vrot.slane %v905_v43, %v7053_v30  ;;  %v1815_v58 = vld [vmem:[#allocation11 + $0x7b0] sm:$0xff]  ;;  %v4891_v14 = vpack.c.bf16 %v1800_v29, %v1793_v61  ;;  %v1821_v44 = vld [vmem:[#allocation11 + $0x7e0] sm:$0xff]  ;;  %v1842_v61 = vld [vmem:[#allocation11 + $0x888] sm:$0xff] }
 0x212   : > { %1088 = vmatmul.mubr.f32.gmra.mrb[64].mxu1 %v745_v32  ;;  %1345 = vmatmul.mubr.f32.gmra.mrb[64].mxu0 %v745_v32  ;;  %v1807_v32 = vld [vmem:[#allocation11 + $0x770] sm:$0xff] }
 0x213   : > { %1093 = vmatprep.mubr.f32.mxu1 %v748_v22  ;;  %1350 = vmatprep.mubr.f32.mxu0 %v748_v22  ;;  %v5019_v22 = vpack.c.bf16 %v1802_v12, %v1795_v7  ;;  %v1831_v45 = vld [vmem:[#allocation11 + $0x830] sm:$0xff] }
 0x216   : > { %1094 = vmatmul.mubr.f32.gmra.mrb[66].mxu1 %v747_v33  ;;  %1351 = vmatmul.mubr.f32.gmra.mrb[66].mxu0 %v747_v33 }
 0x217   : > { %1099 = vmatprep.mubr.f32.mxu1 %v750_v23  ;;  %1356 = vmatprep.mubr.f32.mxu0 %v750_v23  ;;  %v1814_v23 = vld [vmem:[#allocation11 + $0x7a8] sm:$0xff] }
 0x218   : > { %v4895_v9 = vpack.c.bf16 %v1814_v23, %v1807_v32 }
 0x21a   : > { %1100 = vmatmul.mubr.f32.gmra.mrb[68].mxu1 %v749_v4  ;;  %1357 = vmatmul.mubr.f32.gmra.mrb[68].mxu0 %v749_v4 }
 0x21b   : > { %1105 = vmatprep.mubr.f32.mxu1 %v752_v46  ;;  %1362 = vmatprep.mubr.f32.mxu0 %v752_v46 }
 0x21e   : > { %1106 = vmatmul.mubr.f32.gmra.mrb[70].mxu1 %v751_v25  ;;  %1363 = vmatmul.mubr.f32.gmra.mrb[70].mxu0 %v751_v25  ;;  %v4893_v25 = vpack.c.bf16 %v1815_v58, %v1808_v21  ;;  %v1844_v58 = vld [vmem:[#allocation11 + $0x898] sm:$0xff] }
 0x21f   : > { %1111 = vmatprep.mubr.f32.mxu1 %v754_v40  ;;  %1368 = vmatprep.mubr.f32.mxu0 %v754_v40 }
 0x222   : > { %1112 = vmatmul.mubr.f32.gmra.mrb[72].mxu1 %v753_v54  ;;  %1369 = vmatmul.mubr.f32.gmra.mrb[72].mxu0 %v753_v54  ;;  %v1809_v54 = vld [vmem:[#allocation11 + $0x780] sm:$0xff] }
 0x223   : > { %1117 = vmatprep.mubr.f32.mxu1 %v756_v60  ;;  %1374 = vmatprep.mubr.f32.mxu0 %v756_v60  ;;  %v5021_v60 = vpack.c.bf16 %v1817_v16, %v1810_v13  ;;  %v1850_v13 = vld [vmem:[#allocation11 + $0x8c8] sm:$0xff] }
 0x226   : > { %1118 = vmatmul.mubr.f32.gmra.mrb[74].mxu1 %v755_v15  ;;  %1375 = vmatmul.mubr.f32.gmra.mrb[74].mxu0 %v755_v15  ;;  %v1822_v15 = vld [vmem:[#allocation11 + $0x7e8] sm:$0xff] }
 0x227   : > { %1123 = vmatprep.mubr.f32.mxu1 %v758_v19  ;;  %1380 = vmatprep.mubr.f32.mxu0 %v758_v19  ;;  %v1816_v19 = vld [vmem:[#allocation11 + $0x7b8] sm:$0xff] }
 0x228   : > { %v5023_v38 = vpack.c.bf16 %v1816_v19, %v1809_v54  ;;  %v1856_v54 = vld [vmem:[#allocation11 + $0x8f8] sm:$0xff] }
 0x22a   : > { %1124 = vmatmul.mubr.f32.gmra.mrb[76].mxu1 %v757_v34  ;;  %1381 = vmatmul.mubr.f32.gmra.mrb[76].mxu0 %v757_v34 }
 0x22b   : > { %1129 = vmatprep.mubr.f32.mxu1 %v760_v20  ;;  %1386 = vmatprep.mubr.f32.mxu0 %v760_v20  ;;  %v1824_v20 = vld [vmem:[#allocation11 + $0x7f8] sm:$0xff] }
 0x22e   : > { %1130 = vmatmul.mubr.f32.gmra.mrb[78].mxu1 %v759_v36  ;;  %1387 = vmatmul.mubr.f32.gmra.mrb[78].mxu0 %v759_v36 }
 0x22f   : > { %1135 = vmatprep.mubr.f32.mxu1 %v762_v8  ;;  %1392 = vmatprep.mubr.f32.mxu0 %v762_v8 }
 0x232   : > { %1136 = vmatmul.mubr.f32.gmra.mrb[80].mxu1 %v761_v37  ;;  %1393 = vmatmul.mubr.f32.gmra.mrb[80].mxu0 %v761_v37 }
 0x233   : > { %1141 = vmatprep.mubr.f32.mxu1 %v764_v53  ;;  %1398 = vmatprep.mubr.f32.mxu0 %v764_v53 }
 0x236   : > { %1142 = vmatmul.mubr.f32.gmra.mrb[82].mxu1 %v763_v6  ;;  %1399 = vmatmul.mubr.f32.gmra.mrb[82].mxu0 %v763_v6  ;;  %v5025_v6 = vpack.c.bf16 %v1831_v45, %v1824_v20 }
 0x237   : > { %1147 = vmatprep.mubr.f32.mxu1 %v766_v26  ;;  %1404 = vmatprep.mubr.f32.mxu0 %v766_v26  ;;  %v4897_v26 = vpack.c.bf16 %v1829_v47, %v1822_v15 }
 0x23a   : > { %1148 = vmatmul.mubr.f32.gmra.mrb[84].mxu1 %v765_v42  ;;  %1405 = vmatmul.mubr.f32.gmra.mrb[84].mxu0 %v765_v42  ;;  %v1830_v42 = vld [vmem:[#allocation11 + $0x828] sm:$0xff] }
 0x23b   : > { %1153 = vmatprep.mubr.f32.mxu1 %v768_v55  ;;  %1410 = vmatprep.mubr.f32.mxu0 %v768_v55  ;;  %v1823_v55 = vld [vmem:[#allocation11 + $0x7f0] sm:$0xff] }
 0x23c   : > { %v5027_v43 = vpack.c.bf16 %v1830_v42, %v1823_v55 }
 0x23e   : > { %1154 = vmatmul.mubr.f32.gmra.mrb[86].mxu1 %v767_v11  ;;  %1411 = vmatmul.mubr.f32.gmra.mrb[86].mxu0 %v767_v11 }
 0x23f   : > { %1159 = vmatprep.mubr.f32.mxu1 %v770_v59  ;;  %1416 = vmatprep.mubr.f32.mxu0 %v770_v59  ;;  %v1836_v59 = vld [vmem:[#allocation11 + $0x858] sm:$0xff] }
 0x242   : > { %1160 = vmatmul.mubr.f32.gmra.mrb[88].mxu1 %v769_v49  ;;  %1417 = vmatmul.mubr.f32.gmra.mrb[88].mxu0 %v769_v49  ;;  %v1838_v49 = vld [vmem:[#allocation11 + $0x868] sm:$0xff] }
 0x243   : > { %1165 = vmatprep.mubr.f32.mxu1 %v772_v24  ;;  %1422 = vmatprep.mubr.f32.mxu0 %v772_v24  ;;  %v1843_v24 = vld [vmem:[#allocation11 + $0x890] sm:$0xff] }
 0x244   : > { %v4901_v12 = vpack.c.bf16 %v1843_v24, %v1836_v59  ;;  %v1870_v24 = vld [vmem:[#allocation11 + $0x968] sm:$0xff] }
 0x246   : > { %1166 = vmatmul.mubr.f32.gmra.mrb[90].mxu1 %v771_v0  ;;  %1423 = vmatmul.mubr.f32.gmra.mrb[90].mxu0 %v771_v0 }
 0x247   : > { %1171 = vmatprep.mubr.f32.mxu1 %v774_v62  ;;  %1428 = vmatprep.mubr.f32.mxu0 %v774_v62  ;;  %v1845_v62 = vld [vmem:[#allocation11 + $0x8a0] sm:$0xff] }
 0x248   : > { %v5029_v21 = vpack.c.bf16 %v1845_v62, %v1838_v49 }
 0x24a   : > { %1172 = vmatmul.mubr.f32.gmra.mrb[92].mxu1 %v773_v1  ;;  %1429 = vmatmul.mubr.f32.gmra.mrb[92].mxu0 %v773_v1 }
 0x24b   : > { %1177 = vmatprep.mubr.f32.mxu1 %v776_v35  ;;  %1434 = vmatprep.mubr.f32.mxu0 %v776_v35 }
 0x24e   : > { %1178 = vmatmul.mubr.f32.gmra.mrb[94].mxu1 %v775_v10  ;;  %1435 = vmatmul.mubr.f32.gmra.mrb[94].mxu0 %v775_v10  ;;  %v4899_v10 = vpack.c.bf16 %v1828_v39, %v1821_v44  ;;  %v1871_v39 = vld [vmem:[#allocation11 + $0x970] sm:$0xff] }
 0x2a5   : > { %v993_v52 = vpop.f32.mrb[32].mxu1  ;;  %v7227_v57 = vpop.f32.mrb[32].mxu0 }
 0x2a6   : > { %v994_v2 = vadd.f32 %v993_v52, %v7222_v56  ;;  %v995_v3 = vpop.f32.mrb[33].mxu1  ;;  %v7230_v5 = vpop.f32.mrb[33].mxu0  ;;  %v1835_v52 = vld [vmem:[#allocation11 + $0x850] sm:$0xff] }
 0x2a7   : > { %v996_v41 = vadd.f32 %v995_v3, %v7225_v51 }
 0x2a8   : > { %v7237_v33 = vmax.f32 %v994_v2, 0.0 }
 0x2a9   : > { %v7233_v18 = vmax.f32 %v996_v41, 0.0  ;;  %v999_v17 = vpop.f32.mrb[34].mxu1  ;;  %v7235_v31 = vpop.f32.mrb[34].mxu0  ;;  %v1837_v41 = vld [vmem:[#allocation11 + $0x860] sm:$0xff] }
 0x2aa   : > { %9093 = vst [vmem:[#allocation24_spill] sm:$0xff] %v7237_v33  ;;  %v1000_v46 = vadd.f32 %v999_v17, %v7222_v56  ;;  %v1001_v4 = vpop.f32.mrb[35].mxu1  ;;  %v7240_v40 = vpop.f32.mrb[35].mxu0  ;;  %v1857_v17 = vld [vmem:[#allocation11 + $0x900] sm:$0xff] }
 0x2ab   : > { %9092 = vst [vmem:[#allocation23_spill] sm:$0xff] %v7233_v18  ;;  %v1002_v50 = vadd.f32 %v1001_v4, %v7225_v51  ;;  %2118 = vmatprep.mubr.f32.mxu1 %v7233_v18  ;;  %2632 = vmatprep.mubr.f32.mxu0 %v7233_v18  ;;  %v4903_v4 = vpack.c.bf16 %v1842_v61, %v1835_v52  ;;  %v1865_v61 = vld [vmem:[#allocation11 + $0x940] sm:$0xff] }
 0x2ac   : > { %2119 = vmatmul.mubr.f32.vlgmr.msra.gmra.mrb[96].mxu1 %v7237_v33  ;;  %2633 = vmatmul.mubr.f32.vlgmr.msra.gmra.mrb[96].mxu0 %v7237_v33  ;;  %v7251_v48 = vmax.f32 %v1000_v46, 0.0  ;;  %v4905_v20 = vpack.c.bf16 %v1857_v17, %v1850_v13 }
 0x2ad   : > { %v7247_v34 = vmax.f32 %v1002_v50, 0.0  ;;  %4892 = vmatpush1.bf16.msra.mxu1 %v4891_v14  ;;  %v1005_v8 = vpop.f32.mrb[36].mxu1  ;;  %v7249_v36 = vpop.f32.mrb[36].mxu0  ;;  %5020 = vmatpush1.bf16.msra.mxu0 %v5019_v22  ;;  %v1852_v14 = vld [vmem:[#allocation11 + $0x8d8] sm:$0xff]  ;;  %v1859_v22 = vld [vmem:[#allocation11 + $0x910] sm:$0xff] }
 0x2ae   : > { %9095 = vst [vmem:[#allocation26_spill] sm:$0xff] %v7251_v48  ;;  %v1006_v53 = vadd.f32 %v1005_v8, %v7222_v56  ;;  %v1007_v63 = vpop.f32.mrb[37].mxu1  ;;  %v7254_v37 = vpop.f32.mrb[37].mxu0  ;;  %4894 = vmatprep.subr.bf16.mxu1 %v4893_v25  ;;  %5022 = vmatprep.subr.bf16.mxu0 %v5021_v60  ;;  %v5031_v25 = vpack.c.bf16 %v1844_v58, %v1837_v41  ;;  %v1849_v60 = vld [vmem:[#allocation11 + $0x8c0] sm:$0xff]  ;;  %v1851_v8 = vld [vmem:[#allocation11 + $0x8d0] sm:$0xff]  ;;  %v1880_v41 = vld [vmem:[#allocation11 + $0x9b8] sm:$0xff] }
 0x2af   : > { %9094 = vst [vmem:[#allocation25_spill] sm:$0xff] %v7247_v34  ;;  %v1008_v11 = vadd.f32 %v1007_v63, %v7225_v51  ;;  %2124 = vmatprep.mubr.f32.mxu1 %v7247_v34  ;;  %2638 = vmatprep.mubr.f32.mxu0 %v7247_v34  ;;  %v5033_v45 = vpack.c.bf16 %v1859_v22, %v1852_v14  ;;  %v1873_v63 = vld [vmem:[#allocation11 + $0x980] sm:$0xff]  ;;  %v1887_v58 = vld [vmem:[#allocation11 + $0x9f0] sm:$0xff] }
 0x2b0   : > { %2125 = vmatmul.mubr.f32.gmra.mrb[98].mxu1 %v7251_v48  ;;  %2639 = vmatmul.mubr.f32.gmra.mrb[98].mxu0 %v7251_v48  ;;  %v7265_v29 = vmax.f32 %v1006_v53, 0.0  ;;  %v1866_v53 = vld [vmem:[#allocation11 + $0x948] sm:$0xff]  ;;  %v4907_v42 = vpack.c.bf16 %v1856_v54, %v1849_v60  ;;  %v2012_v48 = vld [vmem:[#allocation11 + $0xdd8] sm:$0xff] }
 0x2b1   : > { %v7261_v0 = vmax.f32 %v1008_v11, 0.0  ;;  %v1011_v35 = vpop.f32.mrb[38].mxu1  ;;  %v7263_v1 = vpop.f32.mrb[38].mxu0  ;;  %4896 = vmatpush1.bf16.msra.mxu1 %v4895_v9  ;;  %5024 = vmatpush1.bf16.msra.mxu0 %v5023_v38  ;;  %v1858_v9 = vld [vmem:[#allocation11 + $0x908] sm:$0xff]  ;;  %v1864_v38 = vld [vmem:[#allocation11 + $0x938] sm:$0xff]  ;;  %v1863_v11 = vld [vmem:[#allocation11 + $0x930] sm:$0xff]  ;;  %v5037_v52 = vpack.c.bf16 %v1873_v63, %v1866_v53 }
 0x2b2   : > { %9097 = vst [vmem:[#allocation28_spill] sm:$0xff] %v7265_v29  ;;  %v1012_v2 = vadd.f32 %v1011_v35, %v7222_v56  ;;  %v1013_v3 = vpop.f32.mrb[39].mxu1  ;;  %v7268_v7 = vpop.f32.mrb[39].mxu0  ;;  %4898 = vmatprep.subr.bf16.mxu1 %v4897_v26  ;;  %5026 = vmatprep.subr.bf16.mxu0 %v5025_v6  ;;  %v5035_v59 = vpack.c.bf16 %v1858_v9, %v1851_v8  ;;  %v1886_v8 = vld [vmem:[#allocation11 + $0x9e8] sm:$0xff]  ;;  %v1892_v9 = vld [vmem:[#allocation11 + $0xa18] sm:$0xff]  ;;  %v1901_v53 = vld [vmem:[#allocation11 + $0xa60] sm:$0xff] }
 0x2b3   : > { %9096 = vst [vmem:[#allocation27_spill] sm:$0xff] %v7261_v0  ;;  %v1014_v16 = vadd.f32 %v1013_v3, %v7225_v51  ;;  %2130 = vmatprep.mubr.f32.mxu1 %v7261_v0  ;;  %2644 = vmatprep.mubr.f32.mxu0 %v7261_v0  ;;  %v1878_v3 = vld [vmem:[#allocation11 + $0x9a8] sm:$0xff]  ;;  %v4911_v14 = vpack.c.bf16 %v1870_v24, %v1863_v11  ;;  %v1891_v24 = vld [vmem:[#allocation11 + $0xa10] sm:$0xff]  ;;  %v2004_v0 = vld [vmem:[#allocation11 + $0xd98] sm:$0xff] }
 0x2b4   : > { %2131 = vmatmul.mubr.f32.gmra.mrb[100].mxu1 %v7265_v29  ;;  %2645 = vmatmul.mubr.f32.gmra.mrb[100].mxu0 %v7265_v29  ;;  %v7279_v19 = vmax.f32 %v1012_v2, 0.0  ;;  %v1872_v2 = vld [vmem:[#allocation11 + $0x978] sm:$0xff]  ;;  %v1998_v29 = vld [vmem:[#allocation11 + $0xd68] sm:$0xff] }
 0x2b5   : > { %v7275_v32 = vmax.f32 %v1014_v16, 0.0  ;;  %v1017_v23 = vpop.f32.mrb[40].mxu1  ;;  %v7277_v46 = vpop.f32.mrb[40].mxu0  ;;  %4900 = vmatpush1.bf16.msra.mxu1 %v4899_v10  ;;  %5028 = vmatpush1.bf16.msra.mxu0 %v5027_v43  ;;  %v4909_v43 = vpack.c.bf16 %v1871_v39, %v1864_v38  ;;  %v5039_v22 = vpack.c.bf16 %v1872_v2, %v1865_v61  ;;  %v1894_v39 = vld [vmem:[#allocation11 + $0xa28] sm:$0xff] }
 0x2b6   : > { %9099 = vst [vmem:[#allocation30_spill] sm:$0xff] %v7279_v19  ;;  %v1018_v15 = vadd.f32 %v1017_v23, %v7222_v56  ;;  %v1019_v50 = vpop.f32.mrb[41].mxu1  ;;  %v7282_v47 = vpop.f32.mrb[41].mxu0  ;;  %4902 = vmatprep.subr.bf16.mxu1 %v4901_v12  ;;  %5030 = vmatprep.subr.bf16.mxu0 %v5029_v21  ;;  %v1885_v21 = vld [vmem:[#allocation11 + $0x9e0] sm:$0xff] }
 0x2b7   : > { %9098 = vst [vmem:[#allocation29_spill] sm:$0xff] %v7275_v32  ;;  %v1020_v44 = vadd.f32 %v1019_v50, %v7225_v51  ;;  %2136 = vmatprep.mubr.f32.mxu1 %v7275_v32  ;;  %2650 = vmatprep.mubr.f32.mxu0 %v7275_v32  ;;  %v1877_v23 = vld [vmem:[#allocation11 + $0x9a0] sm:$0xff]  ;;  %v4913_v50 = vpack.c.bf16 %v1885_v21, %v1878_v3  ;;  %v1900_v21 = vld [vmem:[#allocation11 + $0xa58] sm:$0xff]  ;;  %v1990_v32 = vld [vmem:[#allocation11 + $0xd28] sm:$0xff] }
 0x2b8   : > { %2137 = vmatmul.mubr.f32.gmra.mrb[102].mxu1 %v7279_v19  ;;  %2651 = vmatmul.mubr.f32.gmra.mrb[102].mxu0 %v7279_v19  ;;  %v7293_v49 = vmax.f32 %v1018_v15, 0.0  ;;  %v5045_v3 = vpack.c.bf16 %v1901_v53, %v1894_v39  ;;  %v1984_v19 = vld [vmem:[#allocation11 + $0xcf8] sm:$0xff] }
 0x2b9   : > { %v7289_v26 = vmax.f32 %v1020_v44, 0.0  ;;  %v1023_v6 = vpop.f32.mrb[42].mxu1  ;;  %v7291_v55 = vpop.f32.mrb[42].mxu0  ;;  %4904 = vmatpush1.bf16.msra.mxu1 %v4903_v4  ;;  %5032 = vmatpush1.bf16.msra.mxu0 %v5031_v25  ;;  %v1884_v4 = vld [vmem:[#allocation11 + $0x9d8] sm:$0xff]  ;;  %v1899_v44 = vld [vmem:[#allocation11 + $0xa50] sm:$0xff] }
 0x2ba   : > { %9101 = vst [vmem:[#allocation32_spill] sm:$0xff] %v7293_v49  ;;  %v1024_v62 = vadd.f32 %v1023_v6, %v7222_v56  ;;  %v1025_v35 = vpop.f32.mrb[43].mxu1  ;;  %v7296_v10 = vpop.f32.mrb[43].mxu0  ;;  %4906 = vmatprep.subr.bf16.mxu1 %v4905_v20  ;;  %5034 = vmatprep.subr.bf16.mxu0 %v5033_v45  ;;  %v5041_v20 = vpack.c.bf16 %v1887_v58, %v1880_v41  ;;  %v1879_v45 = vld [vmem:[#allocation11 + $0x9b0] sm:$0xff]  ;;  %v1906_v41 = vld [vmem:[#allocation11 + $0xa88] sm:$0xff] }
 0x2bb   : > { %9100 = vst [vmem:[#allocation31_spill] sm:$0xff] %v7289_v26  ;;  %v1026_v12 = vadd.f32 %v1025_v35, %v7225_v51  ;;  %2142 = vmatprep.mubr.f32.mxu1 %v7289_v26  ;;  %2656 = vmatprep.mubr.f32.mxu0 %v7289_v26  ;;  %v5043_v11 = vpack.c.bf16 %v1886_v8, %v1879_v45  ;;  %v1912_v45 = vld [vmem:[#allocation11 + $0xab8] sm:$0xff] }
 0x2bc   : > { %2143 = vmatmul.mubr.f32.gmra.mrb[104].mxu1 %v7293_v49  ;;  %2657 = vmatmul.mubr.f32.gmra.mrb[104].mxu0 %v7293_v49  ;;  %v7307_v25 = vmax.f32 %v1024_v62, 0.0  ;;  %v1898_v62 = vld [vmem:[#allocation11 + $0xa48] sm:$0xff]  ;;  %v4917_v2 = vpack.c.bf16 %v1899_v44, %v1892_v9  ;;  %v1976_v26 = vld [vmem:[#allocation11 + $0xcb8] sm:$0xff] }
 0x2bd   : > { %v7303_v13 = vmax.f32 %v1026_v12, 0.0  ;;  %v1029_v16 = vpop.f32.mrb[44].mxu1  ;;  %v7305_v17 = vpop.f32.mrb[44].mxu0  ;;  %4908 = vmatpush1.bf16.msra.mxu1 %v4907_v42  ;;  %5036 = vmatpush1.bf16.msra.mxu0 %v5035_v59  ;;  %v4915_v59 = vpack.c.bf16 %v1884_v4, %v1877_v23  ;;  %v1893_v12 = vld [vmem:[#allocation11 + $0xa20] sm:$0xff]  ;;  %v1970_v49 = vld [vmem:[#allocation11 + $0xc88] sm:$0xff] }
 0x2be   : > { %9103 = vst [vmem:[#allocation34_spill] sm:$0xff] %v7307_v25  ;;  %v1030_v60 = vadd.f32 %v1029_v16, %v7222_v56  ;;  %v1031_v54 = vpop.f32.mrb[45].mxu1  ;;  %v7310_v15 = vpop.f32.mrb[45].mxu0  ;;  %4910 = vmatprep.subr.bf16.mxu1 %v4909_v43  ;;  %5038 = vmatprep.subr.bf16.mxu0 %v5037_v52  ;;  %v1913_v16 = vld [vmem:[#allocation11 + $0xac0] sm:$0xff] }
 0x2bf   : > { %9102 = vst [vmem:[#allocation33_spill] sm:$0xff] %v7303_v13  ;;  %v1032_v38 = vadd.f32 %v1031_v54, %v7225_v51  ;;  %2148 = vmatprep.mubr.f32.mxu1 %v7303_v13  ;;  %2662 = vmatprep.mubr.f32.mxu0 %v7303_v13  ;;  %v4919_v54 = vpack.c.bf16 %v1898_v62, %v1891_v24  ;;  %v1922_v24 = vld [vmem:[#allocation11 + $0xb08] sm:$0xff]  ;;  %v1929_v62 = vld [vmem:[#allocation11 + $0xb40] sm:$0xff] }
 0x2c0   : > { %2149 = vmatmul.mubr.f32.gmra.mrb[106].mxu1 %v7307_v25  ;;  %2663 = vmatmul.mubr.f32.gmra.mrb[106].mxu0 %v7307_v25  ;;  %v7321_v35 = vmax.f32 %v1030_v60, 0.0  ;;  %v4921_v39 = vpack.c.bf16 %v1913_v16, %v1906_v41  ;;  %v1919_v41 = vld [vmem:[#allocation11 + $0xaf0] sm:$0xff]  ;;  %v1926_v16 = vld [vmem:[#allocation11 + $0xb28] sm:$0xff]  ;;  %v5053_v30 = vpack.c.bf16 %v1929_v62, %v1922_v24  ;;  %v1956_v25 = vld [vmem:[#allocation11 + $0xc18] sm:$0xff] }
 0x2c1   : > { %v7317_v63 = vmax.f32 %v1032_v38, 0.0  ;;  %v1035_v6 = vpop.f32.mrb[46].mxu1  ;;  %v7319_v42 = vpop.f32.mrb[46].mxu0  ;;  %4912 = vmatpush1.bf16.msra.mxu1 %v4911_v14  ;;  %5040 = vmatpush1.bf16.msra.mxu0 %v5039_v22  ;;  %v1908_v14 = vld [vmem:[#allocation11 + $0xa98] sm:$0xff]  ;;  %v1915_v22 = vld [vmem:[#allocation11 + $0xad0] sm:$0xff]  ;;  %v1962_v13 = vld [vmem:[#allocation11 + $0xc48] sm:$0xff] }
 0x2c2   : > { %9105 = vst [vmem:[#allocation36_spill] sm:$0xff] %v7321_v35  ;;  %v1036_v43 = vadd.f32 %v1035_v6, %v7222_v56  ;;  %v1037_v52 = vpop.f32.mrb[47].mxu1  ;;  %v7324_v61 = vpop.f32.mrb[47].mxu0  ;;  %4914 = vmatprep.subr.bf16.mxu1 %v4913_v50  ;;  %5042 = vmatprep.subr.bf16.mxu0 %v5041_v20  ;;  %v5047_v50 = vpack.c.bf16 %v1900_v21, %v1893_v12  ;;  %v1905_v20 = vld [vmem:[#allocation11 + $0xa80] sm:$0xff]  ;;  %v1907_v6 = vld [vmem:[#allocation11 + $0xa90] sm:$0xff] }
 0x2c3   : > { %9104 = vst [vmem:[#allocation35_spill] sm:$0xff] %v7317_v63  ;;  %v1038_v58 = vadd.f32 %v1037_v52, %v7225_v51  ;;  %2154 = vmatprep.mubr.f32.mxu1 %v7317_v63  ;;  %2668 = vmatprep.mubr.f32.mxu0 %v7317_v63  ;;  %v5049_v53 = vpack.c.bf16 %v1915_v22, %v1908_v14  ;;  %v1914_v52 = vld [vmem:[#allocation11 + $0xac8] sm:$0xff]  ;;  %v1948_v63 = vld [vmem:[#allocation11 + $0xbd8] sm:$0xff] }
 0x2c4   : > { %2155 = vmatmul.mubr.f32.gmra.mrb[108].mxu1 %v7321_v35  ;;  %2669 = vmatmul.mubr.f32.gmra.mrb[108].mxu0 %v7321_v35  ;;  %v7335_v8 = vmax.f32 %v1036_v43, 0.0  ;;  %v4923_v12 = vpack.c.bf16 %v1912_v45, %v1905_v20  ;;  %v5051_v21 = vpack.c.bf16 %v1914_v52, %v1907_v6  ;;  %v1936_v20 = vld [vmem:[#allocation11 + $0xb78] sm:$0xff]  ;;  %v1943_v45 = vld [vmem:[#allocation11 + $0xbb0] sm:$0xff]  ;;  %v4927_v6 = vpack.c.bf16 %v1926_v16, %v1919_v41  ;;  %v1942_v35 = vld [vmem:[#allocation11 + $0xba8] sm:$0xff] }
 0x2c5   : > { %v7331_v23 = vmax.f32 %v1038_v58, 0.0  ;;  %v1041_v4 = vpop.f32.mrb[48].mxu1  ;;  %v7333_v60 = vpop.f32.mrb[48].mxu0  ;;  %4916 = vmatpush1.bf16.msra.mxu1 %v4915_v59  ;;  %5044 = vmatpush1.bf16.msra.mxu0 %v5043_v11  ;;  %v1920_v58 = vld [vmem:[#allocation11 + $0xaf8] sm:$0xff]  ;;  %v1927_v11 = vld [vmem:[#allocation11 + $0xb30] sm:$0xff] }
 0x2c6   : > { %9107 = vst [vmem:[#allocation38_spill] sm:$0xff] %v7335_v8  ;;  %v1042_v9 = vadd.f32 %v1041_v4, %v7222_v56  ;;  %v1043_v38 = vpop.f32.mrb[49].mxu1  ;;  %v7338_v44 = vpop.f32.mrb[49].mxu0  ;;  %4918 = vmatprep.subr.bf16.mxu1 %v4917_v2  ;;  %5046 = vmatprep.subr.bf16.mxu0 %v5045_v3 }
 0x2c7   : > { %9106 = vst [vmem:[#allocation37_spill] sm:$0xff] %v7331_v23  ;;  %v1044_v59 = vadd.f32 %v1043_v38, %v7225_v51  ;;  %2160 = vmatprep.mubr.f32.mxu1 %v7331_v23  ;;  %2674 = vmatprep.mubr.f32.mxu0 %v7331_v23  ;;  %v1934_v23 = vld [vmem:[#allocation11 + $0xb68] sm:$0xff] }
 0x2c8   : > { %2161 = vmatmul.mubr.f32.gmra.mrb[110].mxu1 %v7335_v8  ;;  %2675 = vmatmul.mubr.f32.gmra.mrb[110].mxu0 %v7335_v8  ;;  %v7349_v14 = vmax.f32 %v1042_v9, 0.0  ;;  %v1928_v8 = vld [vmem:[#allocation11 + $0xb38] sm:$0xff] }
 0x2c9   : > { %v7345_v43 = vmax.f32 %v1044_v59, 0.0  ;;  %v1047_v2 = vpop.f32.mrb[50].mxu1  ;;  %v7347_v3 = vpop.f32.mrb[50].mxu0  ;;  %4920 = vmatpush1.bf16.msra.mxu1 %v4919_v54  ;;  %5048 = vmatpush1.bf16.msra.mxu0 %v5047_v50  ;;  %v4925_v59 = vpack.c.bf16 %v1927_v11, %v1920_v58  ;;  %v1941_v50 = vld [vmem:[#allocation11 + $0xba0] sm:$0xff]  ;;  %v5055_v52 = vpack.c.bf16 %v1928_v8, %v1921_v28  ;;  %v1940_v11 = vld [vmem:[#allocation11 + $0xb98] sm:$0xff]  ;;  %v1955_v28 = vld [vmem:[#allocation11 + $0xc10] sm:$0xff] }
 0x2ca   : > { %9109 = vst [vmem:[#allocation40_spill] sm:$0xff] %v7349_v14  ;;  %v1048_v22 = vadd.f32 %v1047_v2, %v7222_v56  ;;  %v1049_v4 = vpop.f32.mrb[51].mxu1  ;;  %v7352_v38 = vpop.f32.mrb[51].mxu0  ;;  %4922 = vmatprep.subr.bf16.mxu1 %v4921_v39  ;;  %5050 = vmatprep.subr.bf16.mxu0 %v5049_v53  ;;  %v1933_v58 = vld [vmem:[#allocation11 + $0xb60] sm:$0xff]  ;;  %v1950_v8 = vld [vmem:[#allocation11 + $0xbe8] sm:$0xff] }
 0x2cb   : > { %9108 = vst [vmem:[#allocation39_spill] sm:$0xff] %v7345_v43  ;;  %v1050_v54 = vadd.f32 %v1049_v4, %v7225_v51  ;;  %2166 = vmatprep.mubr.f32.mxu1 %v7345_v43  ;;  %2680 = vmatprep.mubr.f32.mxu0 %v7345_v43  ;;  %v1935_v43 = vld [vmem:[#allocation11 + $0xb70] sm:$0xff]  ;;  %v4931_v16 = vpack.c.bf16 %v1940_v11, %v1933_v58 }
 0x2cc   : > { %2167 = vmatmul.mubr.f32.gmra.mrb[112].mxu1 %v7349_v14  ;;  %2681 = vmatmul.mubr.f32.gmra.mrb[112].mxu0 %v7349_v14  ;;  %v7363_v24 = vmax.f32 %v1048_v22, 0.0  ;;  %v5057_v14 = vpack.c.bf16 %v1943_v45, %v1936_v20  ;;  %v5059_v22 = vpack.c.bf16 %v1942_v35, %v1935_v43  ;;  %v1969_v35 = vld [vmem:[#allocation11 + $0xc80] sm:$0xff]  ;;  %v1964_v43 = vld [vmem:[#allocation11 + $0xc58] sm:$0xff] }
 0x2cd   : > { %v7359_v9 = vmax.f32 %v1050_v54, 0.0  ;;  %v1053_v39 = vpop.f32.mrb[52].mxu1  ;;  %v7361_v53 = vpop.f32.mrb[52].mxu0  ;;  %4924 = vmatpush1.bf16.msra.mxu1 %v4923_v12  ;;  %5052 = vmatpush1.bf16.msra.mxu0 %v5051_v21  ;;  %v4929_v54 = vpack.c.bf16 %v1941_v50, %v1934_v23  ;;  %v1957_v21 = vld [vmem:[#allocation11 + $0xc20] sm:$0xff]  ;;  %v1954_v50 = vld [vmem:[#allocation11 + $0xc08] sm:$0xff] }
 0x2ce   : > { %9111 = vst [vmem:[#allocation42_spill] sm:$0xff] %v7363_v24  ;;  %v1054_v62 = vadd.f32 %v1053_v39, %v7222_v56  ;;  %v1055_v2 = vpop.f32.mrb[53].mxu1  ;;  %v7366_v4 = vpop.f32.mrb[53].mxu0  ;;  %4926 = vmatprep.subr.bf16.mxu1 %v4925_v59  ;;  %5054 = vmatprep.subr.bf16.mxu0 %v5053_v30  ;;  %v1947_v59 = vld [vmem:[#allocation11 + $0xbd0] sm:$0xff] }
 0x2cf   : > { %9110 = vst [vmem:[#allocation41_spill] sm:$0xff] %v7359_v9  ;;  %v1056_v12 = vadd.f32 %v1055_v2, %v7225_v51  ;;  %2172 = vmatprep.mubr.f32.mxu1 %v7359_v9  ;;  %2686 = vmatprep.mubr.f32.mxu0 %v7359_v9  ;;  %v1949_v9 = vld [vmem:[#allocation11 + $0xbe0] sm:$0xff]  ;;  %v4935_v11 = vpack.c.bf16 %v1954_v50, %v1947_v59 }
 0x2d0   : > { %2173 = vmatmul.mubr.f32.gmra.mrb[114].mxu1 %v7363_v24  ;;  %2687 = vmatmul.mubr.f32.gmra.mrb[114].mxu0 %v7363_v24  ;;  %v7377_v20 = vmax.f32 %v1054_v62, 0.0  ;;  %v5061_v24 = vpack.c.bf16 %v1957_v21, %v1950_v8  ;;  %v5063_v62 = vpack.c.bf16 %v1956_v25, %v1949_v9  ;;  %v1983_v25 = vld [vmem:[#allocation11 + $0xcf0] sm:$0xff]  ;;  %v1978_v9 = vld [vmem:[#allocation11 + $0xcc8] sm:$0xff] }
 0x2d1   : > { %v7373_v41 = vmax.f32 %v1056_v12, 0.0  ;;  %v1059_v30 = vpop.f32.mrb[54].mxu1  ;;  %v7375_v23 = vpop.f32.mrb[54].mxu0  ;;  %4928 = vmatpush1.bf16.msra.mxu1 %v4927_v6  ;;  %5056 = vmatpush1.bf16.msra.mxu0 %v5055_v52  ;;  %v4933_v12 = vpack.c.bf16 %v1955_v28, %v1948_v63  ;;  %v1971_v52 = vld [vmem:[#allocation11 + $0xc90] sm:$0xff]  ;;  %v1968_v28 = vld [vmem:[#allocation11 + $0xc78] sm:$0xff] }
 0x2d2   : > { %9113 = vst [vmem:[#allocation44_spill] sm:$0xff] %v7377_v20  ;;  %v1060_v45 = vadd.f32 %v1059_v30, %v7222_v56  ;;  %v1061_v39 = vpop.f32.mrb[55].mxu1  ;;  %v7380_v2 = vpop.f32.mrb[55].mxu0  ;;  %4930 = vmatprep.subr.bf16.mxu1 %v4929_v54  ;;  %5058 = vmatprep.subr.bf16.mxu0 %v5057_v14  ;;  %v1961_v54 = vld [vmem:[#allocation11 + $0xc40] sm:$0xff] }
 0x2d3   : > { %9112 = vst [vmem:[#allocation43_spill] sm:$0xff] %v7373_v41  ;;  %v1062_v6 = vadd.f32 %v1061_v39, %v7225_v51  ;;  %2178 = vmatprep.mubr.f32.mxu1 %v7373_v41  ;;  %2692 = vmatprep.mubr.f32.mxu0 %v7373_v41  ;;  %v1963_v41 = vld [vmem:[#allocation11 + $0xc50] sm:$0xff]  ;;  %v4939_v50 = vpack.c.bf16 %v1968_v28, %v1961_v54 }
 0x2d4   : > { %2179 = vmatmul.mubr.f32.gmra.mrb[116].mxu1 %v7377_v20  ;;  %2693 = vmatmul.mubr.f32.gmra.mrb[116].mxu0 %v7377_v20  ;;  %v7391_v8 = vmax.f32 %v1060_v45, 0.0  ;;  %v5065_v20 = vpack.c.bf16 %v1971_v52, %v1964_v43  ;;  %v5067_v45 = vpack.c.bf16 %v1970_v49, %v1963_v41  ;;  %v1997_v49 = vld [vmem:[#allocation11 + $0xd60] sm:$0xff]  ;;  %v1992_v41 = vld [vmem:[#allocation11 + $0xd38] sm:$0xff] }
 0x2d5   : > { %v7387_v58 = vmax.f32 %v1062_v6, 0.0  ;;  %v1065_v63 = vpop.f32.mrb[56].mxu1  ;;  %v7389_v14 = vpop.f32.mrb[56].mxu0  ;;  %4932 = vmatpush1.bf16.msra.mxu1 %v4931_v16  ;;  %5060 = vmatpush1.bf16.msra.mxu0 %v5059_v22  ;;  %v4937_v6 = vpack.c.bf16 %v1969_v35, %v1962_v13  ;;  %v1985_v22 = vld [vmem:[#allocation11 + $0xd00] sm:$0xff]  ;;  %v1982_v35 = vld [vmem:[#allocation11 + $0xce8] sm:$0xff] }
 0x2d6   : > { %9115 = vst [vmem:[#allocation46_spill] sm:$0xff] %v7391_v8  ;;  %v1066_v21 = vadd.f32 %v1065_v63, %v7222_v56  ;;  %v1067_v30 = vpop.f32.mrb[57].mxu1  ;;  %v7394_v39 = vpop.f32.mrb[57].mxu0  ;;  %4934 = vmatprep.subr.bf16.mxu1 %v4933_v12  ;;  %5062 = vmatprep.subr.bf16.mxu0 %v5061_v24  ;;  %v1975_v12 = vld [vmem:[#allocation11 + $0xcb0] sm:$0xff] }
 0x2d7   : > { %9114 = vst [vmem:[#allocation45_spill] sm:$0xff] %v7387_v58  ;;  %v1068_v16 = vadd.f32 %v1067_v30, %v7225_v51  ;;  %2184 = vmatprep.mubr.f32.mxu1 %v7387_v58  ;;  %2698 = vmatprep.mubr.f32.mxu0 %v7387_v58  ;;  %v1977_v58 = vld [vmem:[#allocation11 + $0xcc0] sm:$0xff]  ;;  %v4943_v28 = vpack.c.bf16 %v1982_v35, %v1975_v12 }
 0x2d8   : > { %2185 = vmatmul.mubr.f32.gmra.mrb[118].mxu1 %v7391_v8  ;;  %2699 = vmatmul.mubr.f32.gmra.mrb[118].mxu0 %v7391_v8  ;;  %v7405_v43 = vmax.f32 %v1066_v21, 0.0  ;;  %v5069_v8 = vpack.c.bf16 %v1985_v22, %v1978_v9  ;;  %v5071_v21 = vpack.c.bf16 %v1984_v19, %v1977_v58  ;;  %v2011_v19 = vld [vmem:[#allocation11 + $0xdd0] sm:$0xff]  ;;  %v2006_v58 = vld [vmem:[#allocation11 + $0xda8] sm:$0xff] }
 0x2d9   : > { %v7401_v59 = vmax.f32 %v1068_v16, 0.0  ;;  %v1071_v13 = vpop.f32.mrb[58].mxu1  ;;  %v7403_v24 = vpop.f32.mrb[58].mxu0  ;;  %4936 = vmatpush1.bf16.msra.mxu1 %v4935_v11  ;;  %5064 = vmatpush1.bf16.msra.mxu0 %v5063_v62  ;;  %v4941_v16 = vpack.c.bf16 %v1983_v25, %v1976_v26  ;;  %v1999_v62 = vld [vmem:[#allocation11 + $0xd70] sm:$0xff]  ;;  %v1996_v25 = vld [vmem:[#allocation11 + $0xd58] sm:$0xff] }
 0x2da   : > { %9117 = vst [vmem:[#allocation48_spill] sm:$0xff] %v7405_v43  ;;  %v1072_v52 = vadd.f32 %v1071_v13, %v7222_v56  ;;  %v1073_v63 = vpop.f32.mrb[59].mxu1  ;;  %v7408_v30 = vpop.f32.mrb[59].mxu0  ;;  %4938 = vmatprep.subr.bf16.mxu1 %v4937_v6  ;;  %5066 = vmatprep.subr.bf16.mxu0 %v5065_v20  ;;  %v1989_v6 = vld [vmem:[#allocation11 + $0xd20] sm:$0xff] }
 0x2db   : > { %9116 = vst [vmem:[#allocation47_spill] sm:$0xff] %v7401_v59  ;;  %v1074_v11 = vadd.f32 %v1073_v63, %v7225_v51  ;;  %2190 = vmatprep.mubr.f32.mxu1 %v7401_v59  ;;  %2704 = vmatprep.mubr.f32.mxu0 %v7401_v59  ;;  %v1991_v59 = vld [vmem:[#allocation11 + $0xd30] sm:$0xff]  ;;  %v4947_v35 = vpack.c.bf16 %v1996_v25, %v1989_v6 }
 0x2dc   : > { %2191 = vmatmul.mubr.f32.gmra.mrb[120].mxu1 %v7405_v43  ;;  %2705 = vmatmul.mubr.f32.gmra.mrb[120].mxu0 %v7405_v43  ;;  %v7419_v9 = vmax.f32 %v1072_v52, 0.0  ;;  %v5073_v43 = vpack.c.bf16 %v1999_v62, %v1992_v41  ;;  %v5075_v52 = vpack.c.bf16 %v1998_v29, %v1991_v59  ;;  %v1574_v29 = vld [vmem:[#allocation11 + $0x28] sm:$0xff]  ;;  %v1581_v59 = vld [vmem:[#allocation11 + $0x60] sm:$0xff] }
 0x2dd   : > { %v7415_v54 = vmax.f32 %v1074_v11, 0.0  ;;  %v1077_v26 = vpop.f32.mrb[60].mxu1  ;;  %v7417_v20 = vpop.f32.mrb[60].mxu0  ;;  %4940 = vmatpush1.bf16.msra.mxu1 %v4939_v50  ;;  %5068 = vmatpush1.bf16.msra.mxu0 %v5067_v45  ;;  %v4945_v11 = vpack.c.bf16 %v1997_v49, %v1990_v32  ;;  %v2013_v45 = vld [vmem:[#allocation11 + $0xde0] sm:$0xff] }
 0x2de   : > { %9119 = vst [vmem:[#allocation50_spill] sm:$0xff] %v7419_v9  ;;  %v1078_v22 = vadd.f32 %v1077_v26, %v7222_v56  ;;  %v1079_v13 = vpop.f32.mrb[61].mxu1  ;;  %v7422_v63 = vpop.f32.mrb[61].mxu0  ;;  %4942 = vmatprep.subr.bf16.mxu1 %v4941_v16  ;;  %5070 = vmatprep.subr.bf16.mxu0 %v5069_v8  ;;  %v2003_v16 = vld [vmem:[#allocation11 + $0xd90] sm:$0xff] }
 0x2df   : > { %9118 = vst [vmem:[#allocation49_spill] sm:$0xff] %v7415_v54  ;;  %v1080_v50 = vadd.f32 %v1079_v13, %v7225_v51  ;;  %2196 = vmatprep.mubr.f32.mxu1 %v7415_v54  ;;  %2710 = vmatprep.mubr.f32.mxu0 %v7415_v54  ;;  %v4949_v13 = vpack.c.bf16 %v2011_v19, %v2004_v0  ;;  %v2005_v54 = vld [vmem:[#allocation11 + $0xda0] sm:$0xff] }
 0x2e0   : > { %2197 = vmatmul.mubr.f32.gmra.mrb[122].mxu1 %v7419_v9  ;;  %2711 = vmatmul.mubr.f32.gmra.mrb[122].mxu0 %v7419_v9  ;;  %v7433_v49 = vmax.f32 %v1078_v22, 0.0  ;;  %v5077_v9 = vpack.c.bf16 %v2013_v45, %v2006_v58  ;;  %v5079_v25 = vpack.c.bf16 %v2012_v48, %v2005_v54  ;;  %v5081_v45 = vpack.c.bf16 %v1581_v59, %v1574_v29 }
 0x2e1   : > { %v7429_v12 = vmax.f32 %v1080_v50, 0.0  ;;  %v1083_v32 = vpop.f32.mrb[62].mxu1  ;;  %v7431_v8 = vpop.f32.mrb[62].mxu0  ;;  %4944 = vmatpush1.bf16.msra.mxu1 %v4943_v28  ;;  %5072 = vmatpush1.bf16.msra.mxu0 %v5071_v21  ;;  %v2010_v50 = vld [vmem:[#allocation11 + $0xdc8] sm:$0xff] }
 0x2e2   : > { %9121 = vst [vmem:[#allocation52_spill] sm:$0xff] %v7433_v49  ;;  %v1084_v41 = vadd.f32 %v1083_v32, %v7222_v56  ;;  %v1085_v62 = vpop.f32.mrb[63].mxu1  ;;  %v7436_v26 = vpop.f32.mrb[63].mxu0  ;;  %4946 = vmatprep.subr.bf16.mxu1 %v4945_v11  ;;  %5074 = vmatprep.subr.bf16.mxu0 %v5073_v43  ;;  %v4951_v6 = vpack.c.bf16 %v2010_v50, %v2003_v16 }
 0x2e3   : > { %9120 = vst [vmem:[#allocation51_spill] sm:$0xff] %v7429_v12  ;;  %v1086_v28 = vadd.f32 %v1085_v62, %v7225_v51  ;;  %2202 = vmatprep.mubr.f32.mxu1 %v7429_v12  ;;  %2716 = vmatprep.mubr.f32.mxu0 %v7429_v12  ;;  %v8945_v62 = vmov 0.0|0.0  }
 0x2e4   : > { %2203 = vmatmul.mubr.f32.gmra.mrb[124].mxu1 %v7433_v49  ;;  %2717 = vmatmul.mubr.f32.gmra.mrb[124].mxu0 %v7433_v49  ;;  %v7447_v22 = vmax.f32 %v1084_v41, 0.0 }
 0x2e5   : > { %v7443_v21 = vmax.f32 %v1086_v28, 0.0  ;;  %v1089_v43 = vpop.f32.mrb[64].mxu1  ;;  %v7445_v0 = vpop.f32.mrb[64].mxu0  ;;  %4948 = vmatpush1.bf16.msra.mxu1 %v4947_v35  ;;  %5076 = vmatpush1.bf16.msra.mxu0 %v5075_v52 }
 0x2e6   : > { %9123 = vst [vmem:[#allocation54_spill] sm:$0xff] %v7447_v22  ;;  %v1090_v11 = vadd.f32 %v1089_v43, %v7222_v56  ;;  %v1091_v19 = vpop.f32.mrb[65].mxu1  ;;  %v7450_v58 = vpop.f32.mrb[65].mxu0  ;;  %4950 = vmatprep.subr.bf16.mxu1 %v4949_v13  ;;  %5078 = vmatprep.subr.bf16.mxu0 %v5077_v9 }
 0x2e7   : > { %9122 = vst [vmem:[#allocation53_spill] sm:$0xff] %v7443_v21  ;;  %v1092_v32 = vadd.f32 %v1091_v19, %v7225_v51  ;;  %2208 = vmatprep.mubr.f32.mxu1 %v7443_v21  ;;  %2722 = vmatprep.mubr.f32.mxu0 %v7443_v21 }
 0x2e8   : > { %2209 = vmatmul.mubr.f32.gmra.mrb[126].mxu1 %v7447_v22  ;;  %2723 = vmatmul.mubr.f32.gmra.mrb[126].mxu0 %v7447_v22  ;;  %v7461_v52 = vmax.f32 %v1090_v11, 0.0 }
 0x2e9   : > { %v7457_v48 = vmax.f32 %v1092_v32, 0.0  ;;  %v1095_v54 = vpop.f32.mrb[66].mxu1  ;;  %v7459_v35 = vpop.f32.mrb[66].mxu0  ;;  %4952 = vmatpush1.bf16.msra.mxu1 %v4951_v6  ;;  %5080 = vmatpush1.bf16.msra.mxu0 %v5079_v25 }
 0x2ea   : > { %9125 = vst [vmem:[#allocation56_spill] sm:$0xff] %v7461_v52  ;;  %v1096_v9 = vadd.f32 %v1095_v54, %v7222_v56  ;;  %v1097_v16 = vpop.f32.mrb[67].mxu1  ;;  %v7464_v41 = vpop.f32.mrb[67].mxu0  ;;  %5082 = vmatprep.subr.bf16.mxu1 %v5081_v45  ;;  %5209 = vmatprep.subr.bf16.mxu0 %v8945_v62 }
 0x2eb   : > { %9124 = vst [vmem:[#allocation55_spill] sm:$0xff] %v7457_v48  ;;  %v1098_v13 = vadd.f32 %v1097_v16, %v7225_v51  ;;  %2214 = vmatprep.mubr.f32.mxu1 %v7457_v48  ;;  %2728 = vmatprep.mubr.f32.mxu0 %v7457_v48 }
 0x2ec   : > { %2215 = vmatmul.mubr.f32.gmra.mrb[128].mxu1 %v7461_v52  ;;  %2729 = vmatmul.mubr.f32.gmra.mrb[128].mxu0 %v7461_v52  ;;  %v7476_v59 = vmax.f32 %v1096_v9, 0.0 }
 0x2ed   : > { %v7472_v50 = vmax.f32 %v1098_v13, 0.0  ;;  %v1101_v28 = vpop.f32.mrb[68].mxu1  ;;  %v7474_v29 = vpop.f32.mrb[68].mxu0 }
 0x2ee   : > { %9127 = vst [vmem:[#allocation58_spill] sm:$0xff] %v7476_v59  ;;  %v1102_v43 = vadd.f32 %v1101_v28, %v7222_v56  ;;  %v1103_v6 = vpop.f32.mrb[69].mxu1  ;;  %v7479_v25 = vpop.f32.mrb[69].mxu0 }
 0x2ef   : > { %9126 = vst [vmem:[#allocation57_spill] sm:$0xff] %v7472_v50  ;;  %v1104_v11 = vadd.f32 %v1103_v6, %v7225_v51  ;;  %2220 = vmatprep.mubr.f32.mxu1 %v7472_v50  ;;  %2734 = vmatprep.mubr.f32.mxu0 %v7472_v50 }
 0x2f0   : > { %2221 = vmatmul.mubr.f32.gmra.mrb[130].mxu1 %v7476_v59  ;;  %2735 = vmatmul.mubr.f32.gmra.mrb[130].mxu0 %v7476_v59  ;;  %v7490_v54 = vmax.f32 %v1102_v43, 0.0 }
 0x2f1   : > { %v7486_v19 = vmax.f32 %v1104_v11, 0.0  ;;  %v1107_v45 = vpop.f32.mrb[70].mxu1  ;;  %v7488_v32 = vpop.f32.mrb[70].mxu0 }
 0x2f2   : > { %9129 = vst [vmem:[#allocation60_spill] sm:$0xff] %v7490_v54  ;;  %v1108_v9 = vadd.f32 %v1107_v45, %v7222_v56  ;;  %v1109_v16 = vpop.f32.mrb[71].mxu1  ;;  %v7493_v13 = vpop.f32.mrb[71].mxu0 }
 0x2f3   : > { %9128 = vst [vmem:[#allocation59_spill] sm:$0xff] %v7486_v19  ;;  %v1110_v28 = vadd.f32 %v1109_v16, %v7225_v51  ;;  %2226 = vmatprep.mubr.f32.mxu1 %v7486_v19  ;;  %2740 = vmatprep.mubr.f32.mxu0 %v7486_v19 }
 0x2f4   : > { %2227 = vmatmul.mubr.f32.gmra.mrb[132].mxu1 %v7490_v54  ;;  %2741 = vmatmul.mubr.f32.gmra.mrb[132].mxu0 %v7490_v54  ;;  %v7504_v62 = vmax.f32 %v1108_v9, 0.0 }
 0x2f5   : > { %v7500_v6 = vmax.f32 %v1110_v28, 0.0  ;;  %v1113_v11 = vpop.f32.mrb[72].mxu1  ;;  %v7502_v43 = vpop.f32.mrb[72].mxu0 }
 0x2f6   : > { %9131 = vst [vmem:[#allocation62_spill] sm:$0xff] %v7504_v62  ;;  %v1114_v45 = vadd.f32 %v1113_v11, %v7222_v56  ;;  %v1115_v59 = vpop.f32.mrb[73].mxu1  ;;  %v7507_v50 = vpop.f32.mrb[73].mxu0 }
 0x2f7   : > { %9130 = vst [vmem:[#allocation61_spill] sm:$0xff] %v7500_v6  ;;  %v1116_v16 = vadd.f32 %v1115_v59, %v7225_v51  ;;  %2232 = vmatprep.mubr.f32.mxu1 %v7500_v6  ;;  %2746 = vmatprep.mubr.f32.mxu0 %v7500_v6 }
 0x2f8   : > { %2233 = vmatmul.mubr.f32.gmra.mrb[134].mxu1 %v7504_v62  ;;  %2747 = vmatmul.mubr.f32.gmra.mrb[134].mxu0 %v7504_v62  ;;  %v7518_v19 = vmax.f32 %v1114_v45, 0.0 }
 0x2f9   : > { %v7514_v28 = vmax.f32 %v1116_v16, 0.0  ;;  %v1119_v54 = vpop.f32.mrb[74].mxu1  ;;  %v7516_v9 = vpop.f32.mrb[74].mxu0 }
 0x2fa   : > { %9133 = vst [vmem:[#allocation64_spill] sm:$0xff] %v7518_v19  ;;  %v1120_v11 = vadd.f32 %v1119_v54, %v7222_v56  ;;  %v1121_v52 = vpop.f32.mrb[75].mxu1  ;;  %v7521_v48 = vpop.f32.mrb[75].mxu0 }
 0x2fb   : > { %9132 = vst [vmem:[#allocation63_spill] sm:$0xff] %v7514_v28  ;;  %v1122_v59 = vadd.f32 %v1121_v52, %v7225_v51  ;;  %2238 = vmatprep.mubr.f32.mxu1 %v7514_v28  ;;  %2752 = vmatprep.mubr.f32.mxu0 %v7514_v28 }
 0x2fc   : > { %2239 = vmatmul.mubr.f32.gmra.mrb[136].mxu1 %v7518_v19  ;;  %2753 = vmatmul.mubr.f32.gmra.mrb[136].mxu0 %v7518_v19  ;;  %v7532_v6 = vmax.f32 %v1120_v11, 0.0 }
 0x2fd   : > { %v7528_v16 = vmax.f32 %v1122_v59, 0.0  ;;  %v1125_v62 = vpop.f32.mrb[76].mxu1  ;;  %v7530_v45 = vpop.f32.mrb[76].mxu0 }
 0x2fe   : > { %9135 = vst [vmem:[#allocation66_spill] sm:$0xff] %v7530_v45  ;;  %9136 = vst [vmem:[#allocation67_spill] sm:$0xff] %v7532_v6  ;;  %v1126_v54 = vadd.f32 %v1125_v62, %v7222_v56  ;;  %v1127_v22 = vpop.f32.mrb[77].mxu1  ;;  %v7535_v21 = vpop.f32.mrb[77].mxu0  ;;  %v1596_v45 = vld [vmem:[#allocation11 + $0xd8] sm:$0xff] }
 0x2ff   : > { %9134 = vst [vmem:[#allocation65_spill] sm:$0xff] %v7528_v16  ;;  %v1128_v52 = vadd.f32 %v1127_v22, %v7225_v51  ;;  %2244 = vmatprep.mubr.f32.mxu1 %v7528_v16  ;;  %2758 = vmatprep.mubr.f32.mxu0 %v7528_v16 }
 0x300   : > { %2245 = vmatmul.mubr.f32.gmra.mrb[138].mxu1 %v7532_v6  ;;  %2759 = vmatmul.mubr.f32.gmra.mrb[138].mxu0 %v7532_v6  ;;  %v7546_v28 = vmax.f32 %v1126_v54, 0.0 }
 0x301   : > { %v7542_v59 = vmax.f32 %v1128_v52, 0.0  ;;  %v1131_v19 = vpop.f32.mrb[78].mxu1  ;;  %v7544_v11 = vpop.f32.mrb[78].mxu0 }
 0x302   : > { %9138 = vst [vmem:[#allocation69_spill] sm:$0xff] %v7544_v11  ;;  %9139 = vst [vmem:[#allocation70_spill] sm:$0xff] %v7546_v28  ;;  %v1132_v62 = vadd.f32 %v1131_v19, %v7222_v56  ;;  %v1133_v49 = vpop.f32.mrb[79].mxu1  ;;  %v7549_v12 = vpop.f32.mrb[79].mxu0 }
 0x303   : > { %9137 = vst [vmem:[#allocation68_spill] sm:$0xff] %v7542_v59  ;;  %9140 = vst [vmem:[#allocation71_spill] sm:$0xff] %v7549_v12  ;;  %v1134_v22 = vadd.f32 %v1133_v49, %v7225_v51  ;;  %2250 = vmatprep.mubr.f32.mxu1 %v7542_v59  ;;  %2764 = vmatprep.mubr.f32.mxu0 %v7542_v59 }
 0x304   : > { %2251 = vmatmul.mubr.f32.gmra.mrb[140].mxu1 %v7546_v28  ;;  %2765 = vmatmul.mubr.f32.gmra.mrb[140].mxu0 %v7546_v28  ;;  %v7560_v16 = vmax.f32 %v1132_v62, 0.0 }
 0x305   : > { %v7556_v52 = vmax.f32 %v1134_v22, 0.0  ;;  %v1137_v6 = vpop.f32.mrb[80].mxu1  ;;  %v7558_v54 = vpop.f32.mrb[80].mxu0 }
 0x306   : > { %9142 = vst [vmem:[#allocation73_spill] sm:$0xff] %v7558_v54  ;;  %9143 = vst [vmem:[#allocation74_spill] sm:$0xff] %v7560_v16  ;;  %v1138_v19 = vadd.f32 %v1137_v6, %v7222_v56  ;;  %v1139_v34 = vpop.f32.mrb[81].mxu1  ;;  %v7563_v33 = vpop.f32.mrb[81].mxu0 }
 0x307   : > { %9141 = vst [vmem:[#allocation72_spill] sm:$0xff] %v7556_v52  ;;  %9144 = vst [vmem:[#allocation75_spill] sm:$0xff] %v7563_v33  ;;  %v1140_v49 = vadd.f32 %v1139_v34, %v7225_v51  ;;  %2256 = vmatprep.mubr.f32.mxu1 %v7556_v52  ;;  %2770 = vmatprep.mubr.f32.mxu0 %v7556_v52  ;;  %v6370_v33 = vld [vmem:[#allocation10] sm:$0xf] }
 0x308   : > { %2257 = vmatmul.mubr.f32.gmra.mrb[142].mxu1 %v7560_v16  ;;  %2771 = vmatmul.mubr.f32.gmra.mrb[142].mxu0 %v7560_v16  ;;  %v7574_v59 = vmax.f32 %v1138_v19, 0.0 }
 0x309   : > { %v7570_v22 = vmax.f32 %v1140_v49, 0.0  ;;  %v1143_v28 = vpop.f32.mrb[82].mxu1  ;;  %v7572_v62 = vpop.f32.mrb[82].mxu0 }
 0x30a   : > { %9146 = vst [vmem:[#allocation77_spill] sm:$0xff] %v7572_v62  ;;  %9147 = vst [vmem:[#allocation78_spill] sm:$0xff] %v7574_v59  ;;  %v1144_v6 = vadd.f32 %v1143_v28, %v7222_v56  ;;  %v1145_v18 = vpop.f32.mrb[83].mxu1  ;;  %v7577_v54 = vpop.f32.mrb[83].mxu0 }
 0x30b   : > { %9145 = vst [vmem:[#allocation76_spill] sm:$0xff] %v7570_v22  ;;  %9148 = vst [vmem:[#allocation79_spill] sm:$0xff] %v7577_v54  ;;  %v1146_v34 = vadd.f32 %v1145_v18, %v7225_v51  ;;  %2262 = vmatprep.mubr.f32.mxu1 %v7570_v22  ;;  %2776 = vmatprep.mubr.f32.mxu0 %v7570_v22 }
 0x30c   : > { %2263 = vmatmul.mubr.f32.gmra.mrb[144].mxu1 %v7574_v59  ;;  %2777 = vmatmul.mubr.f32.gmra.mrb[144].mxu0 %v7574_v59  ;;  %v7588_v52 = vmax.f32 %v1144_v6, 0.0 }
 0x30d   : > { %v7584_v49 = vmax.f32 %v1146_v34, 0.0  ;;  %v1149_v16 = vpop.f32.mrb[84].mxu1  ;;  %v7586_v19 = vpop.f32.mrb[84].mxu0 }
 0x30e   : > { %9150 = vst [vmem:[#allocation81_spill] sm:$0xff] %v7586_v19  ;;  %9151 = vst [vmem:[#allocation82_spill] sm:$0xff] %v7588_v52  ;;  %v1150_v28 = vadd.f32 %v1149_v16, %v7222_v56  ;;  %v1151_v62 = vpop.f32.mrb[85].mxu1  ;;  %v7591_v54 = vpop.f32.mrb[85].mxu0 }
 0x30f   : > { %9149 = vst [vmem:[#allocation80_spill] sm:$0xff] %v7584_v49  ;;  %9152 = vst [vmem:[#allocation83_spill] sm:$0xff] %v7591_v54  ;;  %v1152_v18 = vadd.f32 %v1151_v62, %v7225_v51  ;;  %2268 = vmatprep.mubr.f32.mxu1 %v7584_v49  ;;  %2782 = vmatprep.mubr.f32.mxu0 %v7584_v49 }
 0x310   : > { %2269 = vmatmul.mubr.f32.gmra.mrb[146].mxu1 %v7588_v52  ;;  %2783 = vmatmul.mubr.f32.gmra.mrb[146].mxu0 %v7588_v52  ;;  %v7602_v22 = vmax.f32 %v1150_v28, 0.0 }
 0x311   : > { %v7598_v34 = vmax.f32 %v1152_v18, 0.0  ;;  %v1155_v59 = vpop.f32.mrb[86].mxu1  ;;  %v7600_v6 = vpop.f32.mrb[86].mxu0 }
 0x312   : > { %9154 = vst [vmem:[#allocation85_spill] sm:$0xff] %v7600_v6  ;;  %9155 = vst [vmem:[#allocation86_spill] sm:$0xff] %v7602_v22  ;;  %v1156_v16 = vadd.f32 %v1155_v59, %v7222_v56  ;;  %v1157_v19 = vpop.f32.mrb[87].mxu1  ;;  %v7605_v54 = vpop.f32.mrb[87].mxu0 }
 0x313   : > { %9153 = vst [vmem:[#allocation84_spill] sm:$0xff] %v7598_v34  ;;  %9156 = vst [vmem:[#allocation87_spill] sm:$0xff] %v7605_v54  ;;  %v1158_v62 = vadd.f32 %v1157_v19, %v7225_v51  ;;  %2274 = vmatprep.mubr.f32.mxu1 %v7598_v34  ;;  %2788 = vmatprep.mubr.f32.mxu0 %v7598_v34 }
 0x314   : > { %2275 = vmatmul.mubr.f32.gmra.mrb[148].mxu1 %v7602_v22  ;;  %2789 = vmatmul.mubr.f32.gmra.mrb[148].mxu0 %v7602_v22  ;;  %v7616_v49 = vmax.f32 %v1156_v16, 0.0 }
 0x315   : > { %v7612_v18 = vmax.f32 %v1158_v62, 0.0  ;;  %v1161_v52 = vpop.f32.mrb[88].mxu1  ;;  %v7614_v28 = vpop.f32.mrb[88].mxu0 }
 0x316   : > { %9158 = vst [vmem:[#allocation89_spill] sm:$0xff] %v7614_v28  ;;  %9159 = vst [vmem:[#allocation90_spill] sm:$0xff] %v7616_v49  ;;  %v1162_v59 = vadd.f32 %v1161_v52, %v7222_v56  ;;  %v1163_v6 = vpop.f32.mrb[89].mxu1  ;;  %v7619_v54 = vpop.f32.mrb[89].mxu0 }
 0x317   : > { %9157 = vst [vmem:[#allocation88_spill] sm:$0xff] %v7612_v18  ;;  %9160 = vst [vmem:[#allocation91_spill] sm:$0xff] %v7619_v54  ;;  %v1164_v19 = vadd.f32 %v1163_v6, %v7225_v51  ;;  %2280 = vmatprep.mubr.f32.mxu1 %v7612_v18  ;;  %2794 = vmatprep.mubr.f32.mxu0 %v7612_v18 }
 0x318   : > { %2281 = vmatmul.mubr.f32.gmra.mrb[150].mxu1 %v7616_v49  ;;  %2795 = vmatmul.mubr.f32.gmra.mrb[150].mxu0 %v7616_v49  ;;  %v7630_v34 = vmax.f32 %v1162_v59, 0.0 }
 0x319   : > { %v7626_v62 = vmax.f32 %v1164_v19, 0.0  ;;  %v1167_v22 = vpop.f32.mrb[90].mxu1  ;;  %v7628_v16 = vpop.f32.mrb[90].mxu0 }
 0x31a   : > { %9162 = vst [vmem:[#allocation93_spill] sm:$0xff] %v7628_v16  ;;  %9163 = vst [vmem:[#allocation94_spill] sm:$0xff] %v7630_v34  ;;  %v1168_v52 = vadd.f32 %v1167_v22, %v7222_v56  ;;  %v1169_v28 = vpop.f32.mrb[91].mxu1  ;;  %v7633_v54 = vpop.f32.mrb[91].mxu0 }
 0x31b   : > { %9161 = vst [vmem:[#allocation92_spill] sm:$0xff] %v7626_v62  ;;  %9164 = vst [vmem:[#allocation95_spill] sm:$0xff] %v7633_v54  ;;  %v1170_v18 = vadd.f32 %v1169_v28, %v7225_v51  ;;  %2286 = vmatprep.mubr.f32.mxu1 %v7626_v62  ;;  %2800 = vmatprep.mubr.f32.mxu0 %v7626_v62  ;;  %v9169_v62 = vsub.s32 3, %v7047_v27 }
 0x31c   : > { %2287 = vmatmul.mubr.f32.gmra.mrb[152].mxu1 %v7630_v34  ;;  %2801 = vmatmul.mubr.f32.gmra.mrb[152].mxu0 %v7630_v34  ;;  %v7646_v16 = vmax.f32 %v1168_v52, 0.0  ;;  %v9172_v34 = vsub.s32 2, %v7047_v27 }
 0x31d   : > { %v7641_v19 = vmax.f32 %v1170_v18, 0.0  ;;  %v1173_v59 = vpop.f32.mrb[92].mxu1  ;;  %v7643_v49 = vpop.f32.mrb[92].mxu0  ;;  %v7653_v11 = vrot.slane %v6370_v33, %v9169_v62 }
 0x31e   : > { %9166 = vst [vmem:[#allocation97_spill] sm:$0xff] %v7643_v49  ;;  %9167 = vst [vmem:[#allocation98_spill] sm:$0xff] %v7646_v16  ;;  %v1174_v6 = vadd.f32 %v1173_v59, %v7222_v56  ;;  %v1175_v28 = vpop.f32.mrb[93].mxu1  ;;  %v7649_v54 = vpop.f32.mrb[93].mxu0  ;;  %v7666_v49 = vrot.slane %v6370_v33, %v9172_v34 }
 0x31f   : > { %9165 = vst [vmem:[#allocation96_spill] sm:$0xff] %v7641_v19  ;;  %9168 = vst [vmem:[#allocation99_spill] sm:$0xff] %v7649_v54  ;;  %v1176_v18 = vadd.f32 %v1175_v28, %v7225_v51  ;;  %2292 = vmatprep.mubr.f32.mxu1 %v7641_v19  ;;  %2806 = vmatprep.mubr.f32.mxu0 %v7641_v19  ;;  %v1253_v19 = vadd.f32 %v7230_v5, %v7653_v11 }
 0x320   : > { %2293 = vmatmul.mubr.f32.gmra.mrb[154].mxu1 %v7646_v16  ;;  %2807 = vmatmul.mubr.f32.gmra.mrb[154].mxu0 %v7646_v16  ;;  %v7668_v62 = vmax.f32 %v1174_v6, 0.0  ;;  %v1573_v6 = vld [vmem:[#allocation11 + $0x20] sm:$0xff]  ;;  %v1265_v27 = vadd.f32 %v7254_v37, %v7653_v11 }
 0x321   : > { %v7660_v52 = vmax.f32 %v1176_v18, 0.0  ;;  %v1179_v59 = vpop.f32.mrb[94].mxu1  ;;  %v7662_v22 = vpop.f32.mrb[94].mxu0  ;;  %v7686_v5 = vmax.f32 %v1253_v19, 0.0 }
 0x322   : > { %9171 = vst [vmem:[#allocation101_spill] sm:$0xff] %v7662_v22  ;;  %9173 = vst [vmem:[#allocation102_spill] sm:$0xff] %v7668_v62  ;;  %v1180_v28 = vadd.f32 %v1179_v59, %v7222_v56  ;;  %v1181_v54 = vpop.f32.mrb[95].mxu1  ;;  %v7671_v12 = vpop.f32.mrb[95].mxu0  ;;  %v1251_v56 = vadd.f32 %v7227_v57, %v7666_v49  ;;  %v1580_v59 = vld [vmem:[#allocation11 + $0x58] sm:$0xff]  ;;  %v1594_v22 = vld [vmem:[#allocation11 + $0xc8] sm:$0xff] }
 0x323   : > { %9170 = vst [vmem:[#allocation100_spill] sm:$0xff] %v7660_v52  ;;  %9174 = vst [vmem:[#allocation103_spill] sm:$0xff] %v7671_v12  ;;  %v1182_v18 = vadd.f32 %v1181_v54, %v7225_v51  ;;  %2298 = vmatprep.mubr.f32.mxu1 %v7660_v52  ;;  %2812 = vmatprep.mubr.f32.mxu0 %v7660_v52  ;;  %v1259_v51 = vadd.f32 %v7240_v40, %v7653_v11  ;;  %v1575_v54 = vld [vmem:[#allocation11 + $0x30] sm:$0xff]  ;;  %v1588_v57 = vld [vmem:[#allocation11 + $0x98] sm:$0xff] }
 0x324   : > { %2299 = vmatmul.mubr.f32.gmra.mrb[156].mxu1 %v7668_v62  ;;  %2813 = vmatmul.mubr.f32.gmra.mrb[156].mxu0 %v7668_v62  ;;  %v7684_v34 = vmax.f32 %v1180_v28, 0.0  ;;  %9177 = vst [vmem:[#allocation106_spill] sm:$0xff] %v7686_v5  ;;  %v1582_v62 = vld [vmem:[#allocation11 + $0x68] sm:$0xff]  ;;  %v1595_v28 = vld [vmem:[#allocation11 + $0xd0] sm:$0xff]  ;;  %v5083_v19 = vpack.c.bf16 %v1580_v59, %v1573_v6  ;;  %v1257_v40 = vadd.f32 %v7235_v31, %v7666_v49  ;;  %v1589_v12 = vld [vmem:[#allocation11 + $0xa0] sm:$0xff] }
 0x325   : > { %v7680_v33 = vmax.f32 %v1182_v18, 0.0  ;;  %v7696_v18 = vmax.f32 %v1251_v56, 0.0  ;;  %v5210_v52 = vpack.c.bf16 %v1582_v62, %v1575_v54  ;;  %v7700_v16 = vmax.f32 %v1259_v51, 0.0  ;;  %v1602_v56 = vld [vmem:[#allocation11 + $0x108] sm:$0xff]  ;;  %v1609_v6 = vld [vmem:[#allocation11 + $0x140] sm:$0xff] }
 0x326   : > { %9176 = vst [vmem:[#allocation105_spill] sm:$0xff] %v7684_v34  ;;  %v7707_v31 = vmax.f32 %v1257_v40, 0.0  ;;  %v1263_v62 = vadd.f32 %v7249_v36, %v7666_v49  ;;  %v5213_v59 = vpack.c.bf16 %v1596_v45, %v1589_v12  ;;  %v1601_v51 = vld [vmem:[#allocation11 + $0x100] sm:$0xff]  ;;  %v7712_v54 = vmax.f32 %v1265_v27, 0.0  ;;  %v1608_v40 = vld [vmem:[#allocation11 + $0x138] sm:$0xff] }
 0x327   : > { %9175 = vst [vmem:[#allocation104_spill] sm:$0xff] %v7680_v33  ;;  %2304 = vmatprep.mubr.f32.mxu1 %v7680_v33  ;;  %2818 = vmatprep.mubr.f32.mxu0 %v7680_v33  ;;  %9178 = vst [vmem:[#allocation107_spill] sm:$0xff] %v7696_v18  ;;  %v1587_v33 = vld [vmem:[#allocation11 + $0x90] sm:$0xff]  ;;  %v1616_v36 = vld [vmem:[#allocation11 + $0x178] sm:$0xff]  ;;  %v5091_v12 = vpack.c.bf16 %v1608_v40, %v1601_v51 }
 0x328   : > { %2305 = vmatmul.mubr.f32.gmra.mrb[158].mxu1 %v7684_v34  ;;  %2819 = vmatmul.mubr.f32.gmra.mrb[158].mxu0 %v7684_v34  ;;  %v5085_v34 = vpack.c.bf16 %v1595_v28, %v1588_v57  ;;  %v5087_v37 = vpack.c.bf16 %v1594_v22, %v1587_v33  ;;  %9179 = vst [vmem:[#allocation108_spill] sm:$0xff] %v7712_v54  ;;  %v9180_v28 = vmov 0.0|0.0   ;;  %v1623_v22 = vld [vmem:[#allocation11 + $0x1b0] sm:$0xff]  ;;  %v7721_v27 = vmax.f32 %v1263_v62, 0.0  ;;  %v1617_v62 = vld [vmem:[#allocation11 + $0x180] sm:$0xff] }
 0x329   : > { %2375 = vmatprep.mubr.f32.mxu1 %v7686_v5  ;;  %2889 = vmatprep.mubr.f32.mxu0 %v7686_v5  ;;  %v1271_v57 = vadd.f32 %v7268_v7, %v7653_v11  ;;  %v1610_v5 = vld [vmem:[#allocation11 + $0x148] sm:$0xff]  ;;  %v1269_v7 = vadd.f32 %v7263_v1, %v7666_v49  ;;  %v1629_v51 = vld [vmem:[#allocation11 + $0x1e0] sm:$0xff] }
 0x32a   : > { %v1630_v1 = vld [vmem:[#allocation11 + $0x1e8] sm:$0xff] }
 0x32b   : > { %v7725_v33 = vmax.f32 %v1271_v57, 0.0 }
 0x32c   : > { %2376 = vmatmul.mubr.f32.vlgmr.msra.gmra.mrb[96].mxu1 %v7696_v18  ;;  %2890 = vmatmul.mubr.f32.vlgmr.msra.gmra.mrb[96].mxu0 %v7696_v18  ;;  %v1603_v18 = vld [vmem:[#allocation11 + $0x110] sm:$0xff] }
 0x32d   : > { %5084 = vmatpush1.bf16.msra.mxu1 %v5083_v19  ;;  %2381 = vmatprep.mubr.f32.mxu1 %v7700_v16  ;;  %v5089_v19 = vpack.c.bf16 %v1609_v6, %v1602_v56  ;;  %v5216_v45 = vpack.c.bf16 %v1610_v5, %v1603_v18  ;;  %v5093_v56 = vpack.c.bf16 %v1623_v22, %v1616_v36  ;;  %v1622_v6 = vld [vmem:[#allocation11 + $0x1a8] sm:$0xff]  ;;  %v7734_v5 = vmax.f32 %v1269_v7, 0.0  ;;  %v1636_v36 = vld [vmem:[#allocation11 + $0x218] sm:$0xff]  ;;  %v1631_v22 = vld [vmem:[#allocation11 + $0x1f0] sm:$0xff] }
 0x32e   : > { %2895 = vmatprep.mubr.f32.mxu0 %v7700_v16  ;;  %5211 = vmatpush1.bf16.msra.mxu0 %v5210_v52  ;;  %v1615_v52 = vld [vmem:[#allocation11 + $0x170] sm:$0xff]  ;;  %v1638_v7 = vld [vmem:[#allocation11 + $0x228] sm:$0xff] }
 0x32f   : > { %5086 = vmatprep.subr.bf16.mxu1 %v5085_v34  ;;  %5212 = vmatprep.subr.bf16.mxu0 %v9180_v28  ;;  %v1277_v34 = vadd.f32 %v7282_v47, %v7653_v11  ;;  %v1275_v47 = vadd.f32 %v7277_v46, %v7666_v49  ;;  %v5095_v18 = vpack.c.bf16 %v1622_v6, %v1615_v52  ;;  %v1644_v46 = vld [vmem:[#allocation11 + $0x258] sm:$0xff] }
 0x330   : > { %2382 = vmatmul.mubr.f32.gmra.mrb[98].mxu1 %v7707_v31  ;;  %2896 = vmatmul.mubr.f32.gmra.mrb[98].mxu0 %v7707_v31  ;;  %v5222_v52 = vpack.c.bf16 %v1638_v7, %v1631_v22  ;;  %v1289_v6 = vadd.f32 %v7310_v15, %v7653_v11  ;;  %v1287_v15 = vadd.f32 %v7305_v17, %v7666_v49  ;;  %v1672_v17 = vld [vmem:[#allocation11 + $0x338] sm:$0xff] }
 0x331   : > { %2387 = vmatprep.mubr.f32.mxu1 %v7712_v54  ;;  %2901 = vmatprep.mubr.f32.mxu0 %v7712_v54  ;;  %v1624_v54 = vld [vmem:[#allocation11 + $0x1b8] sm:$0xff]  ;;  %v7738_v57 = vmax.f32 %v1277_v34, 0.0  ;;  %v1643_v34 = vld [vmem:[#allocation11 + $0x250] sm:$0xff]  ;;  %v1295_v22 = vadd.f32 %v7324_v61, %v7653_v11  ;;  %v1293_v61 = vadd.f32 %v7319_v42, %v7666_v49  ;;  %v1686_v42 = vld [vmem:[#allocation11 + $0x3a8] sm:$0xff] }
 0x332   : > { %5088 = vmatpush1.bf16.msra.mxu1 %v5087_v37  ;;  %5214 = vmatpush1.bf16.msra.mxu0 %v5213_v59  ;;  %v1637_v37 = vld [vmem:[#allocation11 + $0x220] sm:$0xff]  ;;  %v5219_v59 = vpack.c.bf16 %v1624_v54, %v1617_v62  ;;  %v7747_v54 = vmax.f32 %v1275_v47, 0.0  ;;  %v1652_v47 = vld [vmem:[#allocation11 + $0x298] sm:$0xff] }
 0x333   : > { %5090 = vmatprep.subr.bf16.mxu1 %v5089_v19  ;;  %5215 = vmatprep.subr.bf16.mxu0 %v9180_v28  ;;  %v1283_v19 = vadd.f32 %v7296_v10, %v7653_v11  ;;  %v5097_v40 = vpack.c.bf16 %v1637_v37, %v1630_v1  ;;  %v1281_v10 = vadd.f32 %v7291_v55, %v7666_v49  ;;  %v1650_v1 = vld [vmem:[#allocation11 + $0x288] sm:$0xff]  ;;  %v1645_v37 = vld [vmem:[#allocation11 + $0x260] sm:$0xff] }
 0x334   : > { %2388 = vmatmul.mubr.f32.gmra.mrb[100].mxu1 %v7721_v27  ;;  %2902 = vmatmul.mubr.f32.gmra.mrb[100].mxu0 %v7721_v27  ;;  %v1658_v55 = vld [vmem:[#allocation11 + $0x2c8] sm:$0xff] }
 0x335   : > { %2393 = vmatprep.mubr.f32.mxu1 %v7725_v33  ;;  %2907 = vmatprep.mubr.f32.mxu0 %v7725_v33 }
 0x336   : > { %5092 = vmatpush1.bf16.msra.mxu1 %v5091_v12  ;;  %5217 = vmatpush1.bf16.msra.mxu0 %v5216_v45  ;;  %v1651_v12 = vld [vmem:[#allocation11 + $0x290] sm:$0xff]  ;;  %v5099_v45 = vpack.c.bf16 %v1636_v36, %v1629_v51  ;;  %v5103_v51 = vpack.c.bf16 %v1650_v1, %v1643_v34  ;;  %v7764_v36 = vmax.f32 %v1289_v6, 0.0  ;;  %v7777_v1 = vmax.f32 %v1295_v22, 0.0 }
 0x337   : > { %5094 = vmatprep.subr.bf16.mxu1 %v5093_v56  ;;  %5218 = vmatprep.subr.bf16.mxu0 %v9180_v28  ;;  %v7751_v56 = vmax.f32 %v1283_v19, 0.0  ;;  %v5101_v62 = vpack.c.bf16 %v1651_v12, %v1644_v46  ;;  %v5225_v19 = vpack.c.bf16 %v1652_v47, %v1645_v37  ;;  %v1664_v46 = vld [vmem:[#allocation11 + $0x2f8] sm:$0xff]  ;;  %v1659_v12 = vld [vmem:[#allocation11 + $0x2d0] sm:$0xff]  ;;  %v1301_v37 = vadd.f32 %v7338_v44, %v7653_v11 }
 0x338   : > { %2394 = vmatmul.mubr.f32.gmra.mrb[102].mxu1 %v7734_v5  ;;  %2908 = vmatmul.mubr.f32.gmra.mrb[102].mxu0 %v7734_v5  ;;  %v1299_v44 = vadd.f32 %v7333_v60, %v7666_v49  ;;  %v1700_v60 = vld [vmem:[#allocation11 + $0x418] sm:$0xff] }
 0x339   : > { %2399 = vmatprep.mubr.f32.mxu1 %v7738_v57  ;;  %2913 = vmatprep.mubr.f32.mxu0 %v7738_v57 }
 0x33a   : > { %5096 = vmatpush1.bf16.msra.mxu1 %v5095_v18  ;;  %5220 = vmatpush1.bf16.msra.mxu0 %v5219_v59  ;;  %v1665_v18 = vld [vmem:[#allocation11 + $0x300] sm:$0xff]  ;;  %v7760_v59 = vmax.f32 %v1281_v10, 0.0  ;;  %v1666_v10 = vld [vmem:[#allocation11 + $0x308] sm:$0xff] }
 0x33b   : > { %5098 = vmatprep.subr.bf16.mxu1 %v5097_v40  ;;  %5221 = vmatprep.subr.bf16.mxu0 %v9180_v28  ;;  %v1657_v40 = vld [vmem:[#allocation11 + $0x2c0] sm:$0xff]  ;;  %v5105_v7 = vpack.c.bf16 %v1665_v18, %v1658_v55  ;;  %v5228_v6 = vpack.c.bf16 %v1666_v10, %v1659_v12  ;;  %v1678_v55 = vld [vmem:[#allocation11 + $0x368] sm:$0xff]  ;;  %v1307_v12 = vadd.f32 %v7352_v38, %v7653_v11 }
 0x33c   : > { %2400 = vmatmul.mubr.f32.gmra.mrb[104].mxu1 %v7747_v54  ;;  %2914 = vmatmul.mubr.f32.gmra.mrb[104].mxu0 %v7747_v54  ;;  %v5107_v34 = vpack.c.bf16 %v1664_v46, %v1657_v40  ;;  %v1673_v18 = vld [vmem:[#allocation11 + $0x340] sm:$0xff]  ;;  %v7790_v46 = vmax.f32 %v1301_v37, 0.0  ;;  %v1305_v38 = vadd.f32 %v7347_v3, %v7666_v49  ;;  %v1714_v3 = vld [vmem:[#allocation11 + $0x488] sm:$0xff] }
 0x33d   : > { %2405 = vmatprep.mubr.f32.mxu1 %v7751_v56  ;;  %2919 = vmatprep.mubr.f32.mxu0 %v7751_v56 }
 0x33e   : > { %5100 = vmatpush1.bf16.msra.mxu1 %v5099_v45  ;;  %5223 = vmatpush1.bf16.msra.mxu0 %v5222_v52  ;;  %v1679_v45 = vld [vmem:[#allocation11 + $0x370] sm:$0xff]  ;;  %v7773_v52 = vmax.f32 %v1287_v15, 0.0  ;;  %v1680_v15 = vld [vmem:[#allocation11 + $0x378] sm:$0xff] }
 0x33f   : > { %5102 = vmatprep.subr.bf16.mxu1 %v5101_v62  ;;  %5224 = vmatprep.subr.bf16.mxu0 %v9180_v28  ;;  %v1671_v62 = vld [vmem:[#allocation11 + $0x330] sm:$0xff]  ;;  %v5109_v47 = vpack.c.bf16 %v1679_v45, %v1672_v17  ;;  %v5231_v22 = vpack.c.bf16 %v1680_v15, %v1673_v18  ;;  %v1692_v17 = vld [vmem:[#allocation11 + $0x3d8] sm:$0xff]  ;;  %v1313_v18 = vadd.f32 %v7366_v4, %v7653_v11 }
 0x340   : > { %2406 = vmatmul.mubr.f32.gmra.mrb[106].mxu1 %v7760_v59  ;;  %2920 = vmatmul.mubr.f32.gmra.mrb[106].mxu0 %v7760_v59  ;;  %v5111_v40 = vpack.c.bf16 %v1678_v55, %v1671_v62  ;;  %v1687_v45 = vld [vmem:[#allocation11 + $0x3b0] sm:$0xff]  ;;  %v7803_v55 = vmax.f32 %v1307_v12, 0.0  ;;  %v1311_v4 = vadd.f32 %v7361_v53, %v7666_v49  ;;  %v1728_v53 = vld [vmem:[#allocation11 + $0x4f8] sm:$0xff] }
 0x341   : > { %2411 = vmatprep.mubr.f32.mxu1 %v7764_v36  ;;  %2925 = vmatprep.mubr.f32.mxu0 %v7764_v36 }
 0x342   : > { %5104 = vmatpush1.bf16.msra.mxu1 %v5103_v51  ;;  %5226 = vmatpush1.bf16.msra.mxu0 %v5225_v19  ;;  %v1693_v51 = vld [vmem:[#allocation11 + $0x3e0] sm:$0xff]  ;;  %v7786_v19 = vmax.f32 %v1293_v61, 0.0  ;;  %v1694_v61 = vld [vmem:[#allocation11 + $0x3e8] sm:$0xff] }
 0x343   : > { %5106 = vmatprep.subr.bf16.mxu1 %v5105_v7  ;;  %5227 = vmatprep.subr.bf16.mxu0 %v9180_v28  ;;  %v1685_v7 = vld [vmem:[#allocation11 + $0x3a0] sm:$0xff]  ;;  %v5113_v10 = vpack.c.bf16 %v1693_v51, %v1686_v42  ;;  %v5234_v37 = vpack.c.bf16 %v1694_v61, %v1687_v45  ;;  %v1706_v42 = vld [vmem:[#allocation11 + $0x448] sm:$0xff]  ;;  %v1319_v45 = vadd.f32 %v7380_v2, %v7653_v11 }
 0x344   : > { %2412 = vmatmul.mubr.f32.gmra.mrb[108].mxu1 %v7773_v52  ;;  %2926 = vmatmul.mubr.f32.gmra.mrb[108].mxu0 %v7773_v52  ;;  %v5115_v62 = vpack.c.bf16 %v1692_v17, %v1685_v7  ;;  %v1701_v51 = vld [vmem:[#allocation11 + $0x420] sm:$0xff]  ;;  %v7816_v17 = vmax.f32 %v1313_v18, 0.0  ;;  %v1317_v2 = vadd.f32 %v7375_v23, %v7666_v49  ;;  %v1742_v23 = vld [vmem:[#allocation11 + $0x568] sm:$0xff] }
 0x345   : > { %2417 = vmatprep.mubr.f32.mxu1 %v7777_v1  ;;  %2931 = vmatprep.mubr.f32.mxu0 %v7777_v1 }
 0x346   : > { %5108 = vmatpush1.bf16.msra.mxu1 %v5107_v34  ;;  %5229 = vmatpush1.bf16.msra.mxu0 %v5228_v6  ;;  %v1707_v34 = vld [vmem:[#allocation11 + $0x450] sm:$0xff]  ;;  %v7799_v6 = vmax.f32 %v1299_v44, 0.0  ;;  %v1708_v44 = vld [vmem:[#allocation11 + $0x458] sm:$0xff] }
 0x347   : > { %5110 = vmatprep.subr.bf16.mxu1 %v5109_v47  ;;  %5230 = vmatprep.subr.bf16.mxu0 %v9180_v28  ;;  %v1699_v47 = vld [vmem:[#allocation11 + $0x410] sm:$0xff]  ;;  %v5117_v15 = vpack.c.bf16 %v1707_v34, %v1700_v60  ;;  %v5237_v12 = vpack.c.bf16 %v1708_v44, %v1701_v51  ;;  %v1720_v60 = vld [vmem:[#allocation11 + $0x4b8] sm:$0xff]  ;;  %v1325_v51 = vadd.f32 %v7394_v39, %v7653_v11 }
 0x348   : > { %2418 = vmatmul.mubr.f32.gmra.mrb[110].mxu1 %v7786_v19  ;;  %2932 = vmatmul.mubr.f32.gmra.mrb[110].mxu0 %v7786_v19  ;;  %v5119_v7 = vpack.c.bf16 %v1706_v42, %v1699_v47  ;;  %v1715_v34 = vld [vmem:[#allocation11 + $0x490] sm:$0xff]  ;;  %v7829_v42 = vmax.f32 %v1319_v45, 0.0  ;;  %v1323_v39 = vadd.f32 %v7389_v14, %v7666_v49  ;;  %v1756_v14 = vld [vmem:[#allocation11 + $0x5d8] sm:$0xff] }
 0x349   : > { %2423 = vmatprep.mubr.f32.mxu1 %v7790_v46  ;;  %2937 = vmatprep.mubr.f32.mxu0 %v7790_v46 }
 0x34a   : > { %5112 = vmatpush1.bf16.msra.mxu1 %v5111_v40  ;;  %5232 = vmatpush1.bf16.msra.mxu0 %v5231_v22  ;;  %v1721_v40 = vld [vmem:[#allocation11 + $0x4c0] sm:$0xff]  ;;  %v7812_v22 = vmax.f32 %v1305_v38, 0.0  ;;  %v1722_v38 = vld [vmem:[#allocation11 + $0x4c8] sm:$0xff] }
 0x34b   : > { %5114 = vmatprep.subr.bf16.mxu1 %v5113_v10  ;;  %5233 = vmatprep.subr.bf16.mxu0 %v9180_v28  ;;  %v1713_v10 = vld [vmem:[#allocation11 + $0x480] sm:$0xff]  ;;  %v5121_v61 = vpack.c.bf16 %v1721_v40, %v1714_v3  ;;  %v5240_v18 = vpack.c.bf16 %v1722_v38, %v1715_v34  ;;  %v1734_v3 = vld [vmem:[#allocation11 + $0x528] sm:$0xff]  ;;  %v1331_v34 = vadd.f32 %v7408_v30, %v7653_v11 }
 0x34c   : > { %2424 = vmatmul.mubr.f32.gmra.mrb[112].mxu1 %v7799_v6  ;;  %2938 = vmatmul.mubr.f32.gmra.mrb[112].mxu0 %v7799_v6  ;;  %v5123_v47 = vpack.c.bf16 %v1720_v60, %v1713_v10  ;;  %v1729_v40 = vld [vmem:[#allocation11 + $0x500] sm:$0xff]  ;;  %v7842_v60 = vmax.f32 %v1325_v51, 0.0  ;;  %v1329_v30 = vadd.f32 %v7403_v24, %v7666_v49  ;;  %v1770_v24 = vld [vmem:[#allocation11 + $0x648] sm:$0xff] }
 0x34d   : > { %2429 = vmatprep.mubr.f32.mxu1 %v7803_v55  ;;  %2943 = vmatprep.mubr.f32.mxu0 %v7803_v55 }
 0x34e   : > { %5116 = vmatpush1.bf16.msra.mxu1 %v5115_v62  ;;  %5235 = vmatpush1.bf16.msra.mxu0 %v5234_v37  ;;  %v1735_v62 = vld [vmem:[#allocation11 + $0x530] sm:$0xff]  ;;  %v7825_v37 = vmax.f32 %v1311_v4, 0.0  ;;  %v1736_v4 = vld [vmem:[#allocation11 + $0x538] sm:$0xff] }
 0x34f   : > { %5118 = vmatprep.subr.bf16.mxu1 %v5117_v15  ;;  %5236 = vmatprep.subr.bf16.mxu0 %v9180_v28  ;;  %v1727_v15 = vld [vmem:[#allocation11 + $0x4f0] sm:$0xff]  ;;  %v5125_v44 = vpack.c.bf16 %v1735_v62, %v1728_v53  ;;  %v5243_v45 = vpack.c.bf16 %v1736_v4, %v1729_v40  ;;  %v1748_v53 = vld [vmem:[#allocation11 + $0x598] sm:$0xff]  ;;  %v1337_v40 = vadd.f32 %v7422_v63, %v7653_v11 }
 0x350   : > { %2430 = vmatmul.mubr.f32.gmra.mrb[114].mxu1 %v7812_v22  ;;  %2944 = vmatmul.mubr.f32.gmra.mrb[114].mxu0 %v7812_v22  ;;  %v5127_v10 = vpack.c.bf16 %v1734_v3, %v1727_v15  ;;  %v1743_v62 = vld [vmem:[#allocation11 + $0x570] sm:$0xff]  ;;  %v7855_v3 = vmax.f32 %v1331_v34, 0.0  ;;  %v1335_v63 = vadd.f32 %v7417_v20, %v7666_v49  ;;  %v1784_v20 = vld [vmem:[#allocation11 + $0x6b8] sm:$0xff] }
 0x351   : > { %2435 = vmatprep.mubr.f32.mxu1 %v7816_v17  ;;  %2949 = vmatprep.mubr.f32.mxu0 %v7816_v17 }
 0x352   : > { %5120 = vmatpush1.bf16.msra.mxu1 %v5119_v7  ;;  %5238 = vmatpush1.bf16.msra.mxu0 %v5237_v12  ;;  %v1749_v7 = vld [vmem:[#allocation11 + $0x5a0] sm:$0xff]  ;;  %v7838_v12 = vmax.f32 %v1317_v2, 0.0  ;;  %v1750_v2 = vld [vmem:[#allocation11 + $0x5a8] sm:$0xff] }
 0x353   : > { %5122 = vmatprep.subr.bf16.mxu1 %v5121_v61  ;;  %5239 = vmatprep.subr.bf16.mxu0 %v9180_v28  ;;  %v1741_v61 = vld [vmem:[#allocation11 + $0x560] sm:$0xff]  ;;  %v5129_v38 = vpack.c.bf16 %v1749_v7, %v1742_v23  ;;  %v5246_v51 = vpack.c.bf16 %v1750_v2, %v1743_v62  ;;  %v1762_v23 = vld [vmem:[#allocation11 + $0x608] sm:$0xff]  ;;  %v1343_v62 = vadd.f32 %v7436_v26, %v7653_v11 }
 0x354   : > { %2436 = vmatmul.mubr.f32.gmra.mrb[116].mxu1 %v7825_v37  ;;  %2950 = vmatmul.mubr.f32.gmra.mrb[116].mxu0 %v7825_v37  ;;  %v5131_v15 = vpack.c.bf16 %v1748_v53, %v1741_v61  ;;  %v1757_v7 = vld [vmem:[#allocation11 + $0x5e0] sm:$0xff]  ;;  %v7868_v53 = vmax.f32 %v1337_v40, 0.0  ;;  %v1341_v26 = vadd.f32 %v7431_v8, %v7666_v49  ;;  %v1798_v8 = vld [vmem:[#allocation11 + $0x728] sm:$0xff] }
 0x355   : > { %2441 = vmatprep.mubr.f32.mxu1 %v7829_v42  ;;  %2955 = vmatprep.mubr.f32.mxu0 %v7829_v42 }
 0x356   : > { %5124 = vmatpush1.bf16.msra.mxu1 %v5123_v47  ;;  %5241 = vmatpush1.bf16.msra.mxu0 %v5240_v18  ;;  %v1763_v47 = vld [vmem:[#allocation11 + $0x610] sm:$0xff]  ;;  %v7851_v18 = vmax.f32 %v1323_v39, 0.0  ;;  %v1764_v39 = vld [vmem:[#allocation11 + $0x618] sm:$0xff] }
 0x357   : > { %5126 = vmatprep.subr.bf16.mxu1 %v5125_v44  ;;  %5242 = vmatprep.subr.bf16.mxu0 %v9180_v28  ;;  %v1755_v44 = vld [vmem:[#allocation11 + $0x5d0] sm:$0xff]  ;;  %v5133_v4 = vpack.c.bf16 %v1763_v47, %v1756_v14  ;;  %v5249_v34 = vpack.c.bf16 %v1764_v39, %v1757_v7  ;;  %v1776_v14 = vld [vmem:[#allocation11 + $0x678] sm:$0xff]  ;;  %v1349_v7 = vadd.f32 %v7450_v58, %v7653_v11 }
 0x358   : > { %2442 = vmatmul.mubr.f32.gmra.mrb[118].mxu1 %v7838_v12  ;;  %2956 = vmatmul.mubr.f32.gmra.mrb[118].mxu0 %v7838_v12  ;;  %v5135_v61 = vpack.c.bf16 %v1762_v23, %v1755_v44  ;;  %v1771_v47 = vld [vmem:[#allocation11 + $0x650] sm:$0xff]  ;;  %v7881_v23 = vmax.f32 %v1343_v62, 0.0  ;;  %v1347_v58 = vadd.f32 %v7445_v0, %v7666_v49 }
 0x359   : > { %2447 = vmatprep.mubr.f32.mxu1 %v7842_v60  ;;  %2961 = vmatprep.mubr.f32.mxu0 %v7842_v60 }
 0x35a   : > { %5128 = vmatpush1.bf16.msra.mxu1 %v5127_v10  ;;  %5244 = vmatpush1.bf16.msra.mxu0 %v5243_v45  ;;  %v1777_v10 = vld [vmem:[#allocation11 + $0x680] sm:$0xff]  ;;  %v7864_v45 = vmax.f32 %v1329_v30, 0.0  ;;  %v1778_v30 = vld [vmem:[#allocation11 + $0x688] sm:$0xff]  ;;  %v7903_v0 = vmax.f32 %v1347_v58, 0.0 }
 0x35b   : > { %5130 = vmatprep.subr.bf16.mxu1 %v5129_v38  ;;  %5245 = vmatprep.subr.bf16.mxu0 %v9180_v28  ;;  %v1769_v38 = vld [vmem:[#allocation11 + $0x640] sm:$0xff]  ;;  %v5137_v2 = vpack.c.bf16 %v1777_v10, %v1770_v24  ;;  %v5252_v40 = vpack.c.bf16 %v1778_v30, %v1771_v47  ;;  %v1790_v24 = vld [vmem:[#allocation11 + $0x6e8] sm:$0xff]  ;;  %v1353_v30 = vadd.f32 %v7459_v35, %v7666_v49 }
 0x35c   : > { %2448 = vmatmul.mubr.f32.gmra.mrb[120].mxu1 %v7851_v18  ;;  %2962 = vmatmul.mubr.f32.gmra.mrb[120].mxu0 %v7851_v18  ;;  %v5139_v44 = vpack.c.bf16 %v1776_v14, %v1769_v38  ;;  %v1785_v10 = vld [vmem:[#allocation11 + $0x6c0] sm:$0xff]  ;;  %v1355_v14 = vadd.f32 %v7464_v41, %v7653_v11  ;;  %v1359_v35 = vadd.f32 %v7474_v29, %v7666_v49 }
 0x35d   : > { %2453 = vmatprep.mubr.f32.mxu1 %v7855_v3  ;;  %2967 = vmatprep.mubr.f32.mxu0 %v7855_v3  ;;  %v1373_v29 = vadd.f32 %v7507_v50, %v7653_v11 }
 0x35e   : > { %5132 = vmatpush1.bf16.msra.mxu1 %v5131_v15  ;;  %5247 = vmatpush1.bf16.msra.mxu0 %v5246_v51  ;;  %v1791_v15 = vld [vmem:[#allocation11 + $0x6f0] sm:$0xff]  ;;  %v7877_v51 = vmax.f32 %v1335_v63, 0.0  ;;  %v1792_v63 = vld [vmem:[#allocation11 + $0x6f8] sm:$0xff]  ;;  %v7907_v41 = vmax.f32 %v1355_v14, 0.0 }
 0x35f   : > { %5134 = vmatprep.subr.bf16.mxu1 %v5133_v4  ;;  %5248 = vmatprep.subr.bf16.mxu0 %v9180_v28  ;;  %v1783_v4 = vld [vmem:[#allocation11 + $0x6b0] sm:$0xff]  ;;  %v5141_v39 = vpack.c.bf16 %v1791_v15, %v1784_v20  ;;  %v5255_v62 = vpack.c.bf16 %v1792_v63, %v1785_v10  ;;  %v1361_v20 = vadd.f32 %v7479_v25, %v7653_v11  ;;  %v7916_v15 = vmax.f32 %v1353_v30, 0.0  ;;  %v9181_v63 = vld [vmem:[#allocation66_spill] sm:$0xff] }
 0x360   : > { %2454 = vmatmul.mubr.f32.gmra.mrb[122].mxu1 %v7864_v45  ;;  %2968 = vmatmul.mubr.f32.gmra.mrb[122].mxu0 %v7864_v45  ;;  %v5143_v38 = vpack.c.bf16 %v1790_v24, %v1783_v4  ;;  %v1367_v25 = vadd.f32 %v7493_v13, %v7653_v11  ;;  %v1377_v24 = vadd.f32 %v7516_v9, %v7666_v49  ;;  %v9182_v9 = vld [vmem:[#allocation71_spill] sm:$0xff] }
 0x361   : > { %2459 = vmatprep.mubr.f32.mxu1 %v7868_v53  ;;  %2973 = vmatprep.mubr.f32.mxu0 %v7868_v53  ;;  %v1391_v58 = vadd.f32 %v9182_v9, %v7653_v11 }
 0x362   : > { %5136 = vmatpush1.bf16.msra.mxu1 %v5135_v61  ;;  %5250 = vmatpush1.bf16.msra.mxu0 %v5249_v34  ;;  %v1805_v61 = vld [vmem:[#allocation11 + $0x760] sm:$0xff]  ;;  %v7890_v34 = vmax.f32 %v1341_v26, 0.0  ;;  %v7920_v26 = vmax.f32 %v1361_v20, 0.0  ;;  %v7932_v4 = vmax.f32 %v1367_v25, 0.0 }
 0x363   : > { %5138 = vmatprep.subr.bf16.mxu1 %v5137_v2  ;;  %5251 = vmatprep.subr.bf16.mxu0 %v9180_v28  ;;  %v7894_v2 = vmax.f32 %v1349_v7, 0.0  ;;  %v5145_v47 = vpack.c.bf16 %v1805_v61, %v1798_v8  ;;  %v1371_v7 = vadd.f32 %v7502_v43, %v7666_v49  ;;  %v1385_v43 = vadd.f32 %v7535_v21, %v7653_v11 }
 0x364   : > { %2460 = vmatmul.mubr.f32.gmra.mrb[124].mxu1 %v7877_v51  ;;  %2974 = vmatmul.mubr.f32.gmra.mrb[124].mxu0 %v7877_v51  ;;  %v1383_v8 = vadd.f32 %v9181_v63, %v7666_v49  ;;  %v7980_v14 = vmax.f32 %v1391_v58, 0.0 }
 0x365   : > { %2465 = vmatprep.mubr.f32.mxu1 %v7881_v23  ;;  %2979 = vmatprep.mubr.f32.mxu0 %v7881_v23  ;;  %v7952_v50 = vmax.f32 %v1371_v7, 0.0  ;;  %v7968_v61 = vmax.f32 %v1385_v43, 0.0 }
 0x366   : > { %5140 = vmatpush1.bf16.msra.mxu1 %v5139_v44  ;;  %5253 = vmatpush1.bf16.msra.mxu0 %v5252_v40  ;;  %v7928_v44 = vmax.f32 %v1359_v35, 0.0  ;;  %v1365_v40 = vadd.f32 %v7488_v32, %v7666_v49  ;;  %v1379_v32 = vadd.f32 %v7521_v48, %v7653_v11  ;;  %v7964_v48 = vmax.f32 %v1377_v24, 0.0  ;;  %9185 = vst [vmem:[#allocation71_spill] sm:$0xff] %v7980_v14  ;;  %v9188_v35 = vld [vmem:[#allocation73_spill] sm:$0xff] }
 0x367   : > { %5142 = vmatprep.subr.bf16.mxu1 %v5141_v39  ;;  %5254 = vmatprep.subr.bf16.mxu0 %v9180_v28  ;;  %v7944_v39 = vmax.f32 %v1373_v29, 0.0  ;;  %v7976_v21 = vmax.f32 %v1383_v8, 0.0  ;;  %v1395_v25 = vadd.f32 %v9188_v35, %v7666_v49  ;;  %v9190_v29 = vld [vmem:[#allocation79_spill] sm:$0xff]  ;;  %v9192_v24 = vld [vmem:[#allocation77_spill] sm:$0xff] }
 0x368   : > { %2466 = vmatmul.mubr.f32.gmra.mrb[126].mxu1 %v7890_v34  ;;  %2980 = vmatmul.mubr.f32.gmra.mrb[126].mxu0 %v7890_v34  ;;  %v7940_v13 = vmax.f32 %v1365_v40, 0.0  ;;  %v7956_v10 = vmax.f32 %v1379_v32, 0.0  ;;  %v1403_v7 = vadd.f32 %v9190_v29, %v7653_v11  ;;  %v1401_v43 = vadd.f32 %v9192_v24, %v7666_v49  ;;  %v9194_v8 = vld [vmem:[#allocation83_spill] sm:$0xff]  ;;  %v9200_v29 = vld [vmem:[#allocation85_spill] sm:$0xff] }
 0x369   : > { %2471 = vmatprep.mubr.f32.mxu1 %v7894_v2  ;;  %2985 = vmatprep.mubr.f32.mxu0 %v7894_v2  ;;  %9183 = vst [vmem:[#allocation66_spill] sm:$0xff] %v7976_v21  ;;  %v8000_v32 = vmax.f32 %v1395_v25, 0.0  ;;  %v1409_v9 = vadd.f32 %v9194_v8, %v7653_v11 }
 0x36a   : > { %5144 = vmatpush1.bf16.msra.mxu1 %v5143_v38  ;;  %5256 = vmatpush1.bf16.msra.mxu0 %v5255_v62  ;;  %v9184_v38 = vld [vmem:[#allocation69_spill] sm:$0xff]  ;;  %v8004_v63 = vmax.f32 %v1403_v7, 0.0  ;;  %v8012_v58 = vmax.f32 %v1401_v43, 0.0  ;;  %v1413_v7 = vadd.f32 %v9200_v29, %v7666_v49  ;;  %v9202_v43 = vld [vmem:[#allocation91_spill] sm:$0xff] }
 0x36b   : > { %5146 = vmatprep.subr.bf16.mxu1 %v5145_v47  ;;  %5257 = vmatprep.subr.bf16.mxu0 %v9180_v28  ;;  %v1389_v62 = vadd.f32 %v9184_v38, %v7666_v49  ;;  %v9186_v47 = vld [vmem:[#allocation75_spill] sm:$0xff]  ;;  %9191 = vst [vmem:[#allocation73_spill] sm:$0xff] %v8000_v32  ;;  %v9196_v38 = vld [vmem:[#allocation81_spill] sm:$0xff]  ;;  %v1421_v8 = vadd.f32 %v9202_v43, %v7653_v11 }
 0x36c   : > { %2472 = vmatmul.mubr.f32.gmra.mrb[128].mxu1 %v7903_v0  ;;  %2986 = vmatmul.mubr.f32.gmra.mrb[128].mxu0 %v7903_v0  ;;  %v1397_v30 = vadd.f32 %v9186_v47, %v7653_v11  ;;  %9193 = vst [vmem:[#allocation79_spill] sm:$0xff] %v8004_v63  ;;  %9195 = vst [vmem:[#allocation77_spill] sm:$0xff] %v8012_v58  ;;  %v8016_v47 = vmax.f32 %v1409_v9, 0.0  ;;  %v8036_v9 = vmax.f32 %v1413_v7, 0.0  ;;  %v9208_v7 = vld [vmem:[#allocation93_spill] sm:$0xff] }
 0x36d   : > { %2477 = vmatprep.mubr.f32.mxu1 %v7907_v41  ;;  %2991 = vmatprep.mubr.f32.mxu0 %v7907_v41  ;;  %v7988_v20 = vmax.f32 %v1389_v62, 0.0  ;;  %v1407_v62 = vadd.f32 %v9196_v38, %v7666_v49  ;;  %v9204_v38 = vld [vmem:[#allocation89_spill] sm:$0xff] }
 0x36e   : > { %v7992_v40 = vmax.f32 %v1397_v30, 0.0  ;;  %9197 = vst [vmem:[#allocation83_spill] sm:$0xff] %v8016_v47  ;;  %v9198_v30 = vld [vmem:[#allocation87_spill] sm:$0xff]  ;;  %9203 = vst [vmem:[#allocation85_spill] sm:$0xff] %v8036_v9 }
 0x36f   : > { %9187 = vst [vmem:[#allocation69_spill] sm:$0xff] %v7988_v20  ;;  %v1415_v35 = vadd.f32 %v9198_v30, %v7653_v11  ;;  %v8024_v25 = vmax.f32 %v1407_v62, 0.0  ;;  %v1419_v62 = vadd.f32 %v9204_v38, %v7666_v49  ;;  %v8040_v30 = vmax.f32 %v1421_v8, 0.0  ;;  %v9210_v8 = vld [vmem:[#allocation99_spill] sm:$0xff] }
 0x370   : > { %2478 = vmatmul.mubr.f32.gmra.mrb[130].mxu1 %v7916_v15  ;;  %2992 = vmatmul.mubr.f32.gmra.mrb[130].mxu0 %v7916_v15  ;;  %9189 = vst [vmem:[#allocation75_spill] sm:$0xff] %v7992_v40  ;;  %v1433_v38 = vadd.f32 %v9210_v8, %v7653_v11 }
 0x371   : > { %2483 = vmatprep.mubr.f32.mxu1 %v7920_v26  ;;  %2997 = vmatprep.mubr.f32.mxu0 %v7920_v26  ;;  %9199 = vst [vmem:[#allocation81_spill] sm:$0xff] %v8024_v25  ;;  %v8028_v24 = vmax.f32 %v1415_v35, 0.0  ;;  %9205 = vst [vmem:[#allocation91_spill] sm:$0xff] %v8040_v30  ;;  %v9206_v35 = vld [vmem:[#allocation95_spill] sm:$0xff]  ;;  %v8048_v43 = vmax.f32 %v1419_v62, 0.0  ;;  %v9212_v62 = vld [vmem:[#allocation97_spill] sm:$0xff] }
 0x372   : > { %v1427_v29 = vadd.f32 %v9206_v35, %v7653_v11 }
 0x373   : > { %9201 = vst [vmem:[#allocation87_spill] sm:$0xff] %v8028_v24  ;;  %9207 = vst [vmem:[#allocation89_spill] sm:$0xff] %v8048_v43 }
 0x374   : > { %2484 = vmatmul.mubr.f32.gmra.mrb[132].mxu1 %v7928_v44  ;;  %2998 = vmatmul.mubr.f32.gmra.mrb[132].mxu0 %v7928_v44 }
 0x375   : > { %2489 = vmatprep.mubr.f32.mxu1 %v7932_v4  ;;  %3003 = vmatprep.mubr.f32.mxu0 %v7932_v4 }
 0x378   : > { %2490 = vmatmul.mubr.f32.gmra.mrb[134].mxu1 %v7940_v13  ;;  %3004 = vmatmul.mubr.f32.gmra.mrb[134].mxu0 %v7940_v13 }
 0x379   : > { %2495 = vmatprep.mubr.f32.mxu1 %v7944_v39  ;;  %3009 = vmatprep.mubr.f32.mxu0 %v7944_v39 }
 0x37c   : > { %2496 = vmatmul.mubr.f32.gmra.mrb[136].mxu1 %v7952_v50  ;;  %3010 = vmatmul.mubr.f32.gmra.mrb[136].mxu0 %v7952_v50 }
 0x37d   : > { %2501 = vmatprep.mubr.f32.mxu1 %v7956_v10  ;;  %3015 = vmatprep.mubr.f32.mxu0 %v7956_v10 }
 0x380   : > { %2502 = vmatmul.mubr.f32.gmra.mrb[138].mxu1 %v7964_v48  ;;  %3016 = vmatmul.mubr.f32.gmra.mrb[138].mxu0 %v7964_v48 }
 0x381   : > { %2507 = vmatprep.mubr.f32.mxu1 %v7968_v61  ;;  %3021 = vmatprep.mubr.f32.mxu0 %v7968_v61 }
 0x384   : > { %2508 = vmatmul.mubr.f32.gmra.mrb[140].mxu1 %v7976_v21  ;;  %3022 = vmatmul.mubr.f32.gmra.mrb[140].mxu0 %v7976_v21  ;;  %v9225_v21 = vld [vmem:[#allocation29_spill] sm:$0xff] }
 0x385   : > { %2513 = vmatprep.mubr.f32.mxu1 %v7980_v14  ;;  %3027 = vmatprep.mubr.f32.mxu0 %v7980_v14  ;;  %v9223_v14 = vld [vmem:[#allocation27_spill] sm:$0xff] }
 0x388   : > { %2514 = vmatmul.mubr.f32.gmra.mrb[142].mxu1 %v7988_v20  ;;  %3028 = vmatmul.mubr.f32.gmra.mrb[142].mxu0 %v7988_v20  ;;  %v9222_v20 = vld [vmem:[#allocation26_spill] sm:$0xff] }
 0x389   : > { %2519 = vmatprep.mubr.f32.mxu1 %v7992_v40  ;;  %3033 = vmatprep.mubr.f32.mxu0 %v7992_v40  ;;  %v1833_v40 = vld [vmem:[#allocation11 + $0x840] sm:$0xff] }
 0x38c   : > { %2520 = vmatmul.mubr.f32.gmra.mrb[144].mxu1 %v8000_v32  ;;  %3034 = vmatmul.mubr.f32.gmra.mrb[144].mxu0 %v8000_v32  ;;  %v1826_v32 = vld [vmem:[#allocation11 + $0x808] sm:$0xff] }
 0x38d   : > { %2525 = vmatprep.mubr.f32.mxu1 %v8004_v63  ;;  %3039 = vmatprep.mubr.f32.mxu0 %v8004_v63  ;;  %v9220_v63 = vld [vmem:[#allocation24_spill] sm:$0xff] }
 0x390   : > { %2526 = vmatmul.mubr.f32.gmra.mrb[146].mxu1 %v8012_v58  ;;  %3040 = vmatmul.mubr.f32.gmra.mrb[146].mxu0 %v8012_v58  ;;  %v1820_v58 = vld [vmem:[#allocation11 + $0x7d8] sm:$0xff] }
 0x391   : > { %2531 = vmatprep.mubr.f32.mxu1 %v8016_v47  ;;  %3045 = vmatprep.mubr.f32.mxu0 %v8016_v47  ;;  %v1813_v47 = vld [vmem:[#allocation11 + $0x7a0] sm:$0xff] }
 0x394   : > { %2532 = vmatmul.mubr.f32.gmra.mrb[148].mxu1 %v8024_v25  ;;  %3046 = vmatmul.mubr.f32.gmra.mrb[148].mxu0 %v8024_v25  ;;  %v8052_v25 = vmax.f32 %v1427_v29, 0.0  ;;  %v9214_v29 = vld [vmem:[#allocation103_spill] sm:$0xff] }
 0x395   : > { %2537 = vmatprep.mubr.f32.mxu1 %v8028_v24  ;;  %3051 = vmatprep.mubr.f32.mxu0 %v8028_v24  ;;  %v1425_v24 = vadd.f32 %v9208_v7, %v7666_v49  ;;  %v1439_v7 = vadd.f32 %v9214_v29, %v7653_v11  ;;  %v1799_v29 = vld [vmem:[#allocation11 + $0x730] sm:$0xff] }
 0x396   : > { %9209 = vst [vmem:[#allocation95_spill] sm:$0xff] %v8052_v25 }
 0x397   : > { %v8060_v35 = vmax.f32 %v1425_v24, 0.0  ;;  %v9216_v24 = vld [vmem:[#allocation101_spill] sm:$0xff] }
 0x398   : > { %2538 = vmatmul.mubr.f32.gmra.mrb[150].mxu1 %v8036_v9  ;;  %3052 = vmatmul.mubr.f32.gmra.mrb[150].mxu0 %v8036_v9  ;;  %v8064_v9 = vmax.f32 %v1433_v38, 0.0  ;;  %v1797_v38 = vld [vmem:[#allocation11 + $0x720] sm:$0xff] }
 0x399   : > { %2543 = vmatprep.mubr.f32.mxu1 %v8040_v30  ;;  %3057 = vmatprep.mubr.f32.mxu0 %v8040_v30  ;;  %9211 = vst [vmem:[#allocation93_spill] sm:$0xff] %v8060_v35  ;;  %v1431_v30 = vadd.f32 %v9212_v62, %v7666_v49  ;;  %v1804_v62 = vld [vmem:[#allocation11 + $0x758] sm:$0xff] }
 0x39a   : > { %9213 = vst [vmem:[#allocation99_spill] sm:$0xff] %v8064_v9 }
 0x39b   : > { %v8072_v8 = vmax.f32 %v1431_v30, 0.0  ;;  %v1806_v30 = vld [vmem:[#allocation11 + $0x768] sm:$0xff] }
 0x39c   : > { %2544 = vmatmul.mubr.f32.gmra.mrb[152].mxu1 %v8048_v43  ;;  %3058 = vmatmul.mubr.f32.gmra.mrb[152].mxu0 %v8048_v43  ;;  %v8076_v43 = vmax.f32 %v1439_v7, 0.0  ;;  %v1819_v7 = vld [vmem:[#allocation11 + $0x7d0] sm:$0xff] }
 0x39d   : > { %2549 = vmatprep.mubr.f32.mxu1 %v8052_v25  ;;  %3063 = vmatprep.mubr.f32.mxu0 %v8052_v25  ;;  %9215 = vst [vmem:[#allocation97_spill] sm:$0xff] %v8072_v8  ;;  %v1437_v25 = vadd.f32 %v9216_v24, %v7666_v49  ;;  %v1812_v49 = vld [vmem:[#allocation11 + $0x798] sm:$0xff]  ;;  %v9219_v24 = vld [vmem:[#allocation23_spill] sm:$0xff] }
 0x39e   : > { %9217 = vst [vmem:[#allocation103_spill] sm:$0xff] %v8076_v43 }
 0x39f   : > { %v8082_v11 = vmax.f32 %v1437_v25, 0.0  ;;  %v1818_v25 = vld [vmem:[#allocation11 + $0x7c8] sm:$0xff] }
 0x3a0   : > { %2550 = vmatmul.mubr.f32.gmra.mrb[154].mxu1 %v8060_v35  ;;  %3064 = vmatmul.mubr.f32.gmra.mrb[154].mxu0 %v8060_v35  ;;  %v1811_v35 = vld [vmem:[#allocation11 + $0x790] sm:$0xff] }
 0x3a1   : > { %2555 = vmatprep.mubr.f32.mxu1 %v8064_v9  ;;  %3069 = vmatprep.mubr.f32.mxu0 %v8064_v9  ;;  %9218 = vst [vmem:[#allocation101_spill] sm:$0xff] %v8082_v11  ;;  %v5258_v9 = vpack.c.bf16 %v1806_v30, %v1799_v29  ;;  %v5153_v29 = vpack.c.bf16 %v1833_v40, %v1826_v32  ;;  %v1832_v30 = vld [vmem:[#allocation11 + $0x838] sm:$0xff]  ;;  %v1846_v32 = vld [vmem:[#allocation11 + $0x8a8] sm:$0xff] }
 0x3a4   : > { %2556 = vmatmul.mubr.f32.gmra.mrb[156].mxu1 %v8072_v8  ;;  %3070 = vmatmul.mubr.f32.gmra.mrb[156].mxu0 %v8072_v8  ;;  %v5147_v8 = vpack.c.bf16 %v1804_v62, %v1797_v38  ;;  %v5261_v38 = vpack.c.bf16 %v1820_v58, %v1813_v47  ;;  %v1825_v62 = vld [vmem:[#allocation11 + $0x800] sm:$0xff] }
 0x3a5   : > { %2561 = vmatprep.mubr.f32.mxu1 %v8076_v43  ;;  %3075 = vmatprep.mubr.f32.mxu0 %v8076_v43  ;;  %v5149_v43 = vpack.c.bf16 %v1819_v7, %v1812_v49  ;;  %v1827_v49 = vld [vmem:[#allocation11 + $0x810] sm:$0xff]  ;;  %v1834_v7 = vld [vmem:[#allocation11 + $0x848] sm:$0xff]  ;;  %v5155_v58 = vpack.c.bf16 %v1832_v30, %v1825_v62 }
 0x3a6   : > { %v5264_v47 = vpack.c.bf16 %v1834_v7, %v1827_v49  ;;  %v1855_v30 = vld [vmem:[#allocation11 + $0x8f0] sm:$0xff]  ;;  %v1862_v49 = vld [vmem:[#allocation11 + $0x928] sm:$0xff]  ;;  %v9226_v7 = vld [vmem:[#allocation30_spill] sm:$0xff] }
 0x3a8   : > { %2562 = vmatmul.mubr.f32.gmra.mrb[158].mxu1 %v8082_v11  ;;  %3076 = vmatmul.mubr.f32.gmra.mrb[158].mxu0 %v8082_v11  ;;  %v9221_v11 = vld [vmem:[#allocation25_spill] sm:$0xff] }
 0x3a9   : > { %3146 = vmatprep.mubr.f32.mxu1 %v9219_v24  ;;  %3660 = vmatprep.mubr.f32.mxu0 %v9219_v24  ;;  %v5151_v24 = vpack.c.bf16 %v1818_v25, %v1811_v35  ;;  %v1848_v35 = vld [vmem:[#allocation11 + $0x8b8] sm:$0xff]  ;;  %v1861_v25 = vld [vmem:[#allocation11 + $0x920] sm:$0xff] }
 0x3ac   : > { %3147 = vmatmul.mubr.f32.vlgmr.msra.gmra.mrb[160].mxu1 %v9220_v63  ;;  %3661 = vmatmul.mubr.f32.vlgmr.msra.gmra.mrb[160].mxu0 %v9220_v63  ;;  %v1840_v63 = vld [vmem:[#allocation11 + $0x878] sm:$0xff] }
 0x3ad   : > { %5148 = vmatpush1.bf16.msra.mxu1 %v5147_v8  ;;  %3152 = vmatprep.mubr.f32.mxu1 %v9221_v11  ;;  %v1847_v8 = vld [vmem:[#allocation11 + $0x8b0] sm:$0xff] }
 0x3ae   : > { %3665 = vmatprep.mubr.f32.mxu0 %v9221_v11  ;;  %5259 = vmatpush1.bf16.msra.mxu0 %v5258_v9  ;;  %v1839_v9 = vld [vmem:[#allocation11 + $0x870] sm:$0xff]  ;;  %v5157_v40 = vpack.c.bf16 %v1847_v8, %v1840_v63  ;;  %v9224_v11 = vld [vmem:[#allocation28_spill] sm:$0xff]  ;;  %v1868_v63 = vld [vmem:[#allocation11 + $0x958] sm:$0xff] }
 0x3af   : > { %5150 = vmatprep.subr.bf16.mxu1 %v5149_v43  ;;  %5260 = vmatprep.subr.bf16.mxu0 %v9180_v28  ;;  %v1841_v43 = vld [vmem:[#allocation11 + $0x880] sm:$0xff]  ;;  %v1875_v8 = vld [vmem:[#allocation11 + $0x990] sm:$0xff] }
 0x3b0   : > { %3153 = vmatmul.mubr.f32.gmra.mrb[162].mxu1 %v9222_v20  ;;  %3666 = vmatmul.mubr.f32.gmra.mrb[162].mxu0 %v9222_v20  ;;  %v1854_v20 = vld [vmem:[#allocation11 + $0x8e8] sm:$0xff] }
 0x3b1   : > { %3158 = vmatprep.mubr.f32.mxu1 %v9223_v14  ;;  %3670 = vmatprep.mubr.f32.mxu0 %v9223_v14  ;;  %v5159_v14 = vpack.c.bf16 %v1846_v32, %v1839_v9  ;;  %v5161_v62 = vpack.c.bf16 %v1861_v25, %v1854_v20  ;;  %v5165_v9 = vpack.c.bf16 %v1875_v8, %v1868_v63  ;;  %v1869_v32 = vld [vmem:[#allocation11 + $0x960] sm:$0xff]  ;;  %v1882_v20 = vld [vmem:[#allocation11 + $0x9c8] sm:$0xff]  ;;  %v9230_v63 = vld [vmem:[#allocation34_spill] sm:$0xff] }
 0x3b2   : > { %5152 = vmatpush1.bf16.msra.mxu1 %v5151_v24  ;;  %5262 = vmatpush1.bf16.msra.mxu0 %v5261_v38  ;;  %v5267_v24 = vpack.c.bf16 %v1848_v35, %v1841_v43  ;;  %v1853_v38 = vld [vmem:[#allocation11 + $0x8e0] sm:$0xff]  ;;  %v1876_v43 = vld [vmem:[#allocation11 + $0x998] sm:$0xff]  ;;  %v9228_v35 = vld [vmem:[#allocation32_spill] sm:$0xff] }
 0x3b3   : > { %5154 = vmatprep.subr.bf16.mxu1 %v5153_v29  ;;  %5263 = vmatprep.subr.bf16.mxu0 %v9180_v28  ;;  %v1860_v29 = vld [vmem:[#allocation11 + $0x918] sm:$0xff]  ;;  %v1889_v25 = vld [vmem:[#allocation11 + $0xa00] sm:$0xff] }
 0x3b4   : > { %3159 = vmatmul.mubr.f32.gmra.mrb[164].mxu1 %v9224_v11  ;;  %3671 = vmatmul.mubr.f32.gmra.mrb[164].mxu0 %v9224_v11  ;;  %v9227_v11 = vld [vmem:[#allocation31_spill] sm:$0xff]  ;;  %v1896_v8 = vld [vmem:[#allocation11 + $0xa38] sm:$0xff] }
 0x3b5   : > { %3164 = vmatprep.mubr.f32.mxu1 %v9225_v21  ;;  %3675 = vmatprep.mubr.f32.mxu0 %v9225_v21  ;;  %v5163_v21 = vpack.c.bf16 %v1860_v29, %v1853_v38  ;;  %v1881_v38 = vld [vmem:[#allocation11 + $0x9c0] sm:$0xff]  ;;  %v1888_v29 = vld [vmem:[#allocation11 + $0x9f8] sm:$0xff] }
 0x3b6   : > { %5156 = vmatpush1.bf16.msra.mxu1 %v5155_v58  ;;  %5265 = vmatpush1.bf16.msra.mxu0 %v5264_v47  ;;  %v5270_v58 = vpack.c.bf16 %v1862_v49, %v1855_v30  ;;  %v1867_v47 = vld [vmem:[#allocation11 + $0x950] sm:$0xff]  ;;  %v1890_v49 = vld [vmem:[#allocation11 + $0xa08] sm:$0xff] }
 0x3b7   : > { %5158 = vmatprep.subr.bf16.mxu1 %v5157_v40  ;;  %5266 = vmatprep.subr.bf16.mxu0 %v9180_v28  ;;  %v1874_v40 = vld [vmem:[#allocation11 + $0x988] sm:$0xff]  ;;  %v1883_v30 = vld [vmem:[#allocation11 + $0x9d0] sm:$0xff] }
 0x3b8   : > { %3165 = vmatmul.mubr.f32.gmra.mrb[166].mxu1 %v9226_v7  ;;  %3676 = vmatmul.mubr.f32.gmra.mrb[166].mxu0 %v9226_v7  ;;  %v9229_v7 = vld [vmem:[#allocation33_spill] sm:$0xff] }
 0x3b9   : > { %3170 = vmatprep.mubr.f32.mxu1 %v9227_v11  ;;  %3680 = vmatprep.mubr.f32.mxu0 %v9227_v11  ;;  %v1903_v11 = vld [vmem:[#allocation11 + $0xa70] sm:$0xff] }
 0x3ba   : > { %5160 = vmatpush1.bf16.msra.mxu1 %v5159_v14  ;;  %5268 = vmatpush1.bf16.msra.mxu0 %v5267_v24  ;;  %v5167_v14 = vpack.c.bf16 %v1874_v40, %v1867_v47  ;;  %v5273_v24 = vpack.c.bf16 %v1876_v43, %v1869_v32  ;;  %v1895_v47 = vld [vmem:[#allocation11 + $0xa30] sm:$0xff]  ;;  %v1902_v40 = vld [vmem:[#allocation11 + $0xa68] sm:$0xff]  ;;  %v1897_v32 = vld [vmem:[#allocation11 + $0xa40] sm:$0xff] }
 0x3bb   : > { %5162 = vmatprep.subr.bf16.mxu1 %v5161_v62  ;;  %5269 = vmatprep.subr.bf16.mxu0 %v9180_v28  ;;  %v5169_v62 = vpack.c.bf16 %v1889_v25, %v1882_v20  ;;  %v1904_v43 = vld [vmem:[#allocation11 + $0xa78] sm:$0xff]  ;;  %v9232_v20 = vld [vmem:[#allocation36_spill] sm:$0xff] }
 0x3bc   : > { %3171 = vmatmul.mubr.f32.gmra.mrb[168].mxu1 %v9228_v35  ;;  %3681 = vmatmul.mubr.f32.gmra.mrb[168].mxu0 %v9228_v35  ;;  %v9231_v35 = vld [vmem:[#allocation35_spill] sm:$0xff]  ;;  %v1910_v25 = vld [vmem:[#allocation11 + $0xaa8] sm:$0xff] }
 0x3bd   : > { %3176 = vmatprep.mubr.f32.mxu1 %v9229_v7  ;;  %3685 = vmatprep.mubr.f32.mxu0 %v9229_v7  ;;  %v1917_v7 = vld [vmem:[#allocation11 + $0xae0] sm:$0xff] }
 0x3be   : > { %5164 = vmatpush1.bf16.msra.mxu1 %v5163_v21  ;;  %5271 = vmatpush1.bf16.msra.mxu0 %v5270_v58  ;;  %v5171_v21 = vpack.c.bf16 %v1888_v29, %v1881_v38  ;;  %v5276_v58 = vpack.c.bf16 %v1890_v49, %v1883_v30  ;;  %v1909_v38 = vld [vmem:[#allocation11 + $0xaa0] sm:$0xff]  ;;  %v1916_v29 = vld [vmem:[#allocation11 + $0xad8] sm:$0xff]  ;;  %v1911_v30 = vld [vmem:[#allocation11 + $0xab0] sm:$0xff] }
 0x3bf   : > { %5166 = vmatprep.subr.bf16.mxu1 %v5165_v9  ;;  %5272 = vmatprep.subr.bf16.mxu0 %v9180_v28  ;;  %v5173_v9 = vpack.c.bf16 %v1903_v11, %v1896_v8  ;;  %v1918_v49 = vld [vmem:[#allocation11 + $0xae8] sm:$0xff]  ;;  %v9234_v8 = vld [vmem:[#allocation38_spill] sm:$0xff] }
 0x3c0   : > { %3177 = vmatmul.mubr.f32.gmra.mrb[170].mxu1 %v9230_v63  ;;  %3686 = vmatmul.mubr.f32.gmra.mrb[170].mxu0 %v9230_v63  ;;  %v9233_v63 = vld [vmem:[#allocation37_spill] sm:$0xff]  ;;  %v1924_v11 = vld [vmem:[#allocation11 + $0xb18] sm:$0xff] }
 0x3c1   : > { %3182 = vmatprep.mubr.f32.mxu1 %v9231_v35  ;;  %3690 = vmatprep.mubr.f32.mxu0 %v9231_v35  ;;  %v1931_v35 = vld [vmem:[#allocation11 + $0xb50] sm:$0xff] }
 0x3c2   : > { %5168 = vmatpush1.bf16.msra.mxu1 %v5167_v14  ;;  %5274 = vmatpush1.bf16.msra.mxu0 %v5273_v24  ;;  %v5175_v14 = vpack.c.bf16 %v1902_v40, %v1895_v47  ;;  %v5279_v24 = vpack.c.bf16 %v1904_v43, %v1897_v32  ;;  %v1923_v47 = vld [vmem:[#allocation11 + $0xb10] sm:$0xff]  ;;  %v1930_v40 = vld [vmem:[#allocation11 + $0xb48] sm:$0xff]  ;;  %v1925_v32 = vld [vmem:[#allocation11 + $0xb20] sm:$0xff] }
 0x3c3   : > { %5170 = vmatprep.subr.bf16.mxu1 %v5169_v62  ;;  %5275 = vmatprep.subr.bf16.mxu0 %v9180_v28  ;;  %v5177_v62 = vpack.c.bf16 %v1917_v7, %v1910_v25  ;;  %v1932_v43 = vld [vmem:[#allocation11 + $0xb58] sm:$0xff]  ;;  %v9236_v25 = vld [vmem:[#allocation40_spill] sm:$0xff] }
 0x3c4   : > { %3183 = vmatmul.mubr.f32.gmra.mrb[172].mxu1 %v9232_v20  ;;  %3691 = vmatmul.mubr.f32.gmra.mrb[172].mxu0 %v9232_v20  ;;  %v9235_v20 = vld [vmem:[#allocation39_spill] sm:$0xff]  ;;  %v1938_v7 = vld [vmem:[#allocation11 + $0xb88] sm:$0xff] }
 0x3c5   : > { %3188 = vmatprep.mubr.f32.mxu1 %v9233_v63  ;;  %3695 = vmatprep.mubr.f32.mxu0 %v9233_v63  ;;  %v1945_v63 = vld [vmem:[#allocation11 + $0xbc0] sm:$0xff] }
 0x3c6   : > { %5172 = vmatpush1.bf16.msra.mxu1 %v5171_v21  ;;  %5277 = vmatpush1.bf16.msra.mxu0 %v5276_v58  ;;  %v5179_v21 = vpack.c.bf16 %v1916_v29, %v1909_v38  ;;  %v5282_v58 = vpack.c.bf16 %v1918_v49, %v1911_v30  ;;  %v1937_v38 = vld [vmem:[#allocation11 + $0xb80] sm:$0xff]  ;;  %v1944_v29 = vld [vmem:[#allocation11 + $0xbb8] sm:$0xff]  ;;  %v1939_v30 = vld [vmem:[#allocation11 + $0xb90] sm:$0xff] }
 0x3c7   : > { %5174 = vmatprep.subr.bf16.mxu1 %v5173_v9  ;;  %5278 = vmatprep.subr.bf16.mxu0 %v9180_v28  ;;  %v5181_v9 = vpack.c.bf16 %v1931_v35, %v1924_v11  ;;  %v1946_v49 = vld [vmem:[#allocation11 + $0xbc8] sm:$0xff]  ;;  %v9238_v11 = vld [vmem:[#allocation42_spill] sm:$0xff] }
 0x3c8   : > { %3189 = vmatmul.mubr.f32.gmra.mrb[174].mxu1 %v9234_v8  ;;  %3696 = vmatmul.mubr.f32.gmra.mrb[174].mxu0 %v9234_v8  ;;  %v9237_v8 = vld [vmem:[#allocation41_spill] sm:$0xff]  ;;  %v1952_v35 = vld [vmem:[#allocation11 + $0xbf8] sm:$0xff] }
 0x3c9   : > { %3194 = vmatprep.mubr.f32.mxu1 %v9235_v20  ;;  %3700 = vmatprep.mubr.f32.mxu0 %v9235_v20  ;;  %v1959_v20 = vld [vmem:[#allocation11 + $0xc30] sm:$0xff] }
 0x3ca   : > { %5176 = vmatpush1.bf16.msra.mxu1 %v5175_v14  ;;  %5280 = vmatpush1.bf16.msra.mxu0 %v5279_v24  ;;  %v5183_v14 = vpack.c.bf16 %v1930_v40, %v1923_v47  ;;  %v5285_v24 = vpack.c.bf16 %v1932_v43, %v1925_v32  ;;  %v1951_v47 = vld [vmem:[#allocation11 + $0xbf0] sm:$0xff]  ;;  %v1958_v40 = vld [vmem:[#allocation11 + $0xc28] sm:$0xff]  ;;  %v1953_v32 = vld [vmem:[#allocation11 + $0xc00] sm:$0xff] }
 0x3cb   : > { %5178 = vmatprep.subr.bf16.mxu1 %v5177_v62  ;;  %5281 = vmatprep.subr.bf16.mxu0 %v9180_v28  ;;  %v5185_v62 = vpack.c.bf16 %v1945_v63, %v1938_v7  ;;  %v1960_v43 = vld [vmem:[#allocation11 + $0xc38] sm:$0xff]  ;;  %v9240_v7 = vld [vmem:[#allocation44_spill] sm:$0xff] }
 0x3cc   : > { %3195 = vmatmul.mubr.f32.gmra.mrb[176].mxu1 %v9236_v25  ;;  %3701 = vmatmul.mubr.f32.gmra.mrb[176].mxu0 %v9236_v25  ;;  %v9239_v25 = vld [vmem:[#allocation43_spill] sm:$0xff]  ;;  %v1966_v63 = vld [vmem:[#allocation11 + $0xc68] sm:$0xff] }
 0x3cd   : > { %3200 = vmatprep.mubr.f32.mxu1 %v9237_v8  ;;  %3705 = vmatprep.mubr.f32.mxu0 %v9237_v8  ;;  %v1973_v8 = vld [vmem:[#allocation11 + $0xca0] sm:$0xff] }
 0x3ce   : > { %5180 = vmatpush1.bf16.msra.mxu1 %v5179_v21  ;;  %5283 = vmatpush1.bf16.msra.mxu0 %v5282_v58  ;;  %v5187_v21 = vpack.c.bf16 %v1944_v29, %v1937_v38  ;;  %v5288_v58 = vpack.c.bf16 %v1946_v49, %v1939_v30  ;;  %v1965_v38 = vld [vmem:[#allocation11 + $0xc60] sm:$0xff]  ;;  %v1972_v29 = vld [vmem:[#allocation11 + $0xc98] sm:$0xff]  ;;  %v1967_v30 = vld [vmem:[#allocation11 + $0xc70] sm:$0xff] }
 0x3cf   : > { %5182 = vmatprep.subr.bf16.mxu1 %v5181_v9  ;;  %5284 = vmatprep.subr.bf16.mxu0 %v9180_v28  ;;  %v5189_v9 = vpack.c.bf16 %v1959_v20, %v1952_v35  ;;  %v1974_v49 = vld [vmem:[#allocation11 + $0xca8] sm:$0xff]  ;;  %v9242_v35 = vld [vmem:[#allocation46_spill] sm:$0xff] }
 0x3d0   : > { %3201 = vmatmul.mubr.f32.gmra.mrb[178].mxu1 %v9238_v11  ;;  %3706 = vmatmul.mubr.f32.gmra.mrb[178].mxu0 %v9238_v11  ;;  %v9241_v11 = vld [vmem:[#allocation45_spill] sm:$0xff]  ;;  %v1980_v20 = vld [vmem:[#allocation11 + $0xcd8] sm:$0xff] }
 0x3d1   : > { %3206 = vmatprep.mubr.f32.mxu1 %v9239_v25  ;;  %3710 = vmatprep.mubr.f32.mxu0 %v9239_v25  ;;  %v1987_v25 = vld [vmem:[#allocation11 + $0xd10] sm:$0xff] }
 0x3d2   : > { %5184 = vmatpush1.bf16.msra.mxu1 %v5183_v14  ;;  %5286 = vmatpush1.bf16.msra.mxu0 %v5285_v24  ;;  %v5191_v14 = vpack.c.bf16 %v1958_v40, %v1951_v47  ;;  %v5291_v24 = vpack.c.bf16 %v1960_v43, %v1953_v32  ;;  %v1979_v47 = vld [vmem:[#allocation11 + $0xcd0] sm:$0xff]  ;;  %v1986_v40 = vld [vmem:[#allocation11 + $0xd08] sm:$0xff]  ;;  %v1981_v32 = vld [vmem:[#allocation11 + $0xce0] sm:$0xff] }
 0x3d3   : > { %5186 = vmatprep.subr.bf16.mxu1 %v5185_v62  ;;  %5287 = vmatprep.subr.bf16.mxu0 %v9180_v28  ;;  %v5193_v62 = vpack.c.bf16 %v1973_v8, %v1966_v63  ;;  %v1988_v43 = vld [vmem:[#allocation11 + $0xd18] sm:$0xff]  ;;  %v9244_v63 = vld [vmem:[#allocation48_spill] sm:$0xff] }
 0x3d4   : > { %3207 = vmatmul.mubr.f32.gmra.mrb[180].mxu1 %v9240_v7  ;;  %3711 = vmatmul.mubr.f32.gmra.mrb[180].mxu0 %v9240_v7  ;;  %v9243_v7 = vld [vmem:[#allocation47_spill] sm:$0xff]  ;;  %v1994_v8 = vld [vmem:[#allocation11 + $0xd48] sm:$0xff] }
 0x3d5   : > { %3212 = vmatprep.mubr.f32.mxu1 %v9241_v11  ;;  %3715 = vmatprep.mubr.f32.mxu0 %v9241_v11  ;;  %v2001_v11 = vld [vmem:[#allocation11 + $0xd80] sm:$0xff] }
 0x3d6   : > { %5188 = vmatpush1.bf16.msra.mxu1 %v5187_v21  ;;  %5289 = vmatpush1.bf16.msra.mxu0 %v5288_v58  ;;  %v5195_v21 = vpack.c.bf16 %v1972_v29, %v1965_v38  ;;  %v5294_v58 = vpack.c.bf16 %v1974_v49, %v1967_v30  ;;  %v1993_v38 = vld [vmem:[#allocation11 + $0xd40] sm:$0xff]  ;;  %v2000_v29 = vld [vmem:[#allocation11 + $0xd78] sm:$0xff]  ;;  %v1995_v30 = vld [vmem:[#allocation11 + $0xd50] sm:$0xff] }
 0x3d7   : > { %5190 = vmatprep.subr.bf16.mxu1 %v5189_v9  ;;  %5290 = vmatprep.subr.bf16.mxu0 %v9180_v28  ;;  %v5197_v9 = vpack.c.bf16 %v1987_v25, %v1980_v20  ;;  %v2002_v49 = vld [vmem:[#allocation11 + $0xd88] sm:$0xff]  ;;  %v9246_v20 = vld [vmem:[#allocation50_spill] sm:$0xff] }
 0x3d8   : > { %3213 = vmatmul.mubr.f32.gmra.mrb[182].mxu1 %v9242_v35  ;;  %3716 = vmatmul.mubr.f32.gmra.mrb[182].mxu0 %v9242_v35  ;;  %v9245_v35 = vld [vmem:[#allocation49_spill] sm:$0xff]  ;;  %v2008_v25 = vld [vmem:[#allocation11 + $0xdb8] sm:$0xff] }
 0x3d9   : > { %3218 = vmatprep.mubr.f32.mxu1 %v9243_v7  ;;  %3720 = vmatprep.mubr.f32.mxu0 %v9243_v7  ;;  %v2015_v7 = vld [vmem:[#allocation11 + $0xdf0] sm:$0xff] }
 0x3da   : > { %5192 = vmatpush1.bf16.msra.mxu1 %v5191_v14  ;;  %5292 = vmatpush1.bf16.msra.mxu0 %v5291_v24  ;;  %v5199_v14 = vpack.c.bf16 %v1986_v40, %v1979_v47  ;;  %v5297_v24 = vpack.c.bf16 %v1988_v43, %v1981_v32  ;;  %v2007_v47 = vld [vmem:[#allocation11 + $0xdb0] sm:$0xff]  ;;  %v2014_v40 = vld [vmem:[#allocation11 + $0xde8] sm:$0xff]  ;;  %v2009_v32 = vld [vmem:[#allocation11 + $0xdc0] sm:$0xff] }
 0x3db   : > { %5194 = vmatprep.subr.bf16.mxu1 %v5193_v62  ;;  %5293 = vmatprep.subr.bf16.mxu0 %v9180_v28  ;;  %v5201_v62 = vpack.c.bf16 %v2001_v11, %v1994_v8  ;;  %v2016_v43 = vld [vmem:[#allocation11 + $0xdf8] sm:$0xff]  ;;  %v9248_v8 = vld [vmem:[#allocation52_spill] sm:$0xff]  ;;  %v9249_v11 = vld [vmem:[#allocation53_spill] sm:$0xff] }
 0x3dc   : > { %3219 = vmatmul.mubr.f32.gmra.mrb[184].mxu1 %v9244_v63  ;;  %3721 = vmatmul.mubr.f32.gmra.mrb[184].mxu0 %v9244_v63  ;;  %v9247_v63 = vld [vmem:[#allocation51_spill] sm:$0xff] }
 0x3dd   : > { %3224 = vmatprep.mubr.f32.mxu1 %v9245_v35  ;;  %3725 = vmatprep.mubr.f32.mxu0 %v9245_v35  ;;  %v5207_v35 = vpack.c.bf16 %v2014_v40, %v2007_v47 }
 0x3de   : > { %5196 = vmatpush1.bf16.msra.mxu1 %v5195_v21  ;;  %5295 = vmatpush1.bf16.msra.mxu0 %v5294_v58  ;;  %v5203_v21 = vpack.c.bf16 %v2000_v29, %v1993_v38  ;;  %v5300_v58 = vpack.c.bf16 %v2002_v49, %v1995_v30  ;;  %v9251_v38 = vld [vmem:[#allocation55_spill] sm:$0xff]  ;;  %v9253_v29 = vld [vmem:[#allocation57_spill] sm:$0xff]  ;;  %v9254_v30 = vld [vmem:[#allocation58_spill] sm:$0xff] }
 0x3df   : > { %5198 = vmatprep.subr.bf16.mxu1 %v5197_v9  ;;  %5296 = vmatprep.subr.bf16.mxu0 %v9180_v28  ;;  %v5205_v9 = vpack.c.bf16 %v2015_v7, %v2008_v25  ;;  %v9256_v49 = vld [vmem:[#allocation60_spill] sm:$0xff]  ;;  %v9258_v25 = vld [vmem:[#allocation62_spill] sm:$0xff]  ;;  %v9259_v7 = vld [vmem:[#allocation63_spill] sm:$0xff] }
 0x3e0   : > { %3225 = vmatmul.mubr.f32.gmra.mrb[186].mxu1 %v9246_v20  ;;  %3726 = vmatmul.mubr.f32.gmra.mrb[186].mxu0 %v9246_v20  ;;  %v9257_v20 = vld [vmem:[#allocation61_spill] sm:$0xff] }
 0x3e1   : > { %3230 = vmatprep.mubr.f32.mxu1 %v9247_v63  ;;  %3730 = vmatprep.mubr.f32.mxu0 %v9247_v63  ;;  %v2017_v63 = vld [vmem:[#allocation13] sm:$0xff] }
 0x3e2   : > { %5200 = vmatpush1.bf16.msra.mxu1 %v5199_v14  ;;  %5298 = vmatpush1.bf16.msra.mxu0 %v5297_v24  ;;  %v5303_v14 = vpack.c.bf16 %v2016_v43, %v2009_v32  ;;  %v9250_v24 = vld [vmem:[#allocation54_spill] sm:$0xff]  ;;  %v9264_v43 = vld [vmem:[#allocation65_spill] sm:$0xff] }
 0x3e3   : > { %5202 = vmatprep.subr.bf16.mxu1 %v5201_v62  ;;  %5299 = vmatprep.subr.bf16.mxu0 %v9180_v28  ;;  %v9252_v62 = vld [vmem:[#allocation56_spill] sm:$0xff] }
 0x3e4   : > { %3231 = vmatmul.mubr.f32.gmra.mrb[188].mxu1 %v9248_v8  ;;  %3731 = vmatmul.mubr.f32.gmra.mrb[188].mxu0 %v9248_v8  ;;  %v9265_v8 = vld [vmem:[#allocation22_spill] sm:$0xff] }
 0x3e5   : > { %3236 = vmatprep.mubr.f32.mxu1 %v9249_v11  ;;  %3735 = vmatprep.mubr.f32.mxu0 %v9249_v11  ;;  %v8195_v11 = vrot.slane %v2017_v63, %v9265_v8 }
 0x3e6   : > { %5204 = vmatpush1.bf16.msra.mxu1 %v5203_v21  ;;  %5301 = vmatpush1.bf16.msra.mxu0 %v5300_v58  ;;  %v9260_v21 = vld [vmem:[#allocation64_spill] sm:$0xff]  ;;  %v9261_v58 = vld [vmem:[#allocation21_spill] sm:$0xff] }
 0x3e7   : > { %5206 = vmatprep.subr.bf16.mxu1 %v5205_v9  ;;  %5302 = vmatprep.subr.bf16.mxu0 %v9180_v28  ;;  %v9255_v28 = vld [vmem:[#allocation59_spill] sm:$0xff]  ;;  %v8186_v47 = vrot.slane %v2017_v63, %v9261_v58  ;;  %v9262_v9 = vld [vmem:[#allocation20_spill] sm:$0xff] }
 0x3e8   : > { %3237 = vmatmul.mubr.f32.gmra.mrb[190].mxu1 %v9250_v24  ;;  %3736 = vmatmul.mubr.f32.gmra.mrb[190].mxu0 %v9250_v24  ;;  %v9263_v40 = vsub.s32 2, %v9262_v9 }
 0x3e9   : > { %3242 = vmatprep.mubr.f32.mxu1 %v9251_v38  ;;  %3740 = vmatprep.mubr.f32.mxu0 %v9251_v38 }
 0x3ea   : > { %5208 = vmatpush1.bf16.msra.mxu1 %v5207_v35  ;;  %5304 = vmatpush1.bf16.msra.mxu0 %v5303_v14  ;;  %v8190_v32 = vrot.slane %v2017_v63, %v9263_v40  ;;  %v9266_v35 = vsub.s32 3, %v9262_v9 }
 0x3ec   : > { %3243 = vmatmul.mubr.f32.gmra.mrb[192].mxu1 %v9252_v62  ;;  %3741 = vmatmul.mubr.f32.gmra.mrb[192].mxu0 %v9252_v62  ;;  %v8199_v14 = vrot.slane %v2017_v63, %v9266_v35  ;;  %v9269_v35 = vld [vmem:[#allocation70_spill] sm:$0xff] }
 0x3ed   : > { %3248 = vmatprep.mubr.f32.mxu1 %v9253_v29  ;;  %3745 = vmatprep.mubr.f32.mxu0 %v9253_v29 }
 0x3f0   : > { %3249 = vmatmul.mubr.f32.gmra.mrb[194].mxu1 %v9254_v30  ;;  %3746 = vmatmul.mubr.f32.gmra.mrb[194].mxu0 %v9254_v30 }
 0x3f1   : > { %3254 = vmatprep.mubr.f32.mxu1 %v9255_v28  ;;  %3750 = vmatprep.mubr.f32.mxu0 %v9255_v28 }
 0x3f4   : > { %3255 = vmatmul.mubr.f32.gmra.mrb[196].mxu1 %v9256_v49  ;;  %3751 = vmatmul.mubr.f32.gmra.mrb[196].mxu0 %v9256_v49  ;;  %v9267_v49 = vld [vmem:[#allocation67_spill] sm:$0xff] }
 0x3f5   : > { %3260 = vmatprep.mubr.f32.mxu1 %v9257_v20  ;;  %3755 = vmatprep.mubr.f32.mxu0 %v9257_v20 }
 0x3f8   : > { %3261 = vmatmul.mubr.f32.gmra.mrb[198].mxu1 %v9258_v25  ;;  %3756 = vmatmul.mubr.f32.gmra.mrb[198].mxu0 %v9258_v25 }
 0x3f9   : > { %3266 = vmatprep.mubr.f32.mxu1 %v9259_v7  ;;  %3760 = vmatprep.mubr.f32.mxu0 %v9259_v7  ;;  %v9268_v7 = vld [vmem:[#allocation68_spill] sm:$0xff] }
 0x3fc   : > { %3267 = vmatmul.mubr.f32.gmra.mrb[200].mxu1 %v9260_v21  ;;  %3761 = vmatmul.mubr.f32.gmra.mrb[200].mxu0 %v9260_v21 }
 0x3fd   : > { %3272 = vmatprep.mubr.f32.mxu1 %v9264_v43  ;;  %3765 = vmatprep.mubr.f32.mxu0 %v9264_v43 }
 0x3ff   : > { %v2377_v24 = vpop.f32.mrb[96].mxu1  ;;  %v2891_v38 = vpop.f32.mrb[96].mxu0 }
 0x400   : > { %v5321_v62 = vadd.f32 %v2377_v24, %v8186_v47  ;;  %v5385_v29 = vadd.f32 %v2891_v38, %v8190_v32  ;;  %v2379_v30 = vpop.f32.mrb[97].mxu1  ;;  %v2893_v28 = vpop.f32.mrb[97].mxu0  ;;  %3273 = vmatmul.mubr.f32.gmra.mrb[202].mxu1 %v9267_v49  ;;  %3766 = vmatmul.mubr.f32.gmra.mrb[202].mxu0 %v9267_v49 }
 0x401   : > { %v5322_v20 = vadd.f32 %v2379_v30, %v8195_v11  ;;  %v5386_v25 = vadd.f32 %v2893_v28, %v8199_v14  ;;  %3278 = vmatprep.mubr.f32.mxu1 %v9268_v7  ;;  %3770 = vmatprep.mubr.f32.mxu0 %v9268_v7  ;;  %v9271_v7 = vld [vmem:[#allocation74_spill] sm:$0xff] }
 0x402   : > { %5922 = vtanh.f32 %v5321_v62  ;;  %v9270_v62 = vld [vmem:[#allocation72_spill] sm:$0xff] }
 0x403   : > { %5924 = vtanh.f32 %v5385_v29  ;;  %v2383_v63 = vpop.f32.mrb[98].mxu1  ;;  %v2897_v21 = vpop.f32.mrb[98].mxu0 }
 0x404   : > { %5926 = vtanh.f32 %v5322_v20  ;;  %v5323_v58 = vadd.f32 %v2383_v63, %v8186_v47  ;;  %v5387_v40 = vadd.f32 %v2897_v21, %v8190_v32  ;;  %v2385_v43 = vpop.f32.mrb[99].mxu1  ;;  %v2899_v8 = vpop.f32.mrb[99].mxu0  ;;  %3279 = vmatmul.mubr.f32.gmra.mrb[204].mxu1 %v9269_v35  ;;  %3771 = vmatmul.mubr.f32.gmra.mrb[204].mxu0 %v9269_v35 }
 0x405   : > { %5928 = vtanh.f32 %v5386_v25  ;;  %v5324_v24 = vadd.f32 %v2385_v43, %v8195_v11  ;;  %v5388_v38 = vadd.f32 %v2899_v8, %v8199_v14  ;;  %3284 = vmatprep.mubr.f32.mxu1 %v9270_v62  ;;  %3775 = vmatprep.mubr.f32.mxu0 %v9270_v62 }
 0x406   : > { %5930 = vtanh.f32 %v5323_v58  ;;  %v9272_v58 = vld [vmem:[#allocation76_spill] sm:$0xff] }
 0x407   : > { %5932 = vtanh.f32 %v5387_v40  ;;  %v2389_v29 = vpop.f32.mrb[100].mxu1  ;;  %v2903_v30 = vpop.f32.mrb[100].mxu0 }
 0x408   : > { %5934 = vtanh.f32 %v5324_v24  ;;  %v5325_v28 = vadd.f32 %v2389_v29, %v8186_v47  ;;  %v5389_v49 = vadd.f32 %v2903_v30, %v8190_v32  ;;  %v2391_v20 = vpop.f32.mrb[101].mxu1  ;;  %v2905_v25 = vpop.f32.mrb[101].mxu0  ;;  %3285 = vmatmul.mubr.f32.gmra.mrb[206].mxu1 %v9271_v7  ;;  %3776 = vmatmul.mubr.f32.gmra.mrb[206].mxu0 %v9271_v7  ;;  %v9273_v29 = vld [vmem:[#allocation78_spill] sm:$0xff] }
 0x409   : > { %5936 = vtanh.f32 %v5388_v38  ;;  %v5326_v63 = vadd.f32 %v2391_v20, %v8195_v11  ;;  %v5390_v21 = vadd.f32 %v2905_v25, %v8199_v14  ;;  %3290 = vmatprep.mubr.f32.mxu1 %v9272_v58  ;;  %3780 = vmatprep.mubr.f32.mxu0 %v9272_v58  ;;  %v9274_v20 = vld [vmem:[#allocation80_spill] sm:$0xff] }
 0x40a   : > { %5938 = vtanh.f32 %v5325_v28 }
 0x40b   : > { %5940 = vtanh.f32 %v5389_v49  ;;  %v2395_v40 = vpop.f32.mrb[102].mxu1  ;;  %v2909_v43 = vpop.f32.mrb[102].mxu0 }
 0x40c   : > { %v5923_v8 = vpop.eup %5922  ;;  %5942 = vtanh.f32 %v5326_v63  ;;  %v5327_v35 = vadd.f32 %v2395_v40, %v8186_v47  ;;  %v5391_v24 = vadd.f32 %v2909_v43, %v8190_v32  ;;  %v2397_v62 = vpop.f32.mrb[103].mxu1  ;;  %3291 = vmatmul.mubr.f32.gmra.mrb[208].mxu1 %v9273_v29  ;;  %3781 = vmatmul.mubr.f32.gmra.mrb[208].mxu0 %v9273_v29 }
 0x40d   : > { %v2911_v38 = vpop.f32.mrb[103].mxu0  ;;  %v5925_v30 = vpop.eup %5924  ;;  %4270 = vst [vmem:[%s8230_s21] sm:$0xff] %v5923_v8  ;;  %5944 = vtanh.f32 %v5390_v21  ;;  %v5328_v28 = vadd.f32 %v2397_v62, %v8195_v11  ;;  %3296 = vmatprep.mubr.f32.mxu1 %v9274_v20  ;;  %3785 = vmatprep.mubr.f32.mxu0 %v9274_v20 }
 0x40e   : > { %v5392_v49 = vadd.f32 %v2911_v38, %v8199_v14  ;;  %v5927_v25 = vpop.eup %5926  ;;  %4272 = vst [vmem:[%s8230_s21 + $0x10] sm:$0xff] %v5925_v30  ;;  %5946 = vtanh.f32 %v5327_v35  ;;  %v9275_v38 = vld [vmem:[#allocation82_spill] sm:$0xff]  ;;  %v9276_v30 = vld [vmem:[#allocation84_spill] sm:$0xff] }
 0x40f   : > { %v5929_v7 = vpop.eup %5928  ;;  %4271 = vst [vmem:[%s8230_s21 + $0x8] sm:$0xff] %v5927_v25  ;;  %5948 = vtanh.f32 %v5391_v24  ;;  %v2401_v63 = vpop.f32.mrb[104].mxu1 }
 0x410   : > { %v2915_v58 = vpop.f32.mrb[104].mxu0  ;;  %v5931_v40 = vpop.eup %5930  ;;  %4273 = vst [vmem:[%s8230_s21 + $0x18] sm:$0xff] %v5929_v7  ;;  %5950 = vtanh.f32 %v5328_v28  ;;  %v5329_v21 = vadd.f32 %v2401_v63, %v8186_v47  ;;  %3297 = vmatmul.mubr.f32.gmra.mrb[210].mxu1 %v9275_v38  ;;  %3786 = vmatmul.mubr.f32.gmra.mrb[210].mxu0 %v9275_v38 }
 0x411   : > { %v5393_v43 = vadd.f32 %v2915_v58, %v8190_v32  ;;  %v2403_v8 = vpop.f32.mrb[105].mxu1  ;;  %v2917_v62 = vpop.f32.mrb[105].mxu0  ;;  %4277 = vst [vmem:[%s8230_s21 + $0x38] sm:$0xff] %v5931_v40  ;;  %5952 = vtanh.f32 %v5392_v49  ;;  %3302 = vmatprep.mubr.f32.mxu1 %v9276_v30  ;;  %3790 = vmatprep.mubr.f32.mxu0 %v9276_v30 }
 0x412   : > { %v5933_v35 = vpop.eup %5932  ;;  %v5330_v24 = vadd.f32 %v2403_v8, %v8195_v11  ;;  %v5394_v29 = vadd.f32 %v2917_v62, %v8199_v14  ;;  %5954 = vtanh.f32 %v5329_v21  ;;  %v9277_v62 = vld [vmem:[#allocation86_spill] sm:$0xff] }
 0x413   : > { %v5935_v28 = vpop.eup %5934  ;;  %4279 = vst [vmem:[%s8230_s21 + $0x48] sm:$0xff] %v5933_v35  ;;  %5956 = vtanh.f32 %v5393_v43  ;;  %v2407_v25 = vpop.f32.mrb[106].mxu1  ;;  %v9278_v35 = vld [vmem:[#allocation88_spill] sm:$0xff] }
 0x414   : > { %v5937_v20 = vpop.eup %5936  ;;  %4278 = vst [vmem:[%s8230_s21 + $0x40] sm:$0xff] %v5935_v28  ;;  %v2921_v7 = vpop.f32.mrb[106].mxu0  ;;  %5958 = vtanh.f32 %v5330_v24  ;;  %v5331_v49 = vadd.f32 %v2407_v25, %v8186_v47  ;;  %3303 = vmatmul.mubr.f32.gmra.mrb[212].mxu1 %v9277_v62  ;;  %3791 = vmatmul.mubr.f32.gmra.mrb[212].mxu0 %v9277_v62 }
 0x415   : > { %v5939_v63 = vpop.eup %5938  ;;  %4280 = vst [vmem:[%s8230_s21 + $0x50] sm:$0xff] %v5937_v20  ;;  %v5395_v58 = vadd.f32 %v2921_v7, %v8190_v32  ;;  %v2409_v40 = vpop.f32.mrb[107].mxu1  ;;  %5960 = vtanh.f32 %v5394_v29  ;;  %3308 = vmatprep.mubr.f32.mxu1 %v9278_v35  ;;  %3795 = vmatprep.mubr.f32.mxu0 %v9278_v35 }
 0x416   : > { %v2923_v8 = vpop.f32.mrb[107].mxu0  ;;  %v5941_v21 = vpop.eup %5940  ;;  %4284 = vst [vmem:[%s8230_s21 + $0x70] sm:$0xff] %v5939_v63  ;;  %v5332_v43 = vadd.f32 %v2409_v40, %v8195_v11  ;;  %5962 = vtanh.f32 %v5331_v49 }
 0x417   : > { %v5396_v38 = vadd.f32 %v2923_v8, %v8199_v14  ;;  %v5943_v24 = vpop.eup %5942  ;;  %4286 = vst [vmem:[%s8230_s21 + $0x80] sm:$0xff] %v5941_v21  ;;  %5964 = vtanh.f32 %v5395_v58  ;;  %v2413_v28 = vpop.f32.mrb[108].mxu1  ;;  %v9279_v8 = vld [vmem:[#allocation90_spill] sm:$0xff]  ;;  %v9280_v21 = vld [vmem:[#allocation92_spill] sm:$0xff] }
 0x418   : > { %v5945_v30 = vpop.eup %5944  ;;  %4285 = vst [vmem:[%s8230_s21 + $0x78] sm:$0xff] %v5943_v24  ;;  %v2927_v20 = vpop.f32.mrb[108].mxu0  ;;  %5966 = vtanh.f32 %v5332_v43  ;;  %v5333_v29 = vadd.f32 %v2413_v28, %v8186_v47  ;;  %3309 = vmatmul.mubr.f32.gmra.mrb[214].mxu1 %v9279_v8  ;;  %3796 = vmatmul.mubr.f32.gmra.mrb[214].mxu0 %v9279_v8 }
 0x419   : > { %v5947_v25 = vpop.eup %5946  ;;  %4287 = vst [vmem:[%s8230_s21 + $0x88] sm:$0xff] %v5945_v30  ;;  %v5397_v7 = vadd.f32 %v2927_v20, %v8190_v32  ;;  %v2415_v63 = vpop.f32.mrb[109].mxu1  ;;  %5968 = vtanh.f32 %v5396_v38  ;;  %3314 = vmatprep.mubr.f32.mxu1 %v9280_v21  ;;  %3800 = vmatprep.mubr.f32.mxu0 %v9280_v21 }
 0x41a   : > { %v2929_v40 = vpop.f32.mrb[109].mxu0  ;;  %v5949_v49 = vpop.eup %5948  ;;  %4291 = vst [vmem:[%s8230_s21 + $0xa8] sm:$0xff] %v5947_v25  ;;  %v5334_v58 = vadd.f32 %v2415_v63, %v8195_v11  ;;  %5970 = vtanh.f32 %v5333_v29 }
 0x41b   : > { %v5398_v62 = vadd.f32 %v2929_v40, %v8199_v14  ;;  %v5951_v43 = vpop.eup %5950  ;;  %4293 = vst [vmem:[%s8230_s21 + $0xb8] sm:$0xff] %v5949_v49  ;;  %5972 = vtanh.f32 %v5397_v7  ;;  %v2419_v24 = vpop.f32.mrb[110].mxu1  ;;  %v9281_v40 = vld [vmem:[#allocation94_spill] sm:$0xff]  ;;  %v9282_v49 = vld [vmem:[#allocation96_spill] sm:$0xff] }
 0x41c   : > { %v5953_v35 = vpop.eup %5952  ;;  %4292 = vst [vmem:[%s8230_s21 + $0xb0] sm:$0xff] %v5951_v43  ;;  %v2933_v30 = vpop.f32.mrb[110].mxu0  ;;  %5974 = vtanh.f32 %v5334_v58  ;;  %v5335_v38 = vadd.f32 %v2419_v24, %v8186_v47  ;;  %3315 = vmatmul.mubr.f32.gmra.mrb[216].mxu1 %v9281_v40  ;;  %3801 = vmatmul.mubr.f32.gmra.mrb[216].mxu0 %v9281_v40 }
 0x41d   : > { %v5955_v28 = vpop.eup %5954  ;;  %4294 = vst [vmem:[%s8230_s21 + $0xc0] sm:$0xff] %v5953_v35  ;;  %v5399_v20 = vadd.f32 %v2933_v30, %v8190_v32  ;;  %v2421_v25 = vpop.f32.mrb[111].mxu1  ;;  %5976 = vtanh.f32 %v5398_v62  ;;  %3320 = vmatprep.mubr.f32.mxu1 %v9282_v49  ;;  %3805 = vmatprep.mubr.f32.mxu0 %v9282_v49 }
 0x41e   : > { %v2935_v63 = vpop.f32.mrb[111].mxu0  ;;  %v5957_v29 = vpop.eup %5956  ;;  %4298 = vst [vmem:[%s8230_s21 + $0xe0] sm:$0xff] %v5955_v28  ;;  %v5336_v7 = vadd.f32 %v2421_v25, %v8195_v11  ;;  %5978 = vtanh.f32 %v5335_v38 }
 0x41f   : > { %v5400_v8 = vadd.f32 %v2935_v63, %v8199_v14  ;;  %v5959_v58 = vpop.eup %5958  ;;  %4300 = vst [vmem:[%s8230_s21 + $0xf0] sm:$0xff] %v5957_v29  ;;  %5980 = vtanh.f32 %v5399_v20  ;;  %v2425_v43 = vpop.f32.mrb[112].mxu1  ;;  %v9283_v63 = vld [vmem:[#allocation98_spill] sm:$0xff]  ;;  %v9284_v29 = vld [vmem:[#allocation100_spill] sm:$0xff] }
 0x420   : > { %v5961_v21 = vpop.eup %5960  ;;  %4299 = vst [vmem:[%s8230_s21 + $0xe8] sm:$0xff] %v5959_v58  ;;  %v2939_v35 = vpop.f32.mrb[112].mxu0  ;;  %5982 = vtanh.f32 %v5336_v7  ;;  %v5337_v62 = vadd.f32 %v2425_v43, %v8186_v47  ;;  %3321 = vmatmul.mubr.f32.gmra.mrb[218].mxu1 %v9283_v63  ;;  %3806 = vmatmul.mubr.f32.gmra.mrb[218].mxu0 %v9283_v63 }
 0x421   : > { %v5963_v24 = vpop.eup %5962  ;;  %4301 = vst [vmem:[%s8230_s21 + $0xf8] sm:$0xff] %v5961_v21  ;;  %v5401_v30 = vadd.f32 %v2939_v35, %v8190_v32  ;;  %v2427_v28 = vpop.f32.mrb[113].mxu1  ;;  %5984 = vtanh.f32 %v5400_v8  ;;  %3326 = vmatprep.mubr.f32.mxu1 %v9284_v29  ;;  %3810 = vmatprep.mubr.f32.mxu0 %v9284_v29 }
 0x422   : > { %v2941_v25 = vpop.f32.mrb[113].mxu0  ;;  %v5965_v38 = vpop.eup %5964  ;;  %4305 = vst [vmem:[%s8230_s21 + $0x118] sm:$0xff] %v5963_v24  ;;  %v5338_v20 = vadd.f32 %v2427_v28, %v8195_v11  ;;  %5986 = vtanh.f32 %v5337_v62 }
 0x423   : > { %v5402_v40 = vadd.f32 %v2941_v25, %v8199_v14  ;;  %v5967_v7 = vpop.eup %5966  ;;  %4307 = vst [vmem:[%s8230_s21 + $0x128] sm:$0xff] %v5965_v38  ;;  %5988 = vtanh.f32 %v5401_v30  ;;  %v2431_v58 = vpop.f32.mrb[114].mxu1  ;;  %v9285_v25 = vld [vmem:[#allocation102_spill] sm:$0xff]  ;;  %v9286_v38 = vld [vmem:[#allocation104_spill] sm:$0xff] }
 0x424   : > { %v5969_v49 = vpop.eup %5968  ;;  %4306 = vst [vmem:[%s8230_s21 + $0x120] sm:$0xff] %v5967_v7  ;;  %v2945_v21 = vpop.f32.mrb[114].mxu0  ;;  %5990 = vtanh.f32 %v5338_v20  ;;  %v5339_v8 = vadd.f32 %v2431_v58, %v8186_v47  ;;  %3327 = vmatmul.mubr.f32.gmra.mrb[220].mxu1 %v9285_v25  ;;  %3811 = vmatmul.mubr.f32.gmra.mrb[220].mxu0 %v9285_v25 }
 0x425   : > { %v5971_v43 = vpop.eup %5970  ;;  %4308 = vst [vmem:[%s8230_s21 + $0x130] sm:$0xff] %v5969_v49  ;;  %v5403_v35 = vadd.f32 %v2945_v21, %v8190_v32  ;;  %v2433_v24 = vpop.f32.mrb[115].mxu1  ;;  %5992 = vtanh.f32 %v5402_v40  ;;  %3332 = vmatprep.mubr.f32.mxu1 %v9286_v38  ;;  %3815 = vmatprep.mubr.f32.mxu0 %v9286_v38 }
 0x426   : > { %v2947_v28 = vpop.f32.mrb[115].mxu0  ;;  %v5973_v62 = vpop.eup %5972  ;;  %4312 = vst [vmem:[%s8230_s21 + $0x150] sm:$0xff] %v5971_v43  ;;  %v5340_v30 = vadd.f32 %v2433_v24, %v8195_v11  ;;  %5994 = vtanh.f32 %v5339_v8 }
 0x427   : > { %v5404_v63 = vadd.f32 %v2947_v28, %v8199_v14  ;;  %v5975_v20 = vpop.eup %5974  ;;  %4314 = vst [vmem:[%s8230_s21 + $0x160] sm:$0xff] %v5973_v62  ;;  %5996 = vtanh.f32 %v5403_v35  ;;  %v2437_v7 = vpop.f32.mrb[116].mxu1  ;;  %v9287_v28 = vld [vmem:[#allocation105_spill] sm:$0xff]  ;;  %v9288_v62 = vld [vmem:[#allocation106_spill] sm:$0xff] }
 0x428   : > { %v5977_v29 = vpop.eup %5976  ;;  %4313 = vst [vmem:[%s8230_s21 + $0x158] sm:$0xff] %v5975_v20  ;;  %v2951_v49 = vpop.f32.mrb[116].mxu0  ;;  %5998 = vtanh.f32 %v5340_v30  ;;  %v5341_v40 = vadd.f32 %v2437_v7, %v8186_v47  ;;  %3333 = vmatmul.mubr.f32.gmra.mrb[222].mxu1 %v9287_v28  ;;  %3816 = vmatmul.mubr.f32.gmra.mrb[222].mxu0 %v9287_v28 }
 0x429   : > { %v5979_v58 = vpop.eup %5978  ;;  %4315 = vst [vmem:[%s8230_s21 + $0x168] sm:$0xff] %v5977_v29  ;;  %v5405_v21 = vadd.f32 %v2951_v49, %v8190_v32  ;;  %v2439_v43 = vpop.f32.mrb[117].mxu1  ;;  %6000 = vtanh.f32 %v5404_v63  ;;  %3403 = vmatprep.mubr.f32.mxu1 %v9288_v62  ;;  %3885 = vmatprep.mubr.f32.mxu0 %v9288_v62 }
 0x42a   : > { %v2953_v24 = vpop.f32.mrb[117].mxu0  ;;  %v5981_v8 = vpop.eup %5980  ;;  %4319 = vst [vmem:[%s8230_s21 + $0x188] sm:$0xff] %v5979_v58  ;;  %v5342_v35 = vadd.f32 %v2439_v43, %v8195_v11  ;;  %6002 = vtanh.f32 %v5341_v40 }
 0x42b   : > { %v5406_v25 = vadd.f32 %v2953_v24, %v8199_v14  ;;  %v5983_v30 = vpop.eup %5982  ;;  %4321 = vst [vmem:[%s8230_s21 + $0x198] sm:$0xff] %v5981_v8  ;;  %6004 = vtanh.f32 %v5405_v21  ;;  %v2443_v20 = vpop.f32.mrb[118].mxu1  ;;  %v9289_v24 = vld [vmem:[#allocation107_spill] sm:$0xff] }
 0x42c   : > { %v5985_v38 = vpop.eup %5984  ;;  %4320 = vst [vmem:[%s8230_s21 + $0x190] sm:$0xff] %v5983_v30  ;;  %v2957_v29 = vpop.f32.mrb[118].mxu0  ;;  %6006 = vtanh.f32 %v5342_v35  ;;  %v5343_v63 = vadd.f32 %v2443_v20, %v8186_v47  ;;  %3404 = vmatmul.mubr.f32.vlgmr.msra.gmra.mrb[160].mxu1 %v9289_v24  ;;  %3886 = vmatmul.mubr.f32.vlgmr.msra.gmra.mrb[160].mxu0 %v9289_v24 }
 0x42d   : > { %v5987_v7 = vpop.eup %5986  ;;  %4322 = vst [vmem:[%s8230_s21 + $0x1a0] sm:$0xff] %v5985_v38  ;;  %v5407_v49 = vadd.f32 %v2957_v29, %v8190_v32  ;;  %v2445_v58 = vpop.f32.mrb[119].mxu1  ;;  %6008 = vtanh.f32 %v5406_v25  ;;  %3409 = vmatprep.mubr.f32.mxu1 %v7700_v16  ;;  %3890 = vmatprep.mubr.f32.mxu0 %v7700_v16 }
 0x42e   : > { %v2959_v43 = vpop.f32.mrb[119].mxu0  ;;  %v5989_v40 = vpop.eup %5988  ;;  %4326 = vst [vmem:[%s8230_s21 + $0x1c0] sm:$0xff] %v5987_v7  ;;  %v5344_v21 = vadd.f32 %v2445_v58, %v8195_v11  ;;  %6010 = vtanh.f32 %v5343_v63  ;;  %v9290_v58 = vld [vmem:[#allocation108_spill] sm:$0xff] }
 0x42f   : > { %v5408_v28 = vadd.f32 %v2959_v43, %v8199_v14  ;;  %v5991_v8 = vpop.eup %5990  ;;  %4328 = vst [vmem:[%s8230_s21 + $0x1d0] sm:$0xff] %v5989_v40  ;;  %6012 = vtanh.f32 %v5407_v49  ;;  %v2449_v62 = vpop.f32.mrb[120].mxu1 }
 0x430   : > { %v5993_v35 = vpop.eup %5992  ;;  %4327 = vst [vmem:[%s8230_s21 + $0x1c8] sm:$0xff] %v5991_v8  ;;  %v2963_v30 = vpop.f32.mrb[120].mxu0  ;;  %6014 = vtanh.f32 %v5344_v21  ;;  %v5345_v25 = vadd.f32 %v2449_v62, %v8186_v47  ;;  %3410 = vmatmul.mubr.f32.gmra.mrb[162].mxu1 %v7707_v31  ;;  %3891 = vmatmul.mubr.f32.gmra.mrb[162].mxu0 %v7707_v31 }
 0x431   : > { %v5995_v38 = vpop.eup %5994  ;;  %4329 = vst [vmem:[%s8230_s21 + $0x1d8] sm:$0xff] %v5993_v35  ;;  %v5409_v20 = vadd.f32 %v2963_v30, %v8190_v32  ;;  %v2451_v29 = vpop.f32.mrb[121].mxu1  ;;  %6016 = vtanh.f32 %v5408_v28  ;;  %3415 = vmatprep.mubr.f32.mxu1 %v9290_v58  ;;  %3895 = vmatprep.mubr.f32.mxu0 %v9290_v58 }
 0x432   : > { %v2965_v16 = vpop.f32.mrb[121].mxu0  ;;  %v5997_v7 = vpop.eup %5996  ;;  %4333 = vst [vmem:[%s8230_s21 + $0x1f8] sm:$0xff] %v5995_v38  ;;  %v5346_v63 = vadd.f32 %v2451_v29, %v8195_v11  ;;  %6018 = vtanh.f32 %v5345_v25 }
 0x433   : > { %v5410_v49 = vadd.f32 %v2965_v16, %v8199_v14  ;;  %v5999_v43 = vpop.eup %5998  ;;  %4335 = vst [vmem:[%s8230_s21 + $0x208] sm:$0xff] %v5997_v7  ;;  %6020 = vtanh.f32 %v5409_v20  ;;  %v2455_v31 = vpop.f32.mrb[122].mxu1 }
 0x434   : > { %v6001_v24 = vpop.eup %6000  ;;  %4334 = vst [vmem:[%s8230_s21 + $0x200] sm:$0xff] %v5999_v43  ;;  %v2969_v40 = vpop.f32.mrb[122].mxu0  ;;  %6022 = vtanh.f32 %v5346_v63  ;;  %v5347_v28 = vadd.f32 %v2455_v31, %v8186_v47  ;;  %3416 = vmatmul.mubr.f32.gmra.mrb[164].mxu1 %v7721_v27  ;;  %3896 = vmatmul.mubr.f32.gmra.mrb[164].mxu0 %v7721_v27 }
 0x435   : > { %v6003_v21 = vpop.eup %6002  ;;  %4336 = vst [vmem:[%s8230_s21 + $0x210] sm:$0xff] %v6001_v24  ;;  %v5411_v8 = vadd.f32 %v2969_v40, %v8190_v32  ;;  %v2457_v35 = vpop.f32.mrb[123].mxu1  ;;  %6024 = vtanh.f32 %v5410_v49  ;;  %3421 = vmatprep.mubr.f32.mxu1 %v7725_v33  ;;  %3900 = vmatprep.mubr.f32.mxu0 %v7725_v33 }
 0x436   : > { %v2971_v62 = vpop.f32.mrb[123].mxu0  ;;  %v6005_v30 = vpop.eup %6004  ;;  %4340 = vst [vmem:[%s8230_s21 + $0x230] sm:$0xff] %v6003_v21  ;;  %v5348_v38 = vadd.f32 %v2457_v35, %v8195_v11  ;;  %6026 = vtanh.f32 %v5347_v28 }
 0x437   : > { %v5412_v25 = vadd.f32 %v2971_v62, %v8199_v14  ;;  %v6007_v20 = vpop.eup %6006  ;;  %4342 = vst [vmem:[%s8230_s21 + $0x240] sm:$0xff] %v6005_v30  ;;  %6028 = vtanh.f32 %v5411_v8  ;;  %v2461_v27 = vpop.f32.mrb[124].mxu1 }
 0x438   : > { %v6009_v29 = vpop.eup %6008  ;;  %4341 = vst [vmem:[%s8230_s21 + $0x238] sm:$0xff] %v6007_v20  ;;  %v2975_v16 = vpop.f32.mrb[124].mxu0  ;;  %6030 = vtanh.f32 %v5348_v38  ;;  %v5349_v63 = vadd.f32 %v2461_v27, %v8186_v47  ;;  %3422 = vmatmul.mubr.f32.gmra.mrb[166].mxu1 %v7734_v5  ;;  %3901 = vmatmul.mubr.f32.gmra.mrb[166].mxu0 %v7734_v5 }
 0x439   : > { %v6011_v7 = vpop.eup %6010  ;;  %4343 = vst [vmem:[%s8230_s21 + $0x248] sm:$0xff] %v6009_v29  ;;  %v5413_v49 = vadd.f32 %v2975_v16, %v8190_v32  ;;  %v2463_v58 = vpop.f32.mrb[125].mxu1  ;;  %6032 = vtanh.f32 %v5412_v25  ;;  %3427 = vmatprep.mubr.f32.mxu1 %v7738_v57  ;;  %3905 = vmatprep.mubr.f32.mxu0 %v7738_v57 }
 0x43a   : > { %v2977_v33 = vpop.f32.mrb[125].mxu0  ;;  %v6013_v43 = vpop.eup %6012  ;;  %4347 = vst [vmem:[%s8230_s21 + $0x268] sm:$0xff] %v6011_v7  ;;  %v5350_v24 = vadd.f32 %v2463_v58, %v8195_v11  ;;  %6034 = vtanh.f32 %v5349_v63 }
 0x43b   : > { %v5414_v31 = vadd.f32 %v2977_v33, %v8199_v14  ;;  %v6015_v40 = vpop.eup %6014  ;;  %4349 = vst [vmem:[%s8230_s21 + $0x278] sm:$0xff] %v6013_v43  ;;  %6036 = vtanh.f32 %v5413_v49  ;;  %v2467_v5 = vpop.f32.mrb[126].mxu1 }
 0x43c   : > { %v6017_v21 = vpop.eup %6016  ;;  %4348 = vst [vmem:[%s8230_s21 + $0x270] sm:$0xff] %v6015_v40  ;;  %v2981_v28 = vpop.f32.mrb[126].mxu0  ;;  %6038 = vtanh.f32 %v5350_v24  ;;  %v5351_v35 = vadd.f32 %v2467_v5, %v8186_v47  ;;  %3428 = vmatmul.mubr.f32.gmra.mrb[168].mxu1 %v7747_v54  ;;  %3906 = vmatmul.mubr.f32.gmra.mrb[168].mxu0 %v7747_v54 }
 0x43d   : > { %v6019_v8 = vpop.eup %6018  ;;  %4350 = vst [vmem:[%s8230_s21 + $0x280] sm:$0xff] %v6017_v21  ;;  %v5415_v62 = vadd.f32 %v2981_v28, %v8190_v32  ;;  %v2469_v30 = vpop.f32.mrb[127].mxu1  ;;  %6040 = vtanh.f32 %v5414_v31  ;;  %3433 = vmatprep.mubr.f32.mxu1 %v7751_v56  ;;  %3910 = vmatprep.mubr.f32.mxu0 %v7751_v56 }
 0x43e   : > { %v2983_v57 = vpop.f32.mrb[127].mxu0  ;;  %v6021_v38 = vpop.eup %6020  ;;  %4354 = vst [vmem:[%s8230_s21 + $0x2a0] sm:$0xff] %v6019_v8  ;;  %v5352_v25 = vadd.f32 %v2469_v30, %v8195_v11  ;;  %6042 = vtanh.f32 %v5351_v35 }
 0x43f   : > { %v5416_v20 = vadd.f32 %v2983_v57, %v8199_v14  ;;  %v6023_v29 = vpop.eup %6022  ;;  %4356 = vst [vmem:[%s8230_s21 + $0x2b0] sm:$0xff] %v6021_v38  ;;  %6044 = vtanh.f32 %v5415_v62  ;;  %v2473_v54 = vpop.f32.mrb[128].mxu1 }
 0x440   : > { %v6025_v27 = vpop.eup %6024  ;;  %4355 = vst [vmem:[%s8230_s21 + $0x2a8] sm:$0xff] %v6023_v29  ;;  %v2987_v16 = vpop.f32.mrb[128].mxu0  ;;  %6046 = vtanh.f32 %v5352_v25  ;;  %v5353_v63 = vadd.f32 %v2473_v54, %v8186_v47  ;;  %3434 = vmatmul.mubr.f32.gmra.mrb[170].mxu1 %v7760_v59  ;;  %3911 = vmatmul.mubr.f32.gmra.mrb[170].mxu0 %v7760_v59 }
 0x441   : > { %v6027_v7 = vpop.eup %6026  ;;  %4357 = vst [vmem:[%s8230_s21 + $0x2b8] sm:$0xff] %v6025_v27  ;;  %v5417_v49 = vadd.f32 %v2987_v16, %v8190_v32  ;;  %v2475_v58 = vpop.f32.mrb[129].mxu1  ;;  %6048 = vtanh.f32 %v5416_v20  ;;  %3439 = vmatprep.mubr.f32.mxu1 %v7764_v36  ;;  %3915 = vmatprep.mubr.f32.mxu0 %v7764_v36 }
 0x442   : > { %v2989_v56 = vpop.f32.mrb[129].mxu0  ;;  %v6029_v33 = vpop.eup %6028  ;;  %4361 = vst [vmem:[%s8230_s21 + $0x2d8] sm:$0xff] %v6027_v7  ;;  %v5354_v43 = vadd.f32 %v2475_v58, %v8195_v11  ;;  %6050 = vtanh.f32 %v5353_v63 }
 0x443   : > { %v5418_v24 = vadd.f32 %v2989_v56, %v8199_v14  ;;  %v6031_v31 = vpop.eup %6030  ;;  %4363 = vst [vmem:[%s8230_s21 + $0x2e8] sm:$0xff] %v6029_v33  ;;  %6052 = vtanh.f32 %v5417_v49  ;;  %v2479_v59 = vpop.f32.mrb[130].mxu1 }
 0x444   : > { %v6033_v40 = vpop.eup %6032  ;;  %4362 = vst [vmem:[%s8230_s21 + $0x2e0] sm:$0xff] %v6031_v31  ;;  %v2993_v21 = vpop.f32.mrb[130].mxu0  ;;  %6054 = vtanh.f32 %v5354_v43  ;;  %v5355_v28 = vadd.f32 %v2479_v59, %v8186_v47  ;;  %3440 = vmatmul.mubr.f32.gmra.mrb[172].mxu1 %v7773_v52  ;;  %3916 = vmatmul.mubr.f32.gmra.mrb[172].mxu0 %v7773_v52 }
 0x445   : > { %v6035_v5 = vpop.eup %6034  ;;  %4364 = vst [vmem:[%s8230_s21 + $0x2f0] sm:$0xff] %v6033_v40  ;;  %v5419_v8 = vadd.f32 %v2993_v21, %v8190_v32  ;;  %v2481_v35 = vpop.f32.mrb[131].mxu1  ;;  %6056 = vtanh.f32 %v5418_v24  ;;  %3445 = vmatprep.mubr.f32.mxu1 %v7777_v1  ;;  %3920 = vmatprep.mubr.f32.mxu0 %v7777_v1 }
 0x446   : > { %v2995_v36 = vpop.f32.mrb[131].mxu0  ;;  %v6037_v62 = vpop.eup %6036  ;;  %4368 = vst [vmem:[%s8230_s21 + $0x310] sm:$0xff] %v6035_v5  ;;  %v5356_v30 = vadd.f32 %v2481_v35, %v8195_v11  ;;  %6058 = vtanh.f32 %v5355_v28 }
 0x447   : > { %v5420_v57 = vadd.f32 %v2995_v36, %v8199_v14  ;;  %v6039_v38 = vpop.eup %6038  ;;  %4370 = vst [vmem:[%s8230_s21 + $0x320] sm:$0xff] %v6037_v62  ;;  %6060 = vtanh.f32 %v5419_v8  ;;  %v2485_v52 = vpop.f32.mrb[132].mxu1 }
 0x448   : > { %v6041_v25 = vpop.eup %6040  ;;  %4369 = vst [vmem:[%s8230_s21 + $0x318] sm:$0xff] %v6039_v38  ;;  %v2999_v20 = vpop.f32.mrb[132].mxu0  ;;  %6062 = vtanh.f32 %v5356_v30  ;;  %v5357_v27 = vadd.f32 %v2485_v52, %v8186_v47  ;;  %3446 = vmatmul.mubr.f32.gmra.mrb[174].mxu1 %v7786_v19  ;;  %3921 = vmatmul.mubr.f32.gmra.mrb[174].mxu0 %v7786_v19 }
 0x449   : > { %v6043_v29 = vpop.eup %6042  ;;  %4371 = vst [vmem:[%s8230_s21 + $0x328] sm:$0xff] %v6041_v25  ;;  %v5421_v54 = vadd.f32 %v2999_v20, %v8190_v32  ;;  %v2487_v16 = vpop.f32.mrb[133].mxu1  ;;  %6064 = vtanh.f32 %v5420_v57  ;;  %3451 = vmatprep.mubr.f32.mxu1 %v7790_v46  ;;  %3925 = vmatprep.mubr.f32.mxu0 %v7790_v46 }
 0x44a   : > { %v3001_v1 = vpop.f32.mrb[133].mxu0  ;;  %v6045_v7 = vpop.eup %6044  ;;  %4375 = vst [vmem:[%s8230_s21 + $0x348] sm:$0xff] %v6043_v29  ;;  %v5358_v63 = vadd.f32 %v2487_v16, %v8195_v11  ;;  %6066 = vtanh.f32 %v5357_v27 }
 0x44b   : > { %v5422_v49 = vadd.f32 %v3001_v1, %v8199_v14  ;;  %v6047_v58 = vpop.eup %6046  ;;  %4377 = vst [vmem:[%s8230_s21 + $0x358] sm:$0xff] %v6045_v7  ;;  %6068 = vtanh.f32 %v5421_v54  ;;  %v2491_v19 = vpop.f32.mrb[134].mxu1 }
 0x44c   : > { %v6049_v56 = vpop.eup %6048  ;;  %4376 = vst [vmem:[%s8230_s21 + $0x350] sm:$0xff] %v6047_v58  ;;  %v3005_v33 = vpop.f32.mrb[134].mxu0  ;;  %6070 = vtanh.f32 %v5358_v63  ;;  %v5359_v24 = vadd.f32 %v2491_v19, %v8186_v47  ;;  %3452 = vmatmul.mubr.f32.gmra.mrb[176].mxu1 %v7799_v6  ;;  %3926 = vmatmul.mubr.f32.gmra.mrb[176].mxu0 %v7799_v6 }
 0x44d   : > { %v6051_v43 = vpop.eup %6050  ;;  %4378 = vst [vmem:[%s8230_s21 + $0x360] sm:$0xff] %v6049_v56  ;;  %v5423_v31 = vadd.f32 %v3005_v33, %v8190_v32  ;;  %v2493_v40 = vpop.f32.mrb[135].mxu1  ;;  %6072 = vtanh.f32 %v5422_v49  ;;  %3457 = vmatprep.mubr.f32.mxu1 %v7803_v55  ;;  %3930 = vmatprep.mubr.f32.mxu0 %v7803_v55 }
 0x44e   : > { %v3007_v46 = vpop.f32.mrb[135].mxu0  ;;  %v6053_v59 = vpop.eup %6052  ;;  %4382 = vst [vmem:[%s8230_s21 + $0x380] sm:$0xff] %v6051_v43  ;;  %v5360_v21 = vadd.f32 %v2493_v40, %v8195_v11  ;;  %6074 = vtanh.f32 %v5359_v24 }
 0x44f   : > { %v5424_v5 = vadd.f32 %v3007_v46, %v8199_v14  ;;  %v6055_v28 = vpop.eup %6054  ;;  %4384 = vst [vmem:[%s8230_s21 + $0x390] sm:$0xff] %v6053_v59  ;;  %6076 = vtanh.f32 %v5423_v31  ;;  %v2497_v6 = vpop.f32.mrb[136].mxu1 }
 0x450   : > { %v6057_v8 = vpop.eup %6056  ;;  %4383 = vst [vmem:[%s8230_s21 + $0x388] sm:$0xff] %v6055_v28  ;;  %v3011_v35 = vpop.f32.mrb[136].mxu0  ;;  %6078 = vtanh.f32 %v5360_v21  ;;  %v5361_v62 = vadd.f32 %v2497_v6, %v8186_v47  ;;  %3458 = vmatmul.mubr.f32.gmra.mrb[178].mxu1 %v7812_v22  ;;  %3931 = vmatmul.mubr.f32.gmra.mrb[178].mxu0 %v7812_v22 }
 0x451   : > { %v6059_v36 = vpop.eup %6058  ;;  %4385 = vst [vmem:[%s8230_s21 + $0x398] sm:$0xff] %v6057_v8  ;;  %v5425_v30 = vadd.f32 %v3011_v35, %v8190_v32  ;;  %v2499_v57 = vpop.f32.mrb[137].mxu1  ;;  %6080 = vtanh.f32 %v5424_v5  ;;  %3463 = vmatprep.mubr.f32.mxu1 %v7816_v17  ;;  %3935 = vmatprep.mubr.f32.mxu0 %v7816_v17 }
 0x452   : > { %v3013_v55 = vpop.f32.mrb[137].mxu0  ;;  %v6061_v38 = vpop.eup %6060  ;;  %4389 = vst [vmem:[%s8230_s21 + $0x3b8] sm:$0xff] %v6059_v36  ;;  %v5362_v25 = vadd.f32 %v2499_v57, %v8195_v11  ;;  %6082 = vtanh.f32 %v5361_v62 }
 0x453   : > { %v5426_v52 = vadd.f32 %v3013_v55, %v8199_v14  ;;  %v6063_v20 = vpop.eup %6062  ;;  %4391 = vst [vmem:[%s8230_s21 + $0x3c8] sm:$0xff] %v6061_v38  ;;  %6084 = vtanh.f32 %v5425_v30  ;;  %v2503_v22 = vpop.f32.mrb[138].mxu1 }
 0x454   : > { %v6065_v29 = vpop.eup %6064  ;;  %4390 = vst [vmem:[%s8230_s21 + $0x3c0] sm:$0xff] %v6063_v20  ;;  %v3017_v27 = vpop.f32.mrb[138].mxu0  ;;  %6086 = vtanh.f32 %v5362_v25  ;;  %v5363_v16 = vadd.f32 %v2503_v22, %v8186_v47  ;;  %3464 = vmatmul.mubr.f32.gmra.mrb[180].mxu1 %v7825_v37  ;;  %3936 = vmatmul.mubr.f32.gmra.mrb[180].mxu0 %v7825_v37 }
 0x455   : > { %v6067_v54 = vpop.eup %6066  ;;  %4392 = vst [vmem:[%s8230_s21 + $0x3d0] sm:$0xff] %v6065_v29  ;;  %v5427_v1 = vadd.f32 %v3017_v27, %v8190_v32  ;;  %v2505_v7 = vpop.f32.mrb[139].mxu1  ;;  %6088 = vtanh.f32 %v5426_v52  ;;  %3469 = vmatprep.mubr.f32.mxu1 %v7829_v42  ;;  %3940 = vmatprep.mubr.f32.mxu0 %v7829_v42 }
 0x456   : > { %v3019_v17 = vpop.f32.mrb[139].mxu0  ;;  %v6069_v63 = vpop.eup %6068  ;;  %4396 = vst [vmem:[%s8230_s21 + $0x3f0] sm:$0xff] %v6067_v54  ;;  %v5364_v49 = vadd.f32 %v2505_v7, %v8195_v11  ;;  %6090 = vtanh.f32 %v5363_v16 }
 0x457   : > { %v5428_v58 = vadd.f32 %v3019_v17, %v8199_v14  ;;  %v6071_v56 = vpop.eup %6070  ;;  %4398 = vst [vmem:[%s8230_s21 + $0x400] sm:$0xff] %v6069_v63  ;;  %6092 = vtanh.f32 %v5427_v1  ;;  %v2509_v37 = vpop.f32.mrb[140].mxu1 }
 0x458   : > { %v6073_v19 = vpop.eup %6072  ;;  %4397 = vst [vmem:[%s8230_s21 + $0x3f8] sm:$0xff] %v6071_v56  ;;  %v3023_v33 = vpop.f32.mrb[140].mxu0  ;;  %6094 = vtanh.f32 %v5364_v49  ;;  %v5365_v24 = vadd.f32 %v2509_v37, %v8186_v47  ;;  %3470 = vmatmul.mubr.f32.gmra.mrb[182].mxu1 %v7838_v12  ;;  %3941 = vmatmul.mubr.f32.gmra.mrb[182].mxu0 %v7838_v12 }
 0x459   : > { %v6075_v43 = vpop.eup %6074  ;;  %4399 = vst [vmem:[%s8230_s21 + $0x408] sm:$0xff] %v6073_v19  ;;  %v5429_v31 = vadd.f32 %v3023_v33, %v8190_v32  ;;  %v2511_v40 = vpop.f32.mrb[141].mxu1  ;;  %6096 = vtanh.f32 %v5428_v58  ;;  %3475 = vmatprep.mubr.f32.mxu1 %v7842_v60  ;;  %3945 = vmatprep.mubr.f32.mxu0 %v7842_v60 }
 0x45a   : > { %v3025_v42 = vpop.f32.mrb[141].mxu0  ;;  %v6077_v46 = vpop.eup %6076  ;;  %4403 = vst [vmem:[%s8230_s21 + $0x428] sm:$0xff] %v6075_v43  ;;  %v5366_v59 = vadd.f32 %v2511_v40, %v8195_v11  ;;  %6098 = vtanh.f32 %v5365_v24 }
 0x45b   : > { %v5430_v21 = vadd.f32 %v3025_v42, %v8199_v14  ;;  %v6079_v5 = vpop.eup %6078  ;;  %4405 = vst [vmem:[%s8230_s21 + $0x438] sm:$0xff] %v6077_v46  ;;  %6100 = vtanh.f32 %v5429_v31  ;;  %v2515_v12 = vpop.f32.mrb[142].mxu1 }
 0x45c   : > { %v6081_v28 = vpop.eup %6080  ;;  %4404 = vst [vmem:[%s8230_s21 + $0x430] sm:$0xff] %v6079_v5  ;;  %v3029_v8 = vpop.f32.mrb[142].mxu0  ;;  %6102 = vtanh.f32 %v5366_v59  ;;  %v5367_v35 = vadd.f32 %v2515_v12, %v8186_v47  ;;  %3476 = vmatmul.mubr.f32.gmra.mrb[184].mxu1 %v7851_v18  ;;  %3946 = vmatmul.mubr.f32.gmra.mrb[184].mxu0 %v7851_v18 }
 0x45d   : > { %v6083_v6 = vpop.eup %6082  ;;  %4406 = vst [vmem:[%s8230_s21 + $0x440] sm:$0xff] %v6081_v28  ;;  %v5431_v36 = vadd.f32 %v3029_v8, %v8190_v32  ;;  %v2517_v62 = vpop.f32.mrb[143].mxu1  ;;  %6104 = vtanh.f32 %v5430_v21  ;;  %3481 = vmatprep.mubr.f32.mxu1 %v7855_v3  ;;  %3950 = vmatprep.mubr.f32.mxu0 %v7855_v3 }
 0x45e   : > { %v3031_v60 = vpop.f32.mrb[143].mxu0  ;;  %v6085_v30 = vpop.eup %6084  ;;  %4410 = vst [vmem:[%s8230_s21 + $0x460] sm:$0xff] %v6083_v6  ;;  %v5368_v57 = vadd.f32 %v2517_v62, %v8195_v11  ;;  %6106 = vtanh.f32 %v5367_v35 }
 0x45f   : > { %v5432_v55 = vadd.f32 %v3031_v60, %v8199_v14  ;;  %v6087_v38 = vpop.eup %6086  ;;  %4412 = vst [vmem:[%s8230_s21 + $0x470] sm:$0xff] %v6085_v30  ;;  %6108 = vtanh.f32 %v5431_v36  ;;  %v2521_v18 = vpop.f32.mrb[144].mxu1 }
 0x460   : > { %v6089_v25 = vpop.eup %6088  ;;  %4411 = vst [vmem:[%s8230_s21 + $0x468] sm:$0xff] %v6087_v38  ;;  %v3035_v52 = vpop.f32.mrb[144].mxu0  ;;  %6110 = vtanh.f32 %v5368_v57  ;;  %v5369_v29 = vadd.f32 %v2521_v18, %v8186_v47  ;;  %3482 = vmatmul.mubr.f32.gmra.mrb[186].mxu1 %v7864_v45  ;;  %3951 = vmatmul.mubr.f32.gmra.mrb[186].mxu0 %v7864_v45 }
 0x461   : > { %v6091_v20 = vpop.eup %6090  ;;  %4413 = vst [vmem:[%s8230_s21 + $0x478] sm:$0xff] %v6089_v25  ;;  %v5433_v22 = vadd.f32 %v3035_v52, %v8190_v32  ;;  %v2523_v27 = vpop.f32.mrb[145].mxu1  ;;  %6112 = vtanh.f32 %v5432_v55  ;;  %3487 = vmatprep.mubr.f32.mxu1 %v7868_v53  ;;  %3955 = vmatprep.mubr.f32.mxu0 %v7868_v53 }
 0x462   : > { %v3037_v3 = vpop.f32.mrb[145].mxu0  ;;  %v6093_v54 = vpop.eup %6092  ;;  %4417 = vst [vmem:[%s8230_s21 + $0x498] sm:$0xff] %v6091_v20  ;;  %v5370_v16 = vadd.f32 %v2523_v27, %v8195_v11  ;;  %6114 = vtanh.f32 %v5369_v29 }
 0x463   : > { %v5434_v1 = vadd.f32 %v3037_v3, %v8199_v14  ;;  %v6095_v7 = vpop.eup %6094  ;;  %4419 = vst [vmem:[%s8230_s21 + $0x4a8] sm:$0xff] %v6093_v54  ;;  %6116 = vtanh.f32 %v5433_v22  ;;  %v2527_v45 = vpop.f32.mrb[146].mxu1 }
 0x464   : > { %v6097_v17 = vpop.eup %6096  ;;  %4418 = vst [vmem:[%s8230_s21 + $0x4a0] sm:$0xff] %v6095_v7  ;;  %v3041_v63 = vpop.f32.mrb[146].mxu0  ;;  %6118 = vtanh.f32 %v5370_v16  ;;  %v5371_v58 = vadd.f32 %v2527_v45, %v8186_v47  ;;  %3488 = vmatmul.mubr.f32.gmra.mrb[188].mxu1 %v7877_v51  ;;  %3956 = vmatmul.mubr.f32.gmra.mrb[188].mxu0 %v7877_v51 }
 0x465   : > { %v6099_v49 = vpop.eup %6098  ;;  %4420 = vst [vmem:[%s8230_s21 + $0x4b0] sm:$0xff] %v6097_v17  ;;  %v5435_v56 = vadd.f32 %v3041_v63, %v8190_v32  ;;  %v2529_v19 = vpop.f32.mrb[147].mxu1  ;;  %6120 = vtanh.f32 %v5434_v1  ;;  %3493 = vmatprep.mubr.f32.mxu1 %v7881_v23  ;;  %3960 = vmatprep.mubr.f32.mxu0 %v7881_v23 }
 0x466   : > { %v3043_v53 = vpop.f32.mrb[147].mxu0  ;;  %v6101_v37 = vpop.eup %6100  ;;  %4424 = vst [vmem:[%s8230_s21 + $0x4d0] sm:$0xff] %v6099_v49  ;;  %v5372_v33 = vadd.f32 %v2529_v19, %v8195_v11  ;;  %6122 = vtanh.f32 %v5371_v58 }
 0x467   : > { %v5436_v43 = vadd.f32 %v3043_v53, %v8199_v14  ;;  %v6103_v24 = vpop.eup %6102  ;;  %4426 = vst [vmem:[%s8230_s21 + $0x4e0] sm:$0xff] %v6101_v37  ;;  %6124 = vtanh.f32 %v5435_v56  ;;  %v2533_v51 = vpop.f32.mrb[148].mxu1 }
 0x468   : > { %v6105_v31 = vpop.eup %6104  ;;  %4425 = vst [vmem:[%s8230_s21 + $0x4d8] sm:$0xff] %v6103_v24  ;;  %v3047_v40 = vpop.f32.mrb[148].mxu0  ;;  %6126 = vtanh.f32 %v5372_v33  ;;  %v5373_v46 = vadd.f32 %v2533_v51, %v8186_v47  ;;  %3494 = vmatmul.mubr.f32.gmra.mrb[190].mxu1 %v7890_v34  ;;  %3961 = vmatmul.mubr.f32.gmra.mrb[190].mxu0 %v7890_v34 }
 0x469   : > { %v6107_v42 = vpop.eup %6106  ;;  %4427 = vst [vmem:[%s8230_s21 + $0x4e8] sm:$0xff] %v6105_v31  ;;  %v5437_v59 = vadd.f32 %v3047_v40, %v8190_v32  ;;  %v2535_v21 = vpop.f32.mrb[149].mxu1  ;;  %6128 = vtanh.f32 %v5436_v43  ;;  %3499 = vmatprep.mubr.f32.mxu1 %v7894_v2  ;;  %3965 = vmatprep.mubr.f32.mxu0 %v7894_v2 }
 0x46a   : > { %v3049_v23 = vpop.f32.mrb[149].mxu0  ;;  %v6109_v5 = vpop.eup %6108  ;;  %4431 = vst [vmem:[%s8230_s21 + $0x508] sm:$0xff] %v6107_v42  ;;  %v5374_v28 = vadd.f32 %v2535_v21, %v8195_v11  ;;  %6130 = vtanh.f32 %v5373_v46 }
 0x46b   : > { %v5438_v12 = vadd.f32 %v3049_v23, %v8199_v14  ;;  %v6111_v8 = vpop.eup %6110  ;;  %4433 = vst [vmem:[%s8230_s21 + $0x518] sm:$0xff] %v6109_v5  ;;  %6132 = vtanh.f32 %v5437_v59  ;;  %v2539_v34 = vpop.f32.mrb[150].mxu1 }
 0x46c   : > { %v6113_v6 = vpop.eup %6112  ;;  %4432 = vst [vmem:[%s8230_s21 + $0x510] sm:$0xff] %v6111_v8  ;;  %v3053_v35 = vpop.f32.mrb[150].mxu0  ;;  %6134 = vtanh.f32 %v5374_v28  ;;  %v5375_v62 = vadd.f32 %v2539_v34, %v8186_v47  ;;  %3500 = vmatmul.mubr.f32.gmra.mrb[192].mxu1 %v7903_v0  ;;  %3966 = vmatmul.mubr.f32.gmra.mrb[192].mxu0 %v7903_v0 }
 0x46d   : > { %v6115_v36 = vpop.eup %6114  ;;  %4434 = vst [vmem:[%s8230_s21 + $0x520] sm:$0xff] %v6113_v6  ;;  %v5439_v60 = vadd.f32 %v3053_v35, %v8190_v32  ;;  %v2541_v30 = vpop.f32.mrb[151].mxu1  ;;  %6136 = vtanh.f32 %v5438_v12  ;;  %3505 = vmatprep.mubr.f32.mxu1 %v7907_v41  ;;  %3970 = vmatprep.mubr.f32.mxu0 %v7907_v41 }
 0x46e   : > { %v3055_v2 = vpop.f32.mrb[151].mxu0  ;;  %v6117_v57 = vpop.eup %6116  ;;  %4438 = vst [vmem:[%s8230_s21 + $0x540] sm:$0xff] %v6115_v36  ;;  %v5376_v55 = vadd.f32 %v2541_v30, %v8195_v11  ;;  %6138 = vtanh.f32 %v5375_v62  ;;  %v9292_v30 = vld [vmem:[#allocation71_spill] sm:$0xff] }
 0x46f   : > { %v5440_v38 = vadd.f32 %v3055_v2, %v8199_v14  ;;  %v6119_v25 = vpop.eup %6118  ;;  %4440 = vst [vmem:[%s8230_s21 + $0x550] sm:$0xff] %v6117_v57  ;;  %6140 = vtanh.f32 %v5439_v60  ;;  %v2545_v0 = vpop.f32.mrb[152].mxu1  ;;  %v9291_v60 = vld [vmem:[#allocation66_spill] sm:$0xff] }
 0x470   : > { %v6121_v18 = vpop.eup %6120  ;;  %4439 = vst [vmem:[%s8230_s21 + $0x548] sm:$0xff] %v6119_v25  ;;  %v3059_v52 = vpop.f32.mrb[152].mxu0  ;;  %6142 = vtanh.f32 %v5376_v55  ;;  %v5377_v29 = vadd.f32 %v2545_v0, %v8186_v47  ;;  %3506 = vmatmul.mubr.f32.gmra.mrb[194].mxu1 %v7916_v15  ;;  %3971 = vmatmul.mubr.f32.gmra.mrb[194].mxu0 %v7916_v15  ;;  %v9293_v55 = vld [vmem:[#allocation69_spill] sm:$0xff]  ;;  %v9294_v25 = vld [vmem:[#allocation75_spill] sm:$0xff] }
 0x471   : > { %v6123_v20 = vpop.eup %6122  ;;  %4441 = vst [vmem:[%s8230_s21 + $0x558] sm:$0xff] %v6121_v18  ;;  %v5441_v22 = vadd.f32 %v3059_v52, %v8190_v32  ;;  %v2547_v27 = vpop.f32.mrb[153].mxu1  ;;  %6144 = vtanh.f32 %v5440_v38  ;;  %3511 = vmatprep.mubr.f32.mxu1 %v7920_v26  ;;  %3975 = vmatprep.mubr.f32.mxu0 %v7920_v26  ;;  %v9295_v52 = vld [vmem:[#allocation73_spill] sm:$0xff] }
 0x472   : > { %v3061_v41 = vpop.f32.mrb[153].mxu0  ;;  %v6125_v3 = vpop.eup %6124  ;;  %4445 = vst [vmem:[%s8230_s21 + $0x578] sm:$0xff] %v6123_v20  ;;  %v5378_v54 = vadd.f32 %v2547_v27, %v8195_v11  ;;  %6146 = vtanh.f32 %v5377_v29  ;;  %v9296_v20 = vld [vmem:[#allocation79_spill] sm:$0xff]  ;;  %v9297_v29 = vld [vmem:[#allocation77_spill] sm:$0xff] }
 0x473   : > { %v5442_v16 = vadd.f32 %v3061_v41, %v8199_v14  ;;  %v6127_v1 = vpop.eup %6126  ;;  %4447 = vst [vmem:[%s8230_s21 + $0x588] sm:$0xff] %v6125_v3  ;;  %6148 = vtanh.f32 %v5441_v22  ;;  %v2551_v15 = vpop.f32.mrb[154].mxu1  ;;  %v9298_v22 = vld [vmem:[#allocation83_spill] sm:$0xff]  ;;  %v9299_v27 = vld [vmem:[#allocation81_spill] sm:$0xff] }
 0x474   : > { %v6129_v7 = vpop.eup %6128  ;;  %4446 = vst [vmem:[%s8230_s21 + $0x580] sm:$0xff] %v6127_v1  ;;  %v3065_v17 = vpop.f32.mrb[154].mxu0  ;;  %6150 = vtanh.f32 %v5378_v54  ;;  %v5379_v63 = vadd.f32 %v2551_v15, %v8186_v47  ;;  %3512 = vmatmul.mubr.f32.gmra.mrb[196].mxu1 %v7928_v44  ;;  %3976 = vmatmul.mubr.f32.gmra.mrb[196].mxu0 %v7928_v44  ;;  %v9300_v41 = vld [vmem:[#allocation87_spill] sm:$0xff]  ;;  %v9301_v3 = vld [vmem:[#allocation85_spill] sm:$0xff] }
 0x475   : > { %v6131_v45 = vpop.eup %6130  ;;  %4448 = vst [vmem:[%s8230_s21 + $0x590] sm:$0xff] %v6129_v7  ;;  %v5443_v49 = vadd.f32 %v3065_v17, %v8190_v32  ;;  %v2553_v58 = vpop.f32.mrb[155].mxu1  ;;  %6152 = vtanh.f32 %v5442_v16  ;;  %3517 = vmatprep.mubr.f32.mxu1 %v7932_v4  ;;  %3980 = vmatprep.mubr.f32.mxu0 %v7932_v4  ;;  %v9302_v54 = vld [vmem:[#allocation91_spill] sm:$0xff]  ;;  %v9303_v16 = vld [vmem:[#allocation89_spill] sm:$0xff] }
 0x476   : > { %v3067_v26 = vpop.f32.mrb[155].mxu0  ;;  %v6133_v56 = vpop.eup %6132  ;;  %4452 = vst [vmem:[%s8230_s21 + $0x5b0] sm:$0xff] %v6131_v45  ;;  %v5380_v19 = vadd.f32 %v2553_v58, %v8195_v11  ;;  %6154 = vtanh.f32 %v5379_v63  ;;  %v9304_v1 = vld [vmem:[#allocation95_spill] sm:$0xff]  ;;  %v9305_v7 = vld [vmem:[#allocation93_spill] sm:$0xff]  ;;  %v2045_v58 = vsub.s32 6, %v9262_v9 }
 0x477   : > { %v5444_v53 = vadd.f32 %v3067_v26, %v8199_v14  ;;  %v6135_v37 = vpop.eup %6134  ;;  %4454 = vst [vmem:[%s8230_s21 + $0x5c0] sm:$0xff] %v6133_v56  ;;  %6156 = vtanh.f32 %v5443_v49  ;;  %v2557_v44 = vpop.f32.mrb[156].mxu1  ;;  %v9306_v15 = vld [vmem:[#allocation99_spill] sm:$0xff]  ;;  %v9307_v17 = vld [vmem:[#allocation97_spill] sm:$0xff]  ;;  %v2037_v49 = vsub.s32 4, %v9262_v9  ;;  %v2041_v26 = vsub.s32 5, %v9262_v9 }
 0x478   : > { %v6137_v33 = vpop.eup %6136  ;;  %4453 = vst [vmem:[%s8230_s21 + $0x5b8] sm:$0xff] %v6135_v37  ;;  %v3071_v43 = vpop.f32.mrb[156].mxu0  ;;  %6158 = vtanh.f32 %v5380_v19  ;;  %v5381_v31 = vadd.f32 %v2557_v44, %v8186_v47  ;;  %3518 = vmatmul.mubr.f32.gmra.mrb[198].mxu1 %v7940_v13  ;;  %3981 = vmatmul.mubr.f32.gmra.mrb[198].mxu0 %v7940_v13  ;;  %v9308_v45 = vld [vmem:[#allocation103_spill] sm:$0xff]  ;;  %v9309_v63 = vld [vmem:[#allocation101_spill] sm:$0xff] }
 0x479   : > { %v6139_v24 = vpop.eup %6138  ;;  %4455 = vst [vmem:[%s8230_s21 + $0x5c8] sm:$0xff] %v6137_v33  ;;  %v5445_v51 = vadd.f32 %v3071_v43, %v8190_v32  ;;  %v2559_v40 = vpop.f32.mrb[157].mxu1  ;;  %6160 = vtanh.f32 %v5444_v53  ;;  %3523 = vmatprep.mubr.f32.mxu1 %v7944_v39  ;;  %3985 = vmatprep.mubr.f32.mxu0 %v7944_v39  ;;  %v6371_v56 = vld [vmem:[#allocation13] sm:$0xff] }
 0x47a   : > { %v3073_v4 = vpop.f32.mrb[157].mxu0  ;;  %v6141_v42 = vpop.eup %6140  ;;  %4459 = vst [vmem:[%s8230_s21 + $0x5e8] sm:$0xff] %v6139_v24  ;;  %v5382_v46 = vadd.f32 %v2559_v40, %v8195_v11  ;;  %6162 = vtanh.f32 %v5381_v31  ;;  %v8633_v19 = vrot.slane %v6371_v56, %v2037_v49  ;;  %v8635_v53 = vrot.slane %v6371_v56, %v2045_v58 }
 0x47b   : > { %v5446_v59 = vadd.f32 %v3073_v4, %v8199_v14  ;;  %v6143_v21 = vpop.eup %6142  ;;  %4461 = vst [vmem:[%s8230_s21 + $0x5f8] sm:$0xff] %v6141_v42  ;;  %6164 = vtanh.f32 %v5445_v51  ;;  %v2563_v13 = vpop.f32.mrb[158].mxu1  ;;  %v8637_v37 = vrot.slane %v6371_v56, %v2041_v26 }
 0x47c   : > { %v6145_v23 = vpop.eup %6144  ;;  %4460 = vst [vmem:[%s8230_s21 + $0x5f0] sm:$0xff] %v6143_v21  ;;  %v3077_v5 = vpop.f32.mrb[158].mxu0  ;;  %6166 = vtanh.f32 %v5382_v46  ;;  %v5383_v12 = vadd.f32 %v2563_v13, %v8186_v47  ;;  %3524 = vmatmul.mubr.f32.gmra.mrb[200].mxu1 %v7952_v50  ;;  %3986 = vmatmul.mubr.f32.gmra.mrb[200].mxu0 %v7952_v50 }
 0x47d   : > { %v6147_v28 = vpop.eup %6146  ;;  %4462 = vst [vmem:[%s8230_s21 + $0x600] sm:$0xff] %v6145_v23  ;;  %v5447_v8 = vadd.f32 %v3077_v5, %v8190_v32  ;;  %v2565_v6 = vpop.f32.mrb[159].mxu1  ;;  %6168 = vtanh.f32 %v5446_v59  ;;  %3529 = vmatprep.mubr.f32.mxu1 %v7956_v10  ;;  %3990 = vmatprep.mubr.f32.mxu0 %v7956_v10 }
 0x47e   : > { %v3079_v39 = vpop.f32.mrb[159].mxu0  ;;  %v6149_v34 = vpop.eup %6148  ;;  %4466 = vst [vmem:[%s8230_s21 + $0x620] sm:$0xff] %v6147_v28  ;;  %v5384_v35 = vadd.f32 %v2565_v6, %v8195_v11  ;;  %6170 = vtanh.f32 %v5383_v12 }
 0x47f   : > { %v5448_v36 = vadd.f32 %v3079_v39, %v8199_v14  ;;  %v6151_v47 = vpop.eup %6150  ;;  %4468 = vst [vmem:[%s8230_s21 + $0x630] sm:$0xff] %v6149_v34  ;;  %6172 = vtanh.f32 %v5447_v8 }
 0x480   : > { %v6153_v32 = vpop.eup %6152  ;;  %4467 = vst [vmem:[%s8230_s21 + $0x628] sm:$0xff] %v6151_v47  ;;  %6174 = vtanh.f32 %v5384_v35  ;;  %3530 = vmatmul.mubr.f32.gmra.mrb[202].mxu1 %v7964_v48  ;;  %3991 = vmatmul.mubr.f32.gmra.mrb[202].mxu0 %v7964_v48 }
 0x481   : > { %v6155_v50 = vpop.eup %6154  ;;  %4469 = vst [vmem:[%s8230_s21 + $0x638] sm:$0xff] %v6153_v32  ;;  %6176 = vtanh.f32 %v5448_v36  ;;  %3535 = vmatprep.mubr.f32.mxu1 %v7968_v61  ;;  %3995 = vmatprep.mubr.f32.mxu0 %v7968_v61 }
 0x482   : > { %v6157_v11 = vpop.eup %6156  ;;  %4473 = vst [vmem:[%s8230_s21 + $0x658] sm:$0xff] %v6155_v50 }
 0x483   : > { %v6159_v10 = vpop.eup %6158  ;;  %4475 = vst [vmem:[%s8230_s21 + $0x668] sm:$0xff] %v6157_v11 }
 0x484   : > { %v6161_v14 = vpop.eup %6160  ;;  %4474 = vst [vmem:[%s8230_s21 + $0x660] sm:$0xff] %v6159_v10  ;;  %3536 = vmatmul.mubr.f32.gmra.mrb[204].mxu1 %v9291_v60  ;;  %3996 = vmatmul.mubr.f32.gmra.mrb[204].mxu0 %v9291_v60 }
 0x485   : > { %v6163_v62 = vpop.eup %6162  ;;  %4476 = vst [vmem:[%s8230_s21 + $0x670] sm:$0xff] %v6161_v14  ;;  %3541 = vmatprep.mubr.f32.mxu1 %v9292_v30  ;;  %4000 = vmatprep.mubr.f32.mxu0 %v9292_v30 }
 0x486   : > { %v6165_v48 = vpop.eup %6164  ;;  %4480 = vst [vmem:[%s8230_s21 + $0x690] sm:$0xff] %v6163_v62 }
 0x487   : > { %v6167_v61 = vpop.eup %6166  ;;  %4482 = vst [vmem:[%s8230_s21 + $0x6a0] sm:$0xff] %v6165_v48 }
 0x488   : > { %v6169_v2 = vpop.eup %6168  ;;  %4481 = vst [vmem:[%s8230_s21 + $0x698] sm:$0xff] %v6167_v61  ;;  %3542 = vmatmul.mubr.f32.gmra.mrb[206].mxu1 %v9293_v55  ;;  %4001 = vmatmul.mubr.f32.gmra.mrb[206].mxu0 %v9293_v55 }
 0x489   : > { %v6171_v57 = vpop.eup %6170  ;;  %4483 = vst [vmem:[%s8230_s21 + $0x6a8] sm:$0xff] %v6169_v2  ;;  %3547 = vmatprep.mubr.f32.mxu1 %v9294_v25  ;;  %4005 = vmatprep.mubr.f32.mxu0 %v9294_v25 }
 0x48a   : > { %v6173_v38 = vpop.eup %6172  ;;  %4487 = vst [vmem:[%s8230_s21 + $0x6c8] sm:$0xff] %v6171_v57 }
 0x48b   : > { %v6175_v18 = vpop.eup %6174  ;;  %4489 = vst [vmem:[%s8230_s21 + $0x6d8] sm:$0xff] %v6173_v38 }
 0x48c   : > { %v6177_v0 = vpop.eup %6176  ;;  %4488 = vst [vmem:[%s8230_s21 + $0x6d0] sm:$0xff] %v6175_v18  ;;  %3548 = vmatmul.mubr.f32.gmra.mrb[208].mxu1 %v9295_v52  ;;  %4006 = vmatmul.mubr.f32.gmra.mrb[208].mxu0 %v9295_v52 }
 0x48d   : > { %4490 = vst [vmem:[%s8230_s21 + $0x6e0] sm:$0xff] %v6177_v0  ;;  %3553 = vmatprep.mubr.f32.mxu1 %v9296_v20  ;;  %4010 = vmatprep.mubr.f32.mxu0 %v9296_v20 }
 0x490   : > { %3554 = vmatmul.mubr.f32.gmra.mrb[210].mxu1 %v9297_v29  ;;  %4011 = vmatmul.mubr.f32.gmra.mrb[210].mxu0 %v9297_v29 }
 0x491   : > { %3559 = vmatprep.mubr.f32.mxu1 %v9298_v22  ;;  %4015 = vmatprep.mubr.f32.mxu0 %v9298_v22 }
 0x494   : > { %3560 = vmatmul.mubr.f32.gmra.mrb[212].mxu1 %v9299_v27  ;;  %4016 = vmatmul.mubr.f32.gmra.mrb[212].mxu0 %v9299_v27 }
 0x495   : > { %3565 = vmatprep.mubr.f32.mxu1 %v9300_v41  ;;  %4020 = vmatprep.mubr.f32.mxu0 %v9300_v41 }
 0x498   : > { %3566 = vmatmul.mubr.f32.gmra.mrb[214].mxu1 %v9301_v3  ;;  %4021 = vmatmul.mubr.f32.gmra.mrb[214].mxu0 %v9301_v3 }
 0x499   : > { %3571 = vmatprep.mubr.f32.mxu1 %v9302_v54  ;;  %4025 = vmatprep.mubr.f32.mxu0 %v9302_v54 }
 0x49c   : > { %3572 = vmatmul.mubr.f32.gmra.mrb[216].mxu1 %v9303_v16  ;;  %4026 = vmatmul.mubr.f32.gmra.mrb[216].mxu0 %v9303_v16 }
 0x49d   : > { %3577 = vmatprep.mubr.f32.mxu1 %v9304_v1  ;;  %4030 = vmatprep.mubr.f32.mxu0 %v9304_v1 }
 0x4a0   : > { %3578 = vmatmul.mubr.f32.gmra.mrb[218].mxu1 %v9305_v7  ;;  %4031 = vmatmul.mubr.f32.gmra.mrb[218].mxu0 %v9305_v7 }
 0x4a1   : > { %3583 = vmatprep.mubr.f32.mxu1 %v9306_v15  ;;  %4035 = vmatprep.mubr.f32.mxu0 %v9306_v15 }
 0x4a4   : > { %3584 = vmatmul.mubr.f32.gmra.mrb[220].mxu1 %v9307_v17  ;;  %4036 = vmatmul.mubr.f32.gmra.mrb[220].mxu0 %v9307_v17 }
 0x4a5   : > { %3589 = vmatprep.mubr.f32.mxu1 %v9308_v45  ;;  %4040 = vmatprep.mubr.f32.mxu0 %v9308_v45 }
 0x4a8   : > { %3590 = vmatmul.mubr.f32.gmra.mrb[222].mxu1 %v9309_v63  ;;  %4041 = vmatmul.mubr.f32.gmra.mrb[222].mxu0 %v9309_v63 }
 0x4ff   : > { %v3405_v33 = vpop.f32.mrb[160].mxu1  ;;  %v3887_v44 = vpop.f32.mrb[160].mxu0 }
 0x500   : > { %v5449_v43 = vadd.f32 %v3405_v33, %v8633_v19  ;;  %v5513_v24 = vadd.f32 %v3887_v44, %v8635_v53  ;;  %v3407_v31 = vpop.f32.mrb[161].mxu1  ;;  %v3889_v51 = vpop.f32.mrb[161].mxu0 }
 0x501   : > { %v5450_v40 = vadd.f32 %v3407_v31, %v8637_v37 }
 0x502   : > { %6178 = vtanh.f32 %v5449_v43 }
 0x503   : > { %6180 = vtanh.f32 %v5513_v24  ;;  %v3411_v9 = vpop.f32.mrb[162].mxu1  ;;  %v3892_v4 = vpop.f32.mrb[162].mxu0 }
 0x504   : > { %6182 = vtanh.f32 %v5450_v40  ;;  %v5451_v42 = vadd.f32 %v3411_v9, %v8633_v19  ;;  %v5514_v46 = vadd.f32 %v3892_v4, %v8635_v53  ;;  %v3413_v59 = vpop.f32.mrb[163].mxu1  ;;  %v3894_v21 = vpop.f32.mrb[163].mxu0 }
 0x505   : > { %v5452_v23 = vadd.f32 %v3413_v59, %v8637_v37 }
 0x506   : > { %6184 = vtanh.f32 %v5451_v42 }
 0x507   : > { %6186 = vtanh.f32 %v5514_v46  ;;  %v3417_v13 = vpop.f32.mrb[164].mxu1  ;;  %v3897_v5 = vpop.f32.mrb[164].mxu0 }
 0x508   : > { %6188 = vtanh.f32 %v5452_v23  ;;  %v5453_v28 = vadd.f32 %v3417_v13, %v8633_v19  ;;  %v5515_v12 = vadd.f32 %v3897_v5, %v8635_v53  ;;  %v3419_v8 = vpop.f32.mrb[165].mxu1  ;;  %v3899_v6 = vpop.f32.mrb[165].mxu0 }
 0x509   : > { %v5454_v39 = vadd.f32 %v3419_v8, %v8637_v37 }
 0x50a   : > { %6190 = vtanh.f32 %v5453_v28 }
 0x50b   : > { %6192 = vtanh.f32 %v5515_v12  ;;  %v3423_v34 = vpop.f32.mrb[166].mxu1  ;;  %v3902_v35 = vpop.f32.mrb[166].mxu0 }
 0x50c   : > { %v6179_v36 = vpop.eup %6178  ;;  %6194 = vtanh.f32 %v5454_v39  ;;  %v5455_v47 = vadd.f32 %v3423_v34, %v8633_v19  ;;  %v5516_v32 = vadd.f32 %v3902_v35, %v8635_v53  ;;  %v3425_v50 = vpop.f32.mrb[167].mxu1 }
 0x50d   : > { %v3904_v11 = vpop.f32.mrb[167].mxu0  ;;  %v6181_v10 = vpop.eup %6180  ;;  %4274 = vst [vmem:[%s8230_s21 + $0x20] sm:$0xff] %v6179_v36  ;;  %v5456_v14 = vadd.f32 %v3425_v50, %v8637_v37 }
 0x50e   : > { %v6183_v62 = vpop.eup %6182  ;;  %4276 = vst [vmem:[%s8230_s21 + $0x30] sm:$0xff] %v6181_v10  ;;  %6196 = vtanh.f32 %v5455_v47 }
 0x50f   : > { %4275 = vst [vmem:[%s8230_s21 + $0x28] sm:$0xff] %v6183_v62  ;;  %6198 = vtanh.f32 %v5516_v32  ;;  %v3429_v60 = vpop.f32.mrb[168].mxu1  ;;  %v3907_v48 = vpop.f32.mrb[168].mxu0 }
 0x510   : > { %v6185_v30 = vpop.eup %6184  ;;  %6200 = vtanh.f32 %v5456_v14  ;;  %v5457_v61 = vadd.f32 %v3429_v60, %v8633_v19  ;;  %v5517_v2 = vadd.f32 %v3907_v48, %v8635_v53  ;;  %v3431_v57 = vpop.f32.mrb[169].mxu1 }
 0x511   : > { %v3909_v55 = vpop.f32.mrb[169].mxu0  ;;  %v6187_v38 = vpop.eup %6186  ;;  %4281 = vst [vmem:[%s8230_s21 + $0x58] sm:$0xff] %v6185_v30  ;;  %v5458_v25 = vadd.f32 %v3431_v57, %v8637_v37 }
 0x512   : > { %v6189_v18 = vpop.eup %6188  ;;  %4283 = vst [vmem:[%s8230_s21 + $0x68] sm:$0xff] %v6187_v38  ;;  %6202 = vtanh.f32 %v5457_v61 }
 0x513   : > { %4282 = vst [vmem:[%s8230_s21 + $0x60] sm:$0xff] %v6189_v18  ;;  %6204 = vtanh.f32 %v5517_v2  ;;  %v3435_v0 = vpop.f32.mrb[170].mxu1  ;;  %v3912_v52 = vpop.f32.mrb[170].mxu0 }
 0x514   : > { %v6191_v20 = vpop.eup %6190  ;;  %6206 = vtanh.f32 %v5458_v25  ;;  %v5459_v29 = vadd.f32 %v3435_v0, %v8633_v19  ;;  %v5518_v22 = vadd.f32 %v3912_v52, %v8635_v53  ;;  %v3437_v27 = vpop.f32.mrb[171].mxu1 }
 0x515   : > { %v3914_v41 = vpop.f32.mrb[171].mxu0  ;;  %v6193_v3 = vpop.eup %6192  ;;  %4288 = vst [vmem:[%s8230_s21 + $0x90] sm:$0xff] %v6191_v20  ;;  %v5460_v54 = vadd.f32 %v3437_v27, %v8637_v37 }
 0x516   : > { %v6195_v16 = vpop.eup %6194  ;;  %4290 = vst [vmem:[%s8230_s21 + $0xa0] sm:$0xff] %v6193_v3  ;;  %6208 = vtanh.f32 %v5459_v29 }
 0x517   : > { %4289 = vst [vmem:[%s8230_s21 + $0x98] sm:$0xff] %v6195_v16  ;;  %6210 = vtanh.f32 %v5518_v22  ;;  %v3441_v1 = vpop.f32.mrb[172].mxu1  ;;  %v3917_v7 = vpop.f32.mrb[172].mxu0 }
 0x518   : > { %v6197_v15 = vpop.eup %6196  ;;  %6212 = vtanh.f32 %v5460_v54  ;;  %v5461_v17 = vadd.f32 %v3441_v1, %v8633_v19  ;;  %v5519_v45 = vadd.f32 %v3917_v7, %v8635_v53  ;;  %v3443_v63 = vpop.f32.mrb[173].mxu1 }
 0x519   : > { %v3919_v49 = vpop.f32.mrb[173].mxu0  ;;  %v6199_v58 = vpop.eup %6198  ;;  %4295 = vst [vmem:[%s8230_s21 + $0xc8] sm:$0xff] %v6197_v15  ;;  %v5462_v26 = vadd.f32 %v3443_v63, %v8637_v37 }
 0x51a   : > { %v6201_v56 = vpop.eup %6200  ;;  %4297 = vst [vmem:[%s8230_s21 + $0xd8] sm:$0xff] %v6199_v58  ;;  %6214 = vtanh.f32 %v5461_v17 }
 0x51b   : > { %4296 = vst [vmem:[%s8230_s21 + $0xd0] sm:$0xff] %v6201_v56  ;;  %6216 = vtanh.f32 %v5519_v45  ;;  %v3447_v33 = vpop.f32.mrb[174].mxu1  ;;  %v3922_v44 = vpop.f32.mrb[174].mxu0 }
 0x51c   : > { %v6203_v43 = vpop.eup %6202  ;;  %6218 = vtanh.f32 %v5462_v26  ;;  %v5463_v24 = vadd.f32 %v3447_v33, %v8633_v19  ;;  %v5520_v31 = vadd.f32 %v3922_v44, %v8635_v53  ;;  %v3449_v51 = vpop.f32.mrb[175].mxu1 }
 0x51d   : > { %v3924_v40 = vpop.f32.mrb[175].mxu0  ;;  %v6205_v9 = vpop.eup %6204  ;;  %4302 = vst [vmem:[%s8230_s21 + $0x100] sm:$0xff] %v6203_v43  ;;  %v5464_v4 = vadd.f32 %v3449_v51, %v8637_v37 }
 0x51e   : > { %v6207_v42 = vpop.eup %6206  ;;  %4304 = vst [vmem:[%s8230_s21 + $0x110] sm:$0xff] %v6205_v9  ;;  %6220 = vtanh.f32 %v5463_v24 }
 0x51f   : > { %4303 = vst [vmem:[%s8230_s21 + $0x108] sm:$0xff] %v6207_v42  ;;  %6222 = vtanh.f32 %v5520_v31  ;;  %v3453_v46 = vpop.f32.mrb[176].mxu1  ;;  %v3927_v59 = vpop.f32.mrb[176].mxu0 }
 0x520   : > { %v6209_v21 = vpop.eup %6208  ;;  %6224 = vtanh.f32 %v5464_v4  ;;  %v5465_v23 = vadd.f32 %v3453_v46, %v8633_v19  ;;  %v5521_v13 = vadd.f32 %v3927_v59, %v8635_v53  ;;  %v3455_v5 = vpop.f32.mrb[177].mxu1 }
 0x521   : > { %v3929_v28 = vpop.f32.mrb[177].mxu0  ;;  %v6211_v12 = vpop.eup %6210  ;;  %4309 = vst [vmem:[%s8230_s21 + $0x138] sm:$0xff] %v6209_v21  ;;  %v5466_v8 = vadd.f32 %v3455_v5, %v8637_v37 }
 0x522   : > { %v6213_v6 = vpop.eup %6212  ;;  %4311 = vst [vmem:[%s8230_s21 + $0x148] sm:$0xff] %v6211_v12  ;;  %6226 = vtanh.f32 %v5465_v23 }
 0x523   : > { %4310 = vst [vmem:[%s8230_s21 + $0x140] sm:$0xff] %v6213_v6  ;;  %6228 = vtanh.f32 %v5521_v13  ;;  %v3459_v39 = vpop.f32.mrb[178].mxu1  ;;  %v3932_v34 = vpop.f32.mrb[178].mxu0 }
 0x524   : > { %v6215_v35 = vpop.eup %6214  ;;  %6230 = vtanh.f32 %v5466_v8  ;;  %v5467_v36 = vadd.f32 %v3459_v39, %v8633_v19  ;;  %v5522_v47 = vadd.f32 %v3932_v34, %v8635_v53  ;;  %v3461_v32 = vpop.f32.mrb[179].mxu1 }
 0x525   : > { %v3934_v50 = vpop.f32.mrb[179].mxu0  ;;  %v6217_v11 = vpop.eup %6216  ;;  %4316 = vst [vmem:[%s8230_s21 + $0x170] sm:$0xff] %v6215_v35  ;;  %v5468_v10 = vadd.f32 %v3461_v32, %v8637_v37 }
 0x526   : > { %v6219_v14 = vpop.eup %6218  ;;  %4318 = vst [vmem:[%s8230_s21 + $0x180] sm:$0xff] %v6217_v11  ;;  %6232 = vtanh.f32 %v5467_v36 }
 0x527   : > { %4317 = vst [vmem:[%s8230_s21 + $0x178] sm:$0xff] %v6219_v14  ;;  %6234 = vtanh.f32 %v5522_v47  ;;  %v3465_v62 = vpop.f32.mrb[180].mxu1  ;;  %v3937_v60 = vpop.f32.mrb[180].mxu0 }
 0x528   : > { %v6221_v48 = vpop.eup %6220  ;;  %6236 = vtanh.f32 %v5468_v10  ;;  %v5469_v30 = vadd.f32 %v3465_v62, %v8633_v19  ;;  %v5523_v61 = vadd.f32 %v3937_v60, %v8635_v53  ;;  %v3467_v2 = vpop.f32.mrb[181].mxu1 }
 0x529   : > { %v3939_v57 = vpop.f32.mrb[181].mxu0  ;;  %v6223_v55 = vpop.eup %6222  ;;  %4323 = vst [vmem:[%s8230_s21 + $0x1a8] sm:$0xff] %v6221_v48  ;;  %v5470_v38 = vadd.f32 %v3467_v2, %v8637_v37 }
 0x52a   : > { %v6225_v25 = vpop.eup %6224  ;;  %4325 = vst [vmem:[%s8230_s21 + $0x1b8] sm:$0xff] %v6223_v55  ;;  %6238 = vtanh.f32 %v5469_v30 }
 0x52b   : > { %4324 = vst [vmem:[%s8230_s21 + $0x1b0] sm:$0xff] %v6225_v25  ;;  %6240 = vtanh.f32 %v5523_v61  ;;  %v3471_v18 = vpop.f32.mrb[182].mxu1  ;;  %v3942_v0 = vpop.f32.mrb[182].mxu0 }
 0x52c   : > { %v6227_v52 = vpop.eup %6226  ;;  %6242 = vtanh.f32 %v5470_v38  ;;  %v5471_v20 = vadd.f32 %v3471_v18, %v8633_v19  ;;  %v5524_v29 = vadd.f32 %v3942_v0, %v8635_v53  ;;  %v3473_v22 = vpop.f32.mrb[183].mxu1 }
 0x52d   : > { %v3944_v27 = vpop.f32.mrb[183].mxu0  ;;  %v6229_v41 = vpop.eup %6228  ;;  %4330 = vst [vmem:[%s8230_s21 + $0x1e0] sm:$0xff] %v6227_v52  ;;  %v5472_v3 = vadd.f32 %v3473_v22, %v8637_v37 }
 0x52e   : > { %v6231_v54 = vpop.eup %6230  ;;  %4332 = vst [vmem:[%s8230_s21 + $0x1f0] sm:$0xff] %v6229_v41  ;;  %6244 = vtanh.f32 %v5471_v20 }
 0x52f   : > { %4331 = vst [vmem:[%s8230_s21 + $0x1e8] sm:$0xff] %v6231_v54  ;;  %6246 = vtanh.f32 %v5524_v29  ;;  %v3477_v16 = vpop.f32.mrb[184].mxu1  ;;  %v3947_v1 = vpop.f32.mrb[184].mxu0 }
 0x530   : > { %v6233_v7 = vpop.eup %6232  ;;  %6248 = vtanh.f32 %v5472_v3  ;;  %v5473_v15 = vadd.f32 %v3477_v16, %v8633_v19  ;;  %v5525_v17 = vadd.f32 %v3947_v1, %v8635_v53  ;;  %v3479_v45 = vpop.f32.mrb[185].mxu1 }
 0x531   : > { %v3949_v63 = vpop.f32.mrb[185].mxu0  ;;  %v6235_v49 = vpop.eup %6234  ;;  %4337 = vst [vmem:[%s8230_s21 + $0x218] sm:$0xff] %v6233_v7  ;;  %v5474_v58 = vadd.f32 %v3479_v45, %v8637_v37 }
 0x532   : > { %v6237_v26 = vpop.eup %6236  ;;  %4339 = vst [vmem:[%s8230_s21 + $0x228] sm:$0xff] %v6235_v49  ;;  %6250 = vtanh.f32 %v5473_v15 }
 0x533   : > { %4338 = vst [vmem:[%s8230_s21 + $0x220] sm:$0xff] %v6237_v26  ;;  %6252 = vtanh.f32 %v5525_v17  ;;  %v3483_v56 = vpop.f32.mrb[186].mxu1  ;;  %v3952_v33 = vpop.f32.mrb[186].mxu0 }
 0x534   : > { %v6239_v44 = vpop.eup %6238  ;;  %6254 = vtanh.f32 %v5474_v58  ;;  %v5475_v43 = vadd.f32 %v3483_v56, %v8633_v19  ;;  %v5526_v24 = vadd.f32 %v3952_v33, %v8635_v53  ;;  %v3485_v31 = vpop.f32.mrb[187].mxu1 }
 0x535   : > { %v3954_v51 = vpop.f32.mrb[187].mxu0  ;;  %v6241_v40 = vpop.eup %6240  ;;  %4344 = vst [vmem:[%s8230_s21 + $0x250] sm:$0xff] %v6239_v44  ;;  %v5476_v9 = vadd.f32 %v3485_v31, %v8637_v37 }
 0x536   : > { %v6243_v4 = vpop.eup %6242  ;;  %4346 = vst [vmem:[%s8230_s21 + $0x260] sm:$0xff] %v6241_v40  ;;  %6256 = vtanh.f32 %v5475_v43 }
 0x537   : > { %4345 = vst [vmem:[%s8230_s21 + $0x258] sm:$0xff] %v6243_v4  ;;  %6258 = vtanh.f32 %v5526_v24  ;;  %v3489_v42 = vpop.f32.mrb[188].mxu1  ;;  %v3957_v46 = vpop.f32.mrb[188].mxu0 }
 0x538   : > { %v6245_v59 = vpop.eup %6244  ;;  %6260 = vtanh.f32 %v5476_v9  ;;  %v5477_v21 = vadd.f32 %v3489_v42, %v8633_v19  ;;  %v5527_v23 = vadd.f32 %v3957_v46, %v8635_v53  ;;  %v3491_v13 = vpop.f32.mrb[189].mxu1 }
 0x539   : > { %v3959_v5 = vpop.f32.mrb[189].mxu0  ;;  %v6247_v28 = vpop.eup %6246  ;;  %4351 = vst [vmem:[%s8230_s21 + $0x288] sm:$0xff] %v6245_v59  ;;  %v5478_v12 = vadd.f32 %v3491_v13, %v8637_v37 }
 0x53a   : > { %v6249_v8 = vpop.eup %6248  ;;  %4353 = vst [vmem:[%s8230_s21 + $0x298] sm:$0xff] %v6247_v28  ;;  %6262 = vtanh.f32 %v5477_v21 }
 0x53b   : > { %4352 = vst [vmem:[%s8230_s21 + $0x290] sm:$0xff] %v6249_v8  ;;  %6264 = vtanh.f32 %v5527_v23  ;;  %v3495_v6 = vpop.f32.mrb[190].mxu1  ;;  %v3962_v39 = vpop.f32.mrb[190].mxu0 }
 0x53c   : > { %v6251_v34 = vpop.eup %6250  ;;  %6266 = vtanh.f32 %v5478_v12  ;;  %v5479_v35 = vadd.f32 %v3495_v6, %v8633_v19  ;;  %v5528_v36 = vadd.f32 %v3962_v39, %v8635_v53  ;;  %v3497_v47 = vpop.f32.mrb[191].mxu1 }
 0x53d   : > { %v3964_v32 = vpop.f32.mrb[191].mxu0  ;;  %v6253_v50 = vpop.eup %6252  ;;  %4358 = vst [vmem:[%s8230_s21 + $0x2c0] sm:$0xff] %v6251_v34  ;;  %v5480_v11 = vadd.f32 %v3497_v47, %v8637_v37 }
 0x53e   : > { %v6255_v10 = vpop.eup %6254  ;;  %4360 = vst [vmem:[%s8230_s21 + $0x2d0] sm:$0xff] %v6253_v50  ;;  %6268 = vtanh.f32 %v5479_v35 }
 0x53f   : > { %4359 = vst [vmem:[%s8230_s21 + $0x2c8] sm:$0xff] %v6255_v10  ;;  %6270 = vtanh.f32 %v5528_v36  ;;  %v3501_v14 = vpop.f32.mrb[192].mxu1  ;;  %v3967_v62 = vpop.f32.mrb[192].mxu0 }
 0x540   : > { %v6257_v60 = vpop.eup %6256  ;;  %6272 = vtanh.f32 %v5480_v11  ;;  %v5481_v48 = vadd.f32 %v3501_v14, %v8633_v19  ;;  %v5529_v30 = vadd.f32 %v3967_v62, %v8635_v53  ;;  %v3503_v61 = vpop.f32.mrb[193].mxu1 }
 0x541   : > { %v3969_v2 = vpop.f32.mrb[193].mxu0  ;;  %v6259_v57 = vpop.eup %6258  ;;  %4365 = vst [vmem:[%s8230_s21 + $0x2f8] sm:$0xff] %v6257_v60  ;;  %v5482_v55 = vadd.f32 %v3503_v61, %v8637_v37 }
 0x542   : > { %v6261_v38 = vpop.eup %6260  ;;  %4367 = vst [vmem:[%s8230_s21 + $0x308] sm:$0xff] %v6259_v57  ;;  %6274 = vtanh.f32 %v5481_v48 }
 0x543   : > { %4366 = vst [vmem:[%s8230_s21 + $0x300] sm:$0xff] %v6261_v38  ;;  %6276 = vtanh.f32 %v5529_v30  ;;  %v3507_v25 = vpop.f32.mrb[194].mxu1  ;;  %v3972_v18 = vpop.f32.mrb[194].mxu0 }
 0x544   : > { %v6263_v0 = vpop.eup %6262  ;;  %6278 = vtanh.f32 %v5482_v55  ;;  %v5483_v52 = vadd.f32 %v3507_v25, %v8633_v19  ;;  %v5530_v20 = vadd.f32 %v3972_v18, %v8635_v53  ;;  %v3509_v29 = vpop.f32.mrb[195].mxu1 }
 0x545   : > { %v3974_v22 = vpop.f32.mrb[195].mxu0  ;;  %v6265_v27 = vpop.eup %6264  ;;  %4372 = vst [vmem:[%s8230_s21 + $0x330] sm:$0xff] %v6263_v0  ;;  %v5484_v41 = vadd.f32 %v3509_v29, %v8637_v37 }
 0x546   : > { %v6267_v3 = vpop.eup %6266  ;;  %4374 = vst [vmem:[%s8230_s21 + $0x340] sm:$0xff] %v6265_v27  ;;  %6280 = vtanh.f32 %v5483_v52 }
 0x547   : > { %4373 = vst [vmem:[%s8230_s21 + $0x338] sm:$0xff] %v6267_v3  ;;  %6282 = vtanh.f32 %v5530_v20  ;;  %v3513_v54 = vpop.f32.mrb[196].mxu1  ;;  %v3977_v16 = vpop.f32.mrb[196].mxu0 }
 0x548   : > { %v6269_v1 = vpop.eup %6268  ;;  %6284 = vtanh.f32 %v5484_v41  ;;  %v5485_v7 = vadd.f32 %v3513_v54, %v8633_v19  ;;  %v5531_v15 = vadd.f32 %v3977_v16, %v8635_v53  ;;  %v3515_v17 = vpop.f32.mrb[197].mxu1 }
 0x549   : > { %v3979_v45 = vpop.f32.mrb[197].mxu0  ;;  %v6271_v63 = vpop.eup %6270  ;;  %4379 = vst [vmem:[%s8230_s21 + $0x368] sm:$0xff] %v6269_v1  ;;  %v5486_v49 = vadd.f32 %v3515_v17, %v8637_v37 }
 0x54a   : > { %v6273_v58 = vpop.eup %6272  ;;  %4381 = vst [vmem:[%s8230_s21 + $0x378] sm:$0xff] %v6271_v63  ;;  %6286 = vtanh.f32 %v5485_v7 }
 0x54b   : > { %4380 = vst [vmem:[%s8230_s21 + $0x370] sm:$0xff] %v6273_v58  ;;  %6288 = vtanh.f32 %v5531_v15  ;;  %v3519_v26 = vpop.f32.mrb[198].mxu1  ;;  %v3982_v56 = vpop.f32.mrb[198].mxu0 }
 0x54c   : > { %v6275_v33 = vpop.eup %6274  ;;  %6290 = vtanh.f32 %v5486_v49  ;;  %v5487_v44 = vadd.f32 %v3519_v26, %v8633_v19  ;;  %v5532_v43 = vadd.f32 %v3982_v56, %v8635_v53  ;;  %v3521_v24 = vpop.f32.mrb[199].mxu1 }
 0x54d   : > { %v3984_v31 = vpop.f32.mrb[199].mxu0  ;;  %v6277_v51 = vpop.eup %6276  ;;  %4386 = vst [vmem:[%s8230_s21 + $0x3a0] sm:$0xff] %v6275_v33  ;;  %v5488_v40 = vadd.f32 %v3521_v24, %v8637_v37 }
 0x54e   : > { %v6279_v9 = vpop.eup %6278  ;;  %4388 = vst [vmem:[%s8230_s21 + $0x3b0] sm:$0xff] %v6277_v51  ;;  %6292 = vtanh.f32 %v5487_v44 }
 0x54f   : > { %4387 = vst [vmem:[%s8230_s21 + $0x3a8] sm:$0xff] %v6279_v9  ;;  %6294 = vtanh.f32 %v5532_v43  ;;  %v3525_v4 = vpop.f32.mrb[200].mxu1  ;;  %v3987_v42 = vpop.f32.mrb[200].mxu0 }
 0x550   : > { %v6281_v46 = vpop.eup %6280  ;;  %6296 = vtanh.f32 %v5488_v40  ;;  %v5489_v59 = vadd.f32 %v3525_v4, %v8633_v19  ;;  %v5533_v21 = vadd.f32 %v3987_v42, %v8635_v53  ;;  %v3527_v23 = vpop.f32.mrb[201].mxu1 }
 0x551   : > { %v3989_v13 = vpop.f32.mrb[201].mxu0  ;;  %v6283_v5 = vpop.eup %6282  ;;  %4393 = vst [vmem:[%s8230_s21 + $0x3d8] sm:$0xff] %v6281_v46  ;;  %v5490_v28 = vadd.f32 %v3527_v23, %v8637_v37 }
 0x552   : > { %v6285_v12 = vpop.eup %6284  ;;  %4395 = vst [vmem:[%s8230_s21 + $0x3e8] sm:$0xff] %v6283_v5  ;;  %6298 = vtanh.f32 %v5489_v59 }
 0x553   : > { %4394 = vst [vmem:[%s8230_s21 + $0x3e0] sm:$0xff] %v6285_v12  ;;  %6300 = vtanh.f32 %v5533_v21  ;;  %v3531_v8 = vpop.f32.mrb[202].mxu1  ;;  %v3992_v6 = vpop.f32.mrb[202].mxu0 }
 0x554   : > { %v6287_v39 = vpop.eup %6286  ;;  %6302 = vtanh.f32 %v5490_v28  ;;  %v5491_v34 = vadd.f32 %v3531_v8, %v8633_v19  ;;  %v5534_v35 = vadd.f32 %v3992_v6, %v8635_v53  ;;  %v3533_v36 = vpop.f32.mrb[203].mxu1 }
 0x555   : > { %v3994_v47 = vpop.f32.mrb[203].mxu0  ;;  %v6289_v32 = vpop.eup %6288  ;;  %4400 = vst [vmem:[%s8230_s21 + $0x410] sm:$0xff] %v6287_v39  ;;  %v5492_v50 = vadd.f32 %v3533_v36, %v8637_v37 }
 0x556   : > { %v6291_v11 = vpop.eup %6290  ;;  %4402 = vst [vmem:[%s8230_s21 + $0x420] sm:$0xff] %v6289_v32  ;;  %6304 = vtanh.f32 %v5491_v34 }
 0x557   : > { %4401 = vst [vmem:[%s8230_s21 + $0x418] sm:$0xff] %v6291_v11  ;;  %6306 = vtanh.f32 %v5534_v35  ;;  %v3537_v10 = vpop.f32.mrb[204].mxu1  ;;  %v3997_v14 = vpop.f32.mrb[204].mxu0 }
 0x558   : > { %v6293_v62 = vpop.eup %6292  ;;  %6308 = vtanh.f32 %v5492_v50  ;;  %v5493_v60 = vadd.f32 %v3537_v10, %v8633_v19  ;;  %v5535_v48 = vadd.f32 %v3997_v14, %v8635_v53  ;;  %v3539_v30 = vpop.f32.mrb[205].mxu1 }
 0x559   : > { %v3999_v61 = vpop.f32.mrb[205].mxu0  ;;  %v6295_v2 = vpop.eup %6294  ;;  %4407 = vst [vmem:[%s8230_s21 + $0x448] sm:$0xff] %v6293_v62  ;;  %v5494_v57 = vadd.f32 %v3539_v30, %v8637_v37 }
 0x55a   : > { %v6297_v55 = vpop.eup %6296  ;;  %4409 = vst [vmem:[%s8230_s21 + $0x458] sm:$0xff] %v6295_v2  ;;  %6310 = vtanh.f32 %v5493_v60 }
 0x55b   : > { %4408 = vst [vmem:[%s8230_s21 + $0x450] sm:$0xff] %v6297_v55  ;;  %6312 = vtanh.f32 %v5535_v48  ;;  %v3543_v38 = vpop.f32.mrb[206].mxu1  ;;  %v4002_v25 = vpop.f32.mrb[206].mxu0 }
 0x55c   : > { %v6299_v18 = vpop.eup %6298  ;;  %6314 = vtanh.f32 %v5494_v57  ;;  %v5495_v0 = vadd.f32 %v3543_v38, %v8633_v19  ;;  %v5536_v52 = vadd.f32 %v4002_v25, %v8635_v53  ;;  %v3545_v20 = vpop.f32.mrb[207].mxu1 }
 0x55d   : > { %v4004_v29 = vpop.f32.mrb[207].mxu0  ;;  %v6301_v22 = vpop.eup %6300  ;;  %4414 = vst [vmem:[%s8230_s21 + $0x480] sm:$0xff] %v6299_v18  ;;  %v5496_v27 = vadd.f32 %v3545_v20, %v8637_v37 }
 0x55e   : > { %v6303_v41 = vpop.eup %6302  ;;  %4416 = vst [vmem:[%s8230_s21 + $0x490] sm:$0xff] %v6301_v22  ;;  %6316 = vtanh.f32 %v5495_v0 }
 0x55f   : > { %4415 = vst [vmem:[%s8230_s21 + $0x488] sm:$0xff] %v6303_v41  ;;  %6318 = vtanh.f32 %v5536_v52  ;;  %v3549_v3 = vpop.f32.mrb[208].mxu1  ;;  %v4007_v54 = vpop.f32.mrb[208].mxu0 }
 0x560   : > { %v6305_v16 = vpop.eup %6304  ;;  %6320 = vtanh.f32 %v5496_v27  ;;  %v5497_v1 = vadd.f32 %v3549_v3, %v8633_v19  ;;  %v5537_v7 = vadd.f32 %v4007_v54, %v8635_v53  ;;  %v3551_v15 = vpop.f32.mrb[209].mxu1 }
 0x561   : > { %v4009_v17 = vpop.f32.mrb[209].mxu0  ;;  %v6307_v45 = vpop.eup %6306  ;;  %4421 = vst [vmem:[%s8230_s21 + $0x4b8] sm:$0xff] %v6305_v16  ;;  %v5498_v63 = vadd.f32 %v3551_v15, %v8637_v37 }
 0x562   : > { %v6309_v49 = vpop.eup %6308  ;;  %4423 = vst [vmem:[%s8230_s21 + $0x4c8] sm:$0xff] %v6307_v45  ;;  %6322 = vtanh.f32 %v5497_v1 }
 0x563   : > { %4422 = vst [vmem:[%s8230_s21 + $0x4c0] sm:$0xff] %v6309_v49  ;;  %6324 = vtanh.f32 %v5537_v7  ;;  %v3555_v58 = vpop.f32.mrb[210].mxu1  ;;  %v4012_v26 = vpop.f32.mrb[210].mxu0 }
 0x564   : > { %v6311_v56 = vpop.eup %6310  ;;  %6326 = vtanh.f32 %v5498_v63  ;;  %v5499_v33 = vadd.f32 %v3555_v58, %v8633_v19  ;;  %v5538_v44 = vadd.f32 %v4012_v26, %v8635_v53  ;;  %v3557_v43 = vpop.f32.mrb[211].mxu1 }
 0x565   : > { %v4014_v24 = vpop.f32.mrb[211].mxu0  ;;  %v6313_v31 = vpop.eup %6312  ;;  %4428 = vst [vmem:[%s8230_s21 + $0x4f0] sm:$0xff] %v6311_v56  ;;  %v5500_v51 = vadd.f32 %v3557_v43, %v8637_v37 }
 0x566   : > { %v6315_v40 = vpop.eup %6314  ;;  %4430 = vst [vmem:[%s8230_s21 + $0x500] sm:$0xff] %v6313_v31  ;;  %6328 = vtanh.f32 %v5499_v33 }
 0x567   : > { %4429 = vst [vmem:[%s8230_s21 + $0x4f8] sm:$0xff] %v6315_v40  ;;  %6330 = vtanh.f32 %v5538_v44  ;;  %v3561_v9 = vpop.f32.mrb[212].mxu1  ;;  %v4017_v4 = vpop.f32.mrb[212].mxu0 }
 0x568   : > { %v6317_v42 = vpop.eup %6316  ;;  %6332 = vtanh.f32 %v5500_v51  ;;  %v5501_v46 = vadd.f32 %v3561_v9, %v8633_v19  ;;  %v5539_v59 = vadd.f32 %v4017_v4, %v8635_v53  ;;  %v3563_v21 = vpop.f32.mrb[213].mxu1 }
 0x569   : > { %v4019_v23 = vpop.f32.mrb[213].mxu0  ;;  %v6319_v13 = vpop.eup %6318  ;;  %4435 = vst [vmem:[%s8230_s21 + $0x528] sm:$0xff] %v6317_v42  ;;  %v5502_v5 = vadd.f32 %v3563_v21, %v8637_v37 }
 0x56a   : > { %v6321_v28 = vpop.eup %6320  ;;  %4437 = vst [vmem:[%s8230_s21 + $0x538] sm:$0xff] %v6319_v13  ;;  %6334 = vtanh.f32 %v5501_v46 }
 0x56b   : > { %4436 = vst [vmem:[%s8230_s21 + $0x530] sm:$0xff] %v6321_v28  ;;  %6336 = vtanh.f32 %v5539_v59  ;;  %v3567_v12 = vpop.f32.mrb[214].mxu1  ;;  %v4022_v8 = vpop.f32.mrb[214].mxu0 }
 0x56c   : > { %v6323_v6 = vpop.eup %6322  ;;  %6338 = vtanh.f32 %v5502_v5  ;;  %v5503_v39 = vadd.f32 %v3567_v12, %v8633_v19  ;;  %v5540_v34 = vadd.f32 %v4022_v8, %v8635_v53  ;;  %v3569_v35 = vpop.f32.mrb[215].mxu1 }
 0x56d   : > { %v4024_v36 = vpop.f32.mrb[215].mxu0  ;;  %v6325_v47 = vpop.eup %6324  ;;  %4442 = vst [vmem:[%s8230_s21 + $0x560] sm:$0xff] %v6323_v6  ;;  %v5504_v32 = vadd.f32 %v3569_v35, %v8637_v37 }
 0x56e   : > { %v6327_v50 = vpop.eup %6326  ;;  %4444 = vst [vmem:[%s8230_s21 + $0x570] sm:$0xff] %v6325_v47  ;;  %6340 = vtanh.f32 %v5503_v39 }
 0x56f   : > { %4443 = vst [vmem:[%s8230_s21 + $0x568] sm:$0xff] %v6327_v50  ;;  %6342 = vtanh.f32 %v5540_v34  ;;  %v3573_v11 = vpop.f32.mrb[216].mxu1  ;;  %v4027_v10 = vpop.f32.mrb[216].mxu0 }
 0x570   : > { %v6329_v14 = vpop.eup %6328  ;;  %6344 = vtanh.f32 %v5504_v32  ;;  %v5505_v62 = vadd.f32 %v3573_v11, %v8633_v19  ;;  %v5541_v60 = vadd.f32 %v4027_v10, %v8635_v53  ;;  %v3575_v48 = vpop.f32.mrb[217].mxu1 }
 0x571   : > { %v4029_v30 = vpop.f32.mrb[217].mxu0  ;;  %v6331_v61 = vpop.eup %6330  ;;  %4449 = vst [vmem:[%s8230_s21 + $0x598] sm:$0xff] %v6329_v14  ;;  %v5506_v2 = vadd.f32 %v3575_v48, %v8637_v37 }
 0x572   : > { %v6333_v57 = vpop.eup %6332  ;;  %4451 = vst [vmem:[%s8230_s21 + $0x5a8] sm:$0xff] %v6331_v61  ;;  %6346 = vtanh.f32 %v5505_v62 }
 0x573   : > { %4450 = vst [vmem:[%s8230_s21 + $0x5a0] sm:$0xff] %v6333_v57  ;;  %6348 = vtanh.f32 %v5541_v60  ;;  %v3579_v55 = vpop.f32.mrb[218].mxu1  ;;  %v4032_v38 = vpop.f32.mrb[218].mxu0 }
 0x574   : > { %v6335_v25 = vpop.eup %6334  ;;  %6350 = vtanh.f32 %v5506_v2  ;;  %v5507_v18 = vadd.f32 %v3579_v55, %v8633_v19  ;;  %v5542_v0 = vadd.f32 %v4032_v38, %v8635_v53  ;;  %v3581_v52 = vpop.f32.mrb[219].mxu1 }
 0x575   : > { %v4034_v20 = vpop.f32.mrb[219].mxu0  ;;  %v6337_v29 = vpop.eup %6336  ;;  %4456 = vst [vmem:[%s8230_s21 + $0x5d0] sm:$0xff] %v6335_v25  ;;  %v5508_v22 = vadd.f32 %v3581_v52, %v8637_v37 }
 0x576   : > { %v6339_v27 = vpop.eup %6338  ;;  %4458 = vst [vmem:[%s8230_s21 + $0x5e0] sm:$0xff] %v6337_v29  ;;  %6352 = vtanh.f32 %v5507_v18 }
 0x577   : > { %4457 = vst [vmem:[%s8230_s21 + $0x5d8] sm:$0xff] %v6339_v27  ;;  %6354 = vtanh.f32 %v5542_v0  ;;  %v3585_v41 = vpop.f32.mrb[220].mxu1  ;;  %v4037_v3 = vpop.f32.mrb[220].mxu0 }
 0x578   : > { %v6341_v54 = vpop.eup %6340  ;;  %6356 = vtanh.f32 %v5508_v22  ;;  %v5509_v16 = vadd.f32 %v3585_v41, %v8633_v19  ;;  %v5543_v1 = vadd.f32 %v4037_v3, %v8635_v53  ;;  %v3587_v7 = vpop.f32.mrb[221].mxu1 }
 0x579   : > { %v4039_v15 = vpop.f32.mrb[221].mxu0  ;;  %v6343_v17 = vpop.eup %6342  ;;  %4463 = vst [vmem:[%s8230_s21 + $0x608] sm:$0xff] %v6341_v54  ;;  %v5510_v45 = vadd.f32 %v3587_v7, %v8637_v37 }
 0x57a   : > { %v6345_v63 = vpop.eup %6344  ;;  %4465 = vst [vmem:[%s8230_s21 + $0x618] sm:$0xff] %v6343_v17  ;;  %6358 = vtanh.f32 %v5509_v16 }
 0x57b   : > { %4464 = vst [vmem:[%s8230_s21 + $0x610] sm:$0xff] %v6345_v63  ;;  %6360 = vtanh.f32 %v5543_v1  ;;  %v3591_v49 = vpop.f32.mrb[222].mxu1  ;;  %v4042_v58 = vpop.f32.mrb[222].mxu0 }
 0x57c   : > { %v6347_v26 = vpop.eup %6346  ;;  %6362 = vtanh.f32 %v5510_v45  ;;  %v5511_v56 = vadd.f32 %v3591_v49, %v8633_v19  ;;  %v5544_v33 = vadd.f32 %v4042_v58, %v8635_v53  ;;  %v3593_v44 = vpop.f32.mrb[223].mxu1 }
 0x57d   : > { %v4044_v43 = vpop.f32.mrb[223].mxu0  ;;  %v6349_v24 = vpop.eup %6348  ;;  %4470 = vst [vmem:[%s8230_s21 + $0x640] sm:$0xff] %v6347_v26  ;;  %v5512_v31 = vadd.f32 %v3593_v44, %v8637_v37 }
 0x57e   : > { %v6351_v51 = vpop.eup %6350  ;;  %4472 = vst [vmem:[%s8230_s21 + $0x650] sm:$0xff] %v6349_v24  ;;  %6364 = vtanh.f32 %v5511_v56 }
 0x57f   : > { %4471 = vst [vmem:[%s8230_s21 + $0x648] sm:$0xff] %v6351_v51  ;;  %6366 = vtanh.f32 %v5544_v33 }
 0x580   : > { %v6353_v19 = vpop.eup %6352  ;;  %6368 = vtanh.f32 %v5512_v31 }
 0x581   : > { %v6355_v53 = vpop.eup %6354  ;;  %4477 = vst [vmem:[%s8230_s21 + $0x678] sm:$0xff] %v6353_v19 }
 0x582   : > { %v6357_v40 = vpop.eup %6356  ;;  %4479 = vst [vmem:[%s8230_s21 + $0x688] sm:$0xff] %v6355_v53 }
 0x583   : > { %4478 = vst [vmem:[%s8230_s21 + $0x680] sm:$0xff] %v6357_v40 }
 0x584   : > { %v6359_v37 = vpop.eup %6358 }
 0x585   : > { %v6361_v9 = vpop.eup %6360  ;;  %4484 = vst [vmem:[%s8230_s21 + $0x6b0] sm:$0xff] %v6359_v37 }
 0x586   : > { %v6363_v4 = vpop.eup %6362  ;;  %4486 = vst [vmem:[%s8230_s21 + $0x6c0] sm:$0xff] %v6361_v9 }
 0x587   : > { %4485 = vst [vmem:[%s8230_s21 + $0x6b8] sm:$0xff] %v6363_v4 }
 0x588   : > { %v6365_v42 = vpop.eup %6364 }
 0x589   : > { %v6367_v46 = vpop.eup %6366  ;;  %4491 = vst [vmem:[%s8230_s21 + $0x6e8] sm:$0xff] %v6365_v42 }
 0x58a   : > { %v6369_v59 = vpop.eup %6368  ;;  %4493 = vst [vmem:[%s8230_s21 + $0x6f8] sm:$0xff] %v6367_v46 }
 0x58b   : > { %4492 = vst [vmem:[%s8230_s21 + $0x6f0] sm:$0xff] %v6369_v59 }
 0x58c   : > { %6583 = shalt.err (!%p6580_p8)
}
 0x58d   : > { %s6584_s22 = scalar_lea.hbm %s8833_s28, 28672  ;;  %s6588_s8 = scalar_lea.hbm %s8889_s7, 57344 }
 0x58e   : > { %p6585_p7 = scmp.ne.s32.totalorder %s8833_s28, %s6584_s22  ;;  %p6589_p3 = scmp.lt.u32.totalorder %s8833_s28, %s8889_s7 }
 0x58f   : > { %p6590_p0 = scmp.lt.u32.totalorder %s6588_s8, %s6584_s22  ;;  %p6592_p6 = scmp.lt.u32.totalorder %s6584_s22, %s8833_s28 }
 0x590   : > { %p6586_p9 = pnand %p6585_p7, %p9310_p5 }
 0x591   : > { %p6591_p2 = por %p6590_p0, %p6589_p3 }
 0x592   : > { %p6587_p4 = pneg %p6586_p9 }
 0x593   : > { %p6593_p10 = por %p6592_p6, %p6591_p2 }
 0x595   : > { %p6594_p1 = pnand %p6593_p10, %p6587_p4 }
 0x597   : > { %6597 = shalt.err (!%p6594_p1)
}
 0x598   : > { %s6668_s16 = smov 896   ;;  %s6669_s19 = smov 56  }
 0x599   : > { %5829 = dma.vmem_to_hbm [thread:$0]  (%p9310_p5), %s8835_s15, 28672, %s8833_s28, %s4495_s30, %s6668_s16, %s6668_s16, %s6669_s19  }
 0x59a PF: > { %s4524_s12 = sand.u32 1, %s6636_s24   ;;  %p9311_p11 = scmp.ne.s32.totalorder %s9080_s29, 0 }
 0x59b   : > { %p9312_p12 = scmp.ge.s32.totalorder %s6648_s27, 2  ;;  %s4525_s9 = scalar_lea.sflag [#allocation4], %s4524_s12 }
 0x59d   : > { %p5855_p13 = pnand %p9312_p12, %p9311_p11 }
 0x59f   : > { %6631 = dma.done.wait (!%p5855_p13), %s4525_s9, 28672  }
 0x5a0   : > { %6633 = vsyncadd (!%p5855_p13), %s4525_s9, 4294938624  ;;  %p23_p8 = scmp.ge.s32.totalorder %s6882_s11, 4   ;;  %s9313_s24 = smov %s6640_s25 }
 0x5a1   : > { %s9314_s25 = smov %s6644_s26  ;;  %s9315_s26 = smov %s6893_s18 }
 0x5a2   : > { %s9316_s27 = smov %s6882_s11  ;;  %25 = sbr.rel (!%p23_p8) target bundleno = 10 (0xa), region = 117 }
 0x5a9   :  { %4530 = vsyncpa [#allocation3], 1 }
 0x5aa   :  { %4532 = vsyncpa [#allocation3 + $0x1], 1 }
 0x5ab   :  { %4533 = vsyncpa [#allocation6], 1 }
 0x5ac   :  { %4534 = vsyncpa [#allocation9], 1 }
 0x5ad   :  { %4535 = vsyncpa [#allocation12], 1 }
 0x5ae   :  { %4536 = vsyncpa [#allocation4], 1 }
 0x5af   :  { %4538 = vsyncpa [#allocation4 + $0x1], 1 }

</bundles_post_ra>
